<compile_context>
chip_gen: v5e
topology: v5e:2x2
jax: 0.10.0
libtpu: 0.0.40
codegen_flags: <defaults>
</compile_context>

<pallas_src>
import numpy as np
import jax
import jax.numpy as jnp
from jax import lax
from jax.experimental import pallas as pl
from jax.experimental.pallas import tpu as pltpu

H = W = 224
N = H * W                 # 50176
RM = 392                  # 392 * 128 == 50176, 392 = 49*8 -> (8,128)-tileable
CH = 8                    # rows per streaming chunk (one f32 vreg)
INV_N = 1.0 / float(N)
EPS_BN = 1e-5             # BatchNorm2d default eps
EPS_LN = 1e-5             # LayerNorm default eps


def partial_quant_kernel(scal_ref, x_ref, gw_ref, o_ref, acc_ref):
    # scal_ref: (8,) f32 SMEM (scalar-prefetch)
    #   [0:3] fused per-channel weights A0..A2   [3] fused bias B
    #   [4]   a   = 2 * sub.conv1.weight  (fp32 x+x folded in, sign preserved)
    #   [5]   c2w = conv2.weight
    #   [6]   C1  = sum(ln_gamma * lin_w)
    #   [7]   D   = c2w*sum(ln_beta*lin_w) + conv2.bias*sum(lin_w) + lin_b
    # x_ref : (3, 392, 128) f32 VMEM  lane-slice of the 3 input planes
    # gw_ref: (392, 128)    f32 VMEM  matching lane-slice of ln_gamma * lin_w
    # o_ref : (1, 1) f32 SMEM output
    # acc_ref: (3,) f32 SMEM scratch — running S1, S2, S3 across grid steps
    step = pl.program_id(0)

    @pl.when(step == 0)
    def _init():
        acc_ref[0] = jnp.float32(0.0)
        acc_ref[1] = jnp.float32(0.0)
        acc_ref[2] = jnp.float32(0.0)

    # hoist SMEM scalar reads + broadcasts once (not re-broadcast per chunk)
    a0 = jnp.full((CH, 128), scal_ref[0], jnp.float32)
    a1 = jnp.full((CH, 128), scal_ref[1], jnp.float32)
    a2 = jnp.full((CH, 128), scal_ref[2], jnp.float32)
    b = jnp.full((CH, 128), scal_ref[3], jnp.float32)

    def body(i, carry):
        p1, p2, p3 = carry
        r = pl.multiple_of(i * CH, CH)
        x0 = x_ref[0, pl.ds(r, CH), :]
        x1 = x_ref[1, pl.ds(r, CH), :]
        x2 = x_ref[2, pl.ds(r, CH), :]
        g = gw_ref[pl.ds(r, CH), :]
        # fused conv(3->1) -> bn -> conv1 -> bn1 -> sub.conv -> sub.bn, then relu
        z = jnp.maximum(x0 * a0 + x1 * a1 + x2 * a2 + b, 0.0)
        return (p1 + z, p2 + z * z, p3 + z * g)

    zero = jnp.zeros((CH, 128), jnp.float32)
    p1, p2, p3 = lax.fori_loop(0, RM // CH, body, (zero, zero, zero),
                               unroll=True)

    # one cross-lane (XLU) collapse per quantity, accumulated across steps
    acc_ref[0] += jnp.sum(p1)
    acc_ref[1] += jnp.sum(p2)
    acc_ref[2] += jnp.sum(p3)

    @pl.when(step == pl.num_programs(0) - 1)
    def _finalize():
        # sub.conv1 + fp32(x+x) + LayerNorm + conv2 + Linear: all scalar math
        a = scal_ref[4]
        c2w = scal_ref[5]
        c1 = scal_ref[6]
        d = scal_ref[7]
        s1 = acc_ref[0]
        s2 = acc_ref[1]
        s3 = acc_ref[2]
        mean = s1 * INV_N
        # single-pass variance (E[z^2]-E[z]^2) in f32; fine for this data regime
        var = jnp.maximum(s2 * INV_N - mean * mean, 0.0)
        inv_std = lax.rsqrt(a * a * var + EPS_LN)
        o_ref[0, 0] = c2w * a * inv_std * (s3 - mean * c1) + d


def fold_partial_quant_params(params, *, num_steps=1):
    """One-time host-side (numpy) fold of all per-pixel affine params.

    Runs at model init only — NOT on the per-call path.
    Returns (scal (8,) f32, gw (392, 128*num_steps) f32) as device arrays.
    """
    p = {k: np.asarray(v, dtype=np.float64) for k, v in params.items()}
    eps = EPS_BN
    s_bn = p["bn_g"][0] / np.sqrt(p["bn_rv"][0] + eps)
    t_bn = p["bn_b"][0] - p["bn_rm"][0] * s_bn
    s_bn1 = p["bn1_g"][0] / np.sqrt(p["bn1_rv"][0] + eps)
    t_bn1 = p["bn1_b"][0] - p["bn1_rm"][0] * s_bn1
    s_sbn = p["sbn_g"][0] / np.sqrt(p["sbn_rv"][0] + eps)
    t_sbn = p["sbn_b"][0] - p["sbn_rm"][0] * s_sbn

    # compose y -> y*s + t across bn, conv1, bn1, sub.conv, sub.bn
    s, t = 1.0, 0.0
    for sc, bi in ((s_bn, t_bn),
                   (p["conv1_w"][0], p["conv1_b"][0]),
                   (s_bn1, t_bn1),
                   (p["sconv_w"][0], p["sconv_b"][0]),
                   (s_sbn, t_sbn)):
        s = s * sc
        t = t * sc + bi

    A = p["conv_w"] * s                       # (3,) effective channel weights
    B = p["conv_b"][0] * s + t                # effective bias

    # post-ReLU: u = sub.conv1(z); fp32 doubles it -> a*z + const (const cancels
    # in LayerNorm centering).  Keep 'a' with its sign.
    a = 2.0 * p["sconv1_w"][0]

    lin_w = p["lin_w"]
    gw = (p["ln_g"] * lin_w).reshape(RM, 128 * num_steps).astype(np.float32)
    c1 = np.sum(p["ln_g"] * lin_w)
    c2 = np.sum(p["ln_b"] * lin_w)
    wsum = np.sum(lin_w)
    c2w = p["conv2_w"][0]
    d = c2w * c2 + p["conv2_b"][0] * wsum + p["lin_b"][0]

    scal = np.array([A[0], A[1], A[2], B, a, c2w, c1, d], dtype=np.float32)
    return jnp.asarray(scal), jnp.asarray(gw)


def partial_quant_forward(x_nchw, scal, gw, *, num_steps=1):
    """x_nchw: (1, 3, 224, 224) f32 -> (1, 1) f32.

    scal/gw come from fold_partial_quant_params (computed once at init).
    num_steps=1 (v6e/v7x) or 2 (v5e: 2-deep DMA/compute pipeline over lane
    slices; blocks stay (8,128)-aligned).
    """
    lanes = 128 * num_steps
    # pure reshape: each channel plane (224,224) -> lane-dense (392, 128*steps)
    x3 = x_nchw.reshape(3, RM, lanes).astype(jnp.float32)

    grid_spec = pltpu.PrefetchScalarGridSpec(
        num_scalar_prefetch=1,
        grid=(num_steps,),
        in_specs=[
            pl.BlockSpec((3, RM, 128), lambda s, scal_ref: (0, 0, s)),  # x
            pl.BlockSpec((RM, 128), lambda s, scal_ref: (0, s)),        # gw
        ],
        out_specs=pl.BlockSpec(memory_space=pltpu.MemorySpace.SMEM),
        scratch_shapes=[pltpu.SMEM((3,), jnp.float32)],
    )

    return pl.pallas_call(
        partial_quant_kernel,
        out_shape=jax.ShapeDtypeStruct((1, 1), jnp.float32),
        grid_spec=grid_spec,
        compiler_params=pltpu.CompilerParams(
            dimension_semantics=("arbitrary",)),
        cost_estimate=pl.CostEstimate(
            flops=9 * N, transcendentals=0,
            bytes_accessed=4 * (3 * N + N + 8 + 1)),
    )(scal, x3, gw)


def _default_num_steps():
    """2-step pipeline only pays off on v5e (slow HBM); single step elsewhere."""
    try:
        kind = jax.devices()[0].device_kind.lower()
    except Exception:
        return 1
    if "v5e" in kind or "v5 lite" in kind or "v5lite" in kind:
        return 2
    return 1


def reference_forward(x_nchw, p):
    """Pure-JAX, step-by-step reference of the module forward (validation)."""
    eps = 1e-5
    x = x_nchw[0]
    y = x[0] * p["conv_w"][0] + x[1] * p["conv_w"][1] + x[2] * p["conv_w"][2] + p["conv_b"][0]
    y = (y - p["bn_rm"][0]) * p["bn_g"][0] / jnp.sqrt(p["bn_rv"][0] + eps) + p["bn_b"][0]
    y = y * p["conv1_w"][0] + p["conv1_b"][0]
    y = (y - p["bn1_rm"][0]) * p["bn1_g"][0] / jnp.sqrt(p["bn1_rv"][0] + eps) + p["bn1_b"][0]
    # sub-module
    y = y * p["sconv_w"][0] + p["sconv_b"][0]
    y = (y - p["sbn_rm"][0]) * p["sbn_g"][0] / jnp.sqrt(p["sbn_rv"][0] + eps) + p["sbn_b"][0]
    y = jnp.maximum(y, 0.0)
    y = y * p["sconv1_w"][0] + p["sconv1_b"][0]
    y = y + y                                   # FP32Model: channels == 1
    mean = jnp.mean(y)
    var = jnp.mean((y - mean) ** 2)
    y = (y - mean) / jnp.sqrt(var + eps) * p["ln_g"] + p["ln_b"]
    # back in the outer model
    y = y * p["conv2_w"][0] + p["conv2_b"][0]
    out = jnp.sum(y * p["lin_w"]) + p["lin_b"][0]
    return out.reshape(1, 1)


def make_params(key):
    ks = jax.random.split(key, 16)
    f32 = jnp.float32
    return {
        # conv: Conv2d(3, 1, 1)
        "conv_w": jax.random.normal(ks[0], (3,), f32) * 0.3,
        "conv_b": jax.random.normal(ks[1], (1,), f32) * 0.1,
        # bn: BatchNorm2d(1) (inference running stats)
        "bn_g": jnp.array([1.1], f32), "bn_b": jnp.array([0.05], f32),
        "bn_rm": jnp.array([0.02], f32), "bn_rv": jnp.array([0.9], f32),
        # conv1: Conv2d(1, 1, 1)
        "conv1_w": jax.random.normal(ks[2], (1,), f32) * 0.4 + 1.0,
        "conv1_b": jax.random.normal(ks[3], (1,), f32) * 0.1,
        # bn1: BatchNorm2d(1)
        "bn1_g": jnp.array([0.9], f32), "bn1_b": jnp.array([-0.02], f32),
        "bn1_rm": jnp.array([0.01], f32), "bn1_rv": jnp.array([1.05], f32),
        # sub.conv / sub.bn / sub.conv1
        "sconv_w": jax.random.normal(ks[4], (1,), f32) * 0.4 + 1.0,
        "sconv_b": jax.random.normal(ks[5], (1,), f32) * 0.1,
        "sbn_g": jnp.array([0.95], f32), "sbn_b": jnp.array([-0.03], f32),
        "sbn_rm": jnp.array([-0.01], f32), "sbn_rv": jnp.array([1.1], f32),
        "sconv1_w": jax.random.normal(ks[6], (1,), f32) * 0.4 + 1.0,
        "sconv1_b": jax.random.normal(ks[7], (1,), f32) * 0.1,
        # sub.norm: LayerNorm([1, 224, 224]) affine params, stored as (H, W)
        "ln_g": jax.random.normal(ks[8], (H, W), f32) * 0.1 + 1.0,
        "ln_b": jax.random.normal(ks[9], (H, W), f32) * 0.1,
        # conv2: Conv2d(1, 1, 1)
        "conv2_w": jax.random.normal(ks[10], (1,), f32) * 0.4 + 1.0,
        "conv2_b": jax.random.normal(ks[11], (1,), f32) * 0.1,
        # linear: Linear(224*224, 1); weight kept as (H, W) = flattened row-major
        "lin_w": jax.random.normal(ks[12], (H, W), f32) * (1.0 / N) ** 0.5,
        "lin_b": jax.random.normal(ks[13], (1,), f32) * 0.1,
    }


if __name__ == "__main__":
    key = jax.random.PRNGKey(0)
    pkey, xkey = jax.random.split(key)
    params = make_params(pkey)
    # batch=1, channels=3, H=W=224 are hard-wired by LayerNorm([1,224,224]),
    # Linear(224*224, 1) and view(1, -1).
    x = jax.random.normal(xkey, (1, 3, H, W), jnp.float32)

    # ---- one-time init (host-side fold, no per-call XLA launches) ----
    num_steps = _default_num_steps()
    scal, gw = fold_partial_quant_params(params, num_steps=num_steps)
    fwd = jax.jit(partial_quant_forward, static_argnames=("num_steps",))

    # ---- per-call path: reshape + single pallas_call ----
    out = jax.block_until_ready(fwd(x, scal, gw, num_steps=num_steps))
    ref = jax.block_until_ready(reference_forward(x, params))

    assert out.shape == (1, 1) and out.dtype == jnp.float32
    assert jnp.allclose(out, ref, rtol=1e-3, atol=1e-3), (out, ref)
    print("KERNEL_OK")
</pallas_src>

<mosaic_0001>
module attributes {stable_mosaic.version = 11 : i64} {
  func.func @partial_quant_kernel(%arg0: i32, %arg1: memref<8xf32, #tpu.memory_space<smem>>, %arg2: memref<3x392x128xf32, #tpu.memory_space<vmem>>, %arg3: memref<392x128xf32, #tpu.memory_space<vmem>>, %arg4: memref<1x1xf32, #tpu.memory_space<smem>>, %arg5: memref<3xf32, #tpu.memory_space<smem>>) attributes {dimension_semantics = [#tpu.dimension_semantics<arbitrary>], iteration_bounds = array<i64: 1>, scalar_prefetch = 1 : i64, scratch_operands = 1 : i64, tpu.core_type = #tpu.core_type<tc>, window_params = [{transform_indices = @transform_0, window_bounds = array<i64: 3, 392, 128>}, {transform_indices = @transform_1, window_bounds = array<i64: 392, 128>}, {transform_indices = @transform_2, window_bounds = array<i64: 1, 1>}]} {
    %c0_i32 = arith.constant 0 : i32
    %0 = arith.cmpi eq, %arg0, %c0_i32 : i32
    %1 = arith.extui %0 : i1 to i32
    %c0_i32_0 = arith.constant 0 : i32
    %2 = arith.cmpi ne, %1, %c0_i32_0 : i32
    scf.if %2 {
      %cst_454 = arith.constant 0.000000e+00 : f32
      %c0_455 = arith.constant 0 : index
      %1310 = memref.load %arg5[%c0_455] : memref<3xf32, #tpu.memory_space<smem>>
      memref.store %cst_454, %arg5[%c0_455] : memref<3xf32, #tpu.memory_space<smem>>
      %cst_456 = arith.constant 0.000000e+00 : f32
      %c1_457 = arith.constant 1 : index
      %1311 = memref.load %arg5[%c1_457] : memref<3xf32, #tpu.memory_space<smem>>
      memref.store %cst_456, %arg5[%c1_457] : memref<3xf32, #tpu.memory_space<smem>>
      %cst_458 = arith.constant 0.000000e+00 : f32
      %c2_459 = arith.constant 2 : index
      %1312 = memref.load %arg5[%c2_459] : memref<3xf32, #tpu.memory_space<smem>>
      memref.store %cst_458, %arg5[%c2_459] : memref<3xf32, #tpu.memory_space<smem>>
    } else {
    }
    %c0 = arith.constant 0 : index
    %3 = memref.load %arg1[%c0] : memref<8xf32, #tpu.memory_space<smem>>
    %4 = vector.broadcast %3 : f32 to vector<8x128xf32>
    %c1 = arith.constant 1 : index
    %5 = memref.load %arg1[%c1] : memref<8xf32, #tpu.memory_space<smem>>
    %6 = vector.broadcast %5 : f32 to vector<8x128xf32>
    %c2 = arith.constant 2 : index
    %7 = memref.load %arg1[%c2] : memref<8xf32, #tpu.memory_space<smem>>
    %8 = vector.broadcast %7 : f32 to vector<8x128xf32>
    %c3 = arith.constant 3 : index
    %9 = memref.load %arg1[%c3] : memref<8xf32, #tpu.memory_space<smem>>
    %10 = vector.broadcast %9 : f32 to vector<8x128xf32>
    %cst = arith.constant 0.000000e+00 : f32
    %11 = vector.broadcast %cst : f32 to vector<8x128xf32>
    %c0_i32_1 = arith.constant 0 : i32
    %c8_i32 = arith.constant 8 : i32
    %12 = arith.muli %c0_i32_1, %c8_i32 : i32
    %13 = tpu.assume_multiple %12, 8 : i32
    %c0_2 = arith.constant 0 : index
    %14 = arith.index_cast %13 : i32 to index
    %c0_3 = arith.constant 0 : index
    %15 = vector.load %arg2[%c0_2, %14, %c0_3] : memref<3x392x128xf32, #tpu.memory_space<vmem>>, vector<1x8x128xf32>
    %16 = vector.shape_cast %15 : vector<1x8x128xf32> to vector<8x128xf32>
    %c1_4 = arith.constant 1 : index
    %17 = arith.index_cast %13 : i32 to index
    %c0_5 = arith.constant 0 : index
    %18 = vector.load %arg2[%c1_4, %17, %c0_5] : memref<3x392x128xf32, #tpu.memory_space<vmem>>, vector<1x8x128xf32>
    %19 = vector.shape_cast %18 : vector<1x8x128xf32> to vector<8x128xf32>
    %c2_6 = arith.constant 2 : index
    %20 = arith.index_cast %13 : i32 to index
    %c0_7 = arith.constant 0 : index
    %21 = vector.load %arg2[%c2_6, %20, %c0_7] : memref<3x392x128xf32, #tpu.memory_space<vmem>>, vector<1x8x128xf32>
    %22 = vector.shape_cast %21 : vector<1x8x128xf32> to vector<8x128xf32>
    %23 = arith.index_cast %13 : i32 to index
    %c0_8 = arith.constant 0 : index
    %24 = vector.load %arg3[%23, %c0_8] : memref<392x128xf32, #tpu.memory_space<vmem>>, vector<8x128xf32>
    %25 = arith.mulf %16, %4 : vector<8x128xf32>
    %26 = arith.mulf %19, %6 : vector<8x128xf32>
    %27 = arith.addf %25, %26 : vector<8x128xf32>
    %28 = arith.mulf %22, %8 : vector<8x128xf32>
    %29 = arith.addf %27, %28 : vector<8x128xf32>
    %30 = arith.addf %29, %10 : vector<8x128xf32>
    %cst_9 = arith.constant 0.000000e+00 : f32
    %31 = vector.broadcast %cst_9 : f32 to vector<8x128xf32>
    %32 = arith.maximumf %30, %31 : vector<8x128xf32>
    %33 = arith.addf %11, %32 : vector<8x128xf32>
    %34 = arith.mulf %32, %32 : vector<8x128xf32>
    %35 = arith.addf %11, %34 : vector<8x128xf32>
    %36 = arith.mulf %32, %24 : vector<8x128xf32>
    %37 = arith.addf %11, %36 : vector<8x128xf32>
    %c1_i32 = arith.constant 1 : i32
    %c8_i32_10 = arith.constant 8 : i32
    %38 = arith.muli %c1_i32, %c8_i32_10 : i32
    %39 = tpu.assume_multiple %38, 8 : i32
    %c0_11 = arith.constant 0 : index
    %40 = arith.index_cast %39 : i32 to index
    %c0_12 = arith.constant 0 : index
    %41 = vector.load %arg2[%c0_11, %40, %c0_12] : memref<3x392x128xf32, #tpu.memory_space<vmem>>, vector<1x8x128xf32>
    %42 = vector.shape_cast %41 : vector<1x8x128xf32> to vector<8x128xf32>
    %c1_13 = arith.constant 1 : index
    %43 = arith.index_cast %39 : i32 to index
    %c0_14 = arith.constant 0 : index
    %44 = vector.load %arg2[%c1_13, %43, %c0_14] : memref<3x392x128xf32, #tpu.memory_space<vmem>>, vector<1x8x128xf32>
    %45 = vector.shape_cast %44 : vector<1x8x128xf32> to vector<8x128xf32>
    %c2_15 = arith.constant 2 : index
    %46 = arith.index_cast %39 : i32 to index
    %c0_16 = arith.constant 0 : index
    %47 = vector.load %arg2[%c2_15, %46, %c0_16] : memref<3x392x128xf32, #tpu.memory_space<vmem>>, vector<1x8x128xf32>
    %48 = vector.shape_cast %47 : vector<1x8x128xf32> to vector<8x128xf32>
    %49 = arith.index_cast %39 : i32 to index
    %c0_17 = arith.constant 0 : index
    %50 = vector.load %arg3[%49, %c0_17] : memref<392x128xf32, #tpu.memory_space<vmem>>, vector<8x128xf32>
    %51 = arith.mulf %42, %4 : vector<8x128xf32>
    %52 = arith.mulf %45, %6 : vector<8x128xf32>
    %53 = arith.addf %51, %52 : vector<8x128xf32>
    %54 = arith.mulf %48, %8 : vector<8x128xf32>
    %55 = arith.addf %53, %54 : vector<8x128xf32>
    %56 = arith.addf %55, %10 : vector<8x128xf32>
    %cst_18 = arith.constant 0.000000e+00 : f32
    %57 = vector.broadcast %cst_18 : f32 to vector<8x128xf32>
    %58 = arith.maximumf %56, %57 : vector<8x128xf32>
    %59 = arith.addf %33, %58 : vector<8x128xf32>
    %60 = arith.mulf %58, %58 : vector<8x128xf32>
    %61 = arith.addf %35, %60 : vector<8x128xf32>
    %62 = arith.mulf %58, %50 : vector<8x128xf32>
    %63 = arith.addf %37, %62 : vector<8x128xf32>
    %c2_i32 = arith.constant 2 : i32
    %c8_i32_19 = arith.constant 8 : i32
    %64 = arith.muli %c2_i32, %c8_i32_19 : i32
    %65 = tpu.assume_multiple %64, 8 : i32
    %c0_20 = arith.constant 0 : index
    %66 = arith.index_cast %65 : i32 to index
    %c0_21 = arith.constant 0 : index
    %67 = vector.load %arg2[%c0_20, %66, %c0_21] : memref<3x392x128xf32, #tpu.memory_space<vmem>>, vector<1x8x128xf32>
    %68 = vector.shape_cast %67 : vector<1x8x128xf32> to vector<8x128xf32>
    %c1_22 = arith.constant 1 : index
    %69 = arith.index_cast %65 : i32 to index
    %c0_23 = arith.constant 0 : index
    %70 = vector.load %arg2[%c1_22, %69, %c0_23] : memref<3x392x128xf32, #tpu.memory_space<vmem>>, vector<1x8x128xf32>
    %71 = vector.shape_cast %70 : vector<1x8x128xf32> to vector<8x128xf32>
    %c2_24 = arith.constant 2 : index
    %72 = arith.index_cast %65 : i32 to index
    %c0_25 = arith.constant 0 : index
    %73 = vector.load %arg2[%c2_24, %72, %c0_25] : memref<3x392x128xf32, #tpu.memory_space<vmem>>, vector<1x8x128xf32>
    %74 = vector.shape_cast %73 : vector<1x8x128xf32> to vector<8x128xf32>
    %75 = arith.index_cast %65 : i32 to index
    %c0_26 = arith.constant 0 : index
    %76 = vector.load %arg3[%75, %c0_26] : memref<392x128xf32, #tpu.memory_space<vmem>>, vector<8x128xf32>
    %77 = arith.mulf %68, %4 : vector<8x128xf32>
    %78 = arith.mulf %71, %6 : vector<8x128xf32>
    %79 = arith.addf %77, %78 : vector<8x128xf32>
    %80 = arith.mulf %74, %8 : vector<8x128xf32>
    %81 = arith.addf %79, %80 : vector<8x128xf32>
    %82 = arith.addf %81, %10 : vector<8x128xf32>
    %cst_27 = arith.constant 0.000000e+00 : f32
    %83 = vector.broadcast %cst_27 : f32 to vector<8x128xf32>
    %84 = arith.maximumf %82, %83 : vector<8x128xf32>
    %85 = arith.addf %59, %84 : vector<8x128xf32>
    %86 = arith.mulf %84, %84 : vector<8x128xf32>
    %87 = arith.addf %61, %86 : vector<8x128xf32>
    %88 = arith.mulf %84, %76 : vector<8x128xf32>
    %89 = arith.addf %63, %88 : vector<8x128xf32>
    %c3_i32 = arith.constant 3 : i32
    %c8_i32_28 = arith.constant 8 : i32
    %90 = arith.muli %c3_i32, %c8_i32_28 : i32
    %91 = tpu.assume_multiple %90, 8 : i32
    %c0_29 = arith.constant 0 : index
    %92 = arith.index_cast %91 : i32 to index
    %c0_30 = arith.constant 0 : index
    %93 = vector.load %arg2[%c0_29, %92, %c0_30] : memref<3x392x128xf32, #tpu.memory_space<vmem>>, vector<1x8x128xf32>
    %94 = vector.shape_cast %93 : vector<1x8x128xf32> to vector<8x128xf32>
    %c1_31 = arith.constant 1 : index
    %95 = arith.index_cast %91 : i32 to index
    %c0_32 = arith.constant 0 : index
    %96 = vector.load %arg2[%c1_31, %95, %c0_32] : memref<3x392x128xf32, #tpu.memory_space<vmem>>, vector<1x8x128xf32>
    %97 = vector.shape_cast %96 : vector<1x8x128xf32> to vector<8x128xf32>
    %c2_33 = arith.constant 2 : index
    %98 = arith.index_cast %91 : i32 to index
    %c0_34 = arith.constant 0 : index
    %99 = vector.load %arg2[%c2_33, %98, %c0_34] : memref<3x392x128xf32, #tpu.memory_space<vmem>>, vector<1x8x128xf32>
    %100 = vector.shape_cast %99 : vector<1x8x128xf32> to vector<8x128xf32>
    %101 = arith.index_cast %91 : i32 to index
    %c0_35 = arith.constant 0 : index
    %102 = vector.load %arg3[%101, %c0_35] : memref<392x128xf32, #tpu.memory_space<vmem>>, vector<8x128xf32>
    %103 = arith.mulf %94, %4 : vector<8x128xf32>
    %104 = arith.mulf %97, %6 : vector<8x128xf32>
    %105 = arith.addf %103, %104 : vector<8x128xf32>
    %106 = arith.mulf %100, %8 : vector<8x128xf32>
    %107 = arith.addf %105, %106 : vector<8x128xf32>
    %108 = arith.addf %107, %10 : vector<8x128xf32>
    %cst_36 = arith.constant 0.000000e+00 : f32
    %109 = vector.broadcast %cst_36 : f32 to vector<8x128xf32>
    %110 = arith.maximumf %108, %109 : vector<8x128xf32>
    %111 = arith.addf %85, %110 : vector<8x128xf32>
    %112 = arith.mulf %110, %110 : vector<8x128xf32>
    %113 = arith.addf %87, %112 : vector<8x128xf32>
    %114 = arith.mulf %110, %102 : vector<8x128xf32>
    %115 = arith.addf %89, %114 : vector<8x128xf32>
    %c4_i32 = arith.constant 4 : i32
    %c8_i32_37 = arith.constant 8 : i32
    %116 = arith.muli %c4_i32, %c8_i32_37 : i32
    %117 = tpu.assume_multiple %116, 8 : i32
    %c0_38 = arith.constant 0 : index
    %118 = arith.index_cast %117 : i32 to index
    %c0_39 = arith.constant 0 : index
    %119 = vector.load %arg2[%c0_38, %118, %c0_39] : memref<3x392x128xf32, #tpu.memory_space<vmem>>, vector<1x8x128xf32>
    %120 = vector.shape_cast %119 : vector<1x8x128xf32> to vector<8x128xf32>
    %c1_40 = arith.constant 1 : index
    %121 = arith.index_cast %117 : i32 to index
    %c0_41 = arith.constant 0 : index
    %122 = vector.load %arg2[%c1_40, %121, %c0_41] : memref<3x392x128xf32, #tpu.memory_space<vmem>>, vector<1x8x128xf32>
    %123 = vector.shape_cast %122 : vector<1x8x128xf32> to vector<8x128xf32>
    %c2_42 = arith.constant 2 : index
    %124 = arith.index_cast %117 : i32 to index
    %c0_43 = arith.constant 0 : index
    %125 = vector.load %arg2[%c2_42, %124, %c0_43] : memref<3x392x128xf32, #tpu.memory_space<vmem>>, vector<1x8x128xf32>
    %126 = vector.shape_cast %125 : vector<1x8x128xf32> to vector<8x128xf32>
    %127 = arith.index_cast %117 : i32 to index
    %c0_44 = arith.constant 0 : index
    %128 = vector.load %arg3[%127, %c0_44] : memref<392x128xf32, #tpu.memory_space<vmem>>, vector<8x128xf32>
    %129 = arith.mulf %120, %4 : vector<8x128xf32>
    %130 = arith.mulf %123, %6 : vector<8x128xf32>
    %131 = arith.addf %129, %130 : vector<8x128xf32>
    %132 = arith.mulf %126, %8 : vector<8x128xf32>
    %133 = arith.addf %131, %132 : vector<8x128xf32>
    %134 = arith.addf %133, %10 : vector<8x128xf32>
    %cst_45 = arith.constant 0.000000e+00 : f32
    %135 = vector.broadcast %cst_45 : f32 to vector<8x128xf32>
    %136 = arith.maximumf %134, %135 : vector<8x128xf32>
    %137 = arith.addf %111, %136 : vector<8x128xf32>
    %138 = arith.mulf %136, %136 : vector<8x128xf32>
    %139 = arith.addf %113, %138 : vector<8x128xf32>
    %140 = arith.mulf %136, %128 : vector<8x128xf32>
    %141 = arith.addf %115, %140 : vector<8x128xf32>
    %c5_i32 = arith.constant 5 : i32
    %c8_i32_46 = arith.constant 8 : i32
    %142 = arith.muli %c5_i32, %c8_i32_46 : i32
    %143 = tpu.assume_multiple %142, 8 : i32
    %c0_47 = arith.constant 0 : index
    %144 = arith.index_cast %143 : i32 to index
    %c0_48 = arith.constant 0 : index
    %145 = vector.load %arg2[%c0_47, %144, %c0_48] : memref<3x392x128xf32, #tpu.memory_space<vmem>>, vector<1x8x128xf32>
    %146 = vector.shape_cast %145 : vector<1x8x128xf32> to vector<8x128xf32>
    %c1_49 = arith.constant 1 : index
    %147 = arith.index_cast %143 : i32 to index
    %c0_50 = arith.constant 0 : index
    %148 = vector.load %arg2[%c1_49, %147, %c0_50] : memref<3x392x128xf32, #tpu.memory_space<vmem>>, vector<1x8x128xf32>
    %149 = vector.shape_cast %148 : vector<1x8x128xf32> to vector<8x128xf32>
    %c2_51 = arith.constant 2 : index
    %150 = arith.index_cast %143 : i32 to index
    %c0_52 = arith.constant 0 : index
    %151 = vector.load %arg2[%c2_51, %150, %c0_52] : memref<3x392x128xf32, #tpu.memory_space<vmem>>, vector<1x8x128xf32>
    %152 = vector.shape_cast %151 : vector<1x8x128xf32> to vector<8x128xf32>
    %153 = arith.index_cast %143 : i32 to index
    %c0_53 = arith.constant 0 : index
    %154 = vector.load %arg3[%153, %c0_53] : memref<392x128xf32, #tpu.memory_space<vmem>>, vector<8x128xf32>
    %155 = arith.mulf %146, %4 : vector<8x128xf32>
    %156 = arith.mulf %149, %6 : vector<8x128xf32>
    %157 = arith.addf %155, %156 : vector<8x128xf32>
    %158 = arith.mulf %152, %8 : vector<8x128xf32>
    %159 = arith.addf %157, %158 : vector<8x128xf32>
    %160 = arith.addf %159, %10 : vector<8x128xf32>
    %cst_54 = arith.constant 0.000000e+00 : f32
    %161 = vector.broadcast %cst_54 : f32 to vector<8x128xf32>
    %162 = arith.maximumf %160, %161 : vector<8x128xf32>
    %163 = arith.addf %137, %162 : vector<8x128xf32>
    %164 = arith.mulf %162, %162 : vector<8x128xf32>
    %165 = arith.addf %139, %164 : vector<8x128xf32>
    %166 = arith.mulf %162, %154 : vector<8x128xf32>
    %167 = arith.addf %141, %166 : vector<8x128xf32>
    %c6_i32 = arith.constant 6 : i32
    %c8_i32_55 = arith.constant 8 : i32
    %168 = arith.muli %c6_i32, %c8_i32_55 : i32
    %169 = tpu.assume_multiple %168, 8 : i32
    %c0_56 = arith.constant 0 : index
    %170 = arith.index_cast %169 : i32 to index
    %c0_57 = arith.constant 0 : index
    %171 = vector.load %arg2[%c0_56, %170, %c0_57] : memref<3x392x128xf32, #tpu.memory_space<vmem>>, vector<1x8x128xf32>
    %172 = vector.shape_cast %171 : vector<1x8x128xf32> to vector<8x128xf32>
    %c1_58 = arith.constant 1 : index
    %173 = arith.index_cast %169 : i32 to index
    %c0_59 = arith.constant 0 : index
    %174 = vector.load %arg2[%c1_58, %173, %c0_59] : memref<3x392x128xf32, #tpu.memory_space<vmem>>, vector<1x8x128xf32>
    %175 = vector.shape_cast %174 : vector<1x8x128xf32> to vector<8x128xf32>
    %c2_60 = arith.constant 2 : index
    %176 = arith.index_cast %169 : i32 to index
    %c0_61 = arith.constant 0 : index
    %177 = vector.load %arg2[%c2_60, %176, %c0_61] : memref<3x392x128xf32, #tpu.memory_space<vmem>>, vector<1x8x128xf32>
    %178 = vector.shape_cast %177 : vector<1x8x128xf32> to vector<8x128xf32>
    %179 = arith.index_cast %169 : i32 to index
    %c0_62 = arith.constant 0 : index
    %180 = vector.load %arg3[%179, %c0_62] : memref<392x128xf32, #tpu.memory_space<vmem>>, vector<8x128xf32>
    %181 = arith.mulf %172, %4 : vector<8x128xf32>
    %182 = arith.mulf %175, %6 : vector<8x128xf32>
    %183 = arith.addf %181, %182 : vector<8x128xf32>
    %184 = arith.mulf %178, %8 : vector<8x128xf32>
    %185 = arith.addf %183, %184 : vector<8x128xf32>
    %186 = arith.addf %185, %10 : vector<8x128xf32>
    %cst_63 = arith.constant 0.000000e+00 : f32
    %187 = vector.broadcast %cst_63 : f32 to vector<8x128xf32>
    %188 = arith.maximumf %186, %187 : vector<8x128xf32>
    %189 = arith.addf %163, %188 : vector<8x128xf32>
    %190 = arith.mulf %188, %188 : vector<8x128xf32>
    %191 = arith.addf %165, %190 : vector<8x128xf32>
    %192 = arith.mulf %188, %180 : vector<8x128xf32>
    %193 = arith.addf %167, %192 : vector<8x128xf32>
    %c7_i32 = arith.constant 7 : i32
    %c8_i32_64 = arith.constant 8 : i32
    %194 = arith.muli %c7_i32, %c8_i32_64 : i32
    %195 = tpu.assume_multiple %194, 8 : i32
    %c0_65 = arith.constant 0 : index
    %196 = arith.index_cast %195 : i32 to index
    %c0_66 = arith.constant 0 : index
    %197 = vector.load %arg2[%c0_65, %196, %c0_66] : memref<3x392x128xf32, #tpu.memory_space<vmem>>, vector<1x8x128xf32>
    %198 = vector.shape_cast %197 : vector<1x8x128xf32> to vector<8x128xf32>
    %c1_67 = arith.constant 1 : index
    %199 = arith.index_cast %195 : i32 to index
    %c0_68 = arith.constant 0 : index
    %200 = vector.load %arg2[%c1_67, %199, %c0_68] : memref<3x392x128xf32, #tpu.memory_space<vmem>>, vector<1x8x128xf32>
    %201 = vector.shape_cast %200 : vector<1x8x128xf32> to vector<8x128xf32>
    %c2_69 = arith.constant 2 : index
    %202 = arith.index_cast %195 : i32 to index
    %c0_70 = arith.constant 0 : index
    %203 = vector.load %arg2[%c2_69, %202, %c0_70] : memref<3x392x128xf32, #tpu.memory_space<vmem>>, vector<1x8x128xf32>
    %204 = vector.shape_cast %203 : vector<1x8x128xf32> to vector<8x128xf32>
    %205 = arith.index_cast %195 : i32 to index
    %c0_71 = arith.constant 0 : index
    %206 = vector.load %arg3[%205, %c0_71] : memref<392x128xf32, #tpu.memory_space<vmem>>, vector<8x128xf32>
    %207 = arith.mulf %198, %4 : vector<8x128xf32>
    %208 = arith.mulf %201, %6 : vector<8x128xf32>
    %209 = arith.addf %207, %208 : vector<8x128xf32>
    %210 = arith.mulf %204, %8 : vector<8x128xf32>
    %211 = arith.addf %209, %210 : vector<8x128xf32>
    %212 = arith.addf %211, %10 : vector<8x128xf32>
    %cst_72 = arith.constant 0.000000e+00 : f32
    %213 = vector.broadcast %cst_72 : f32 to vector<8x128xf32>
    %214 = arith.maximumf %212, %213 : vector<8x128xf32>
    %215 = arith.addf %189, %214 : vector<8x128xf32>
    %216 = arith.mulf %214, %214 : vector<8x128xf32>
    %217 = arith.addf %191, %216 : vector<8x128xf32>
    %218 = arith.mulf %214, %206 : vector<8x128xf32>
    %219 = arith.addf %193, %218 : vector<8x128xf32>
    %c8_i32_73 = arith.constant 8 : i32
    %c8_i32_74 = arith.constant 8 : i32
    %220 = arith.muli %c8_i32_73, %c8_i32_74 : i32
    %221 = tpu.assume_multiple %220, 8 : i32
    %c0_75 = arith.constant 0 : index
    %222 = arith.index_cast %221 : i32 to index
    %c0_76 = arith.constant 0 : index
    %223 = vector.load %arg2[%c0_75, %222, %c0_76] : memref<3x392x128xf32, #tpu.memory_space<vmem>>, vector<1x8x128xf32>
    %224 = vector.shape_cast %223 : vector<1x8x128xf32> to vector<8x128xf32>
    %c1_77 = arith.constant 1 : index
    %225 = arith.index_cast %221 : i32 to index
    %c0_78 = arith.constant 0 : index
    %226 = vector.load %arg2[%c1_77, %225, %c0_78] : memref<3x392x128xf32, #tpu.memory_space<vmem>>, vector<1x8x128xf32>
    %227 = vector.shape_cast %226 : vector<1x8x128xf32> to vector<8x128xf32>
    %c2_79 = arith.constant 2 : index
    %228 = arith.index_cast %221 : i32 to index
    %c0_80 = arith.constant 0 : index
    %229 = vector.load %arg2[%c2_79, %228, %c0_80] : memref<3x392x128xf32, #tpu.memory_space<vmem>>, vector<1x8x128xf32>
    %230 = vector.shape_cast %229 : vector<1x8x128xf32> to vector<8x128xf32>
    %231 = arith.index_cast %221 : i32 to index
    %c0_81 = arith.constant 0 : index
    %232 = vector.load %arg3[%231, %c0_81] : memref<392x128xf32, #tpu.memory_space<vmem>>, vector<8x128xf32>
    %233 = arith.mulf %224, %4 : vector<8x128xf32>
    %234 = arith.mulf %227, %6 : vector<8x128xf32>
    %235 = arith.addf %233, %234 : vector<8x128xf32>
    %236 = arith.mulf %230, %8 : vector<8x128xf32>
    %237 = arith.addf %235, %236 : vector<8x128xf32>
    %238 = arith.addf %237, %10 : vector<8x128xf32>
    %cst_82 = arith.constant 0.000000e+00 : f32
    %239 = vector.broadcast %cst_82 : f32 to vector<8x128xf32>
    %240 = arith.maximumf %238, %239 : vector<8x128xf32>
    %241 = arith.addf %215, %240 : vector<8x128xf32>
    %242 = arith.mulf %240, %240 : vector<8x128xf32>
    %243 = arith.addf %217, %242 : vector<8x128xf32>
    %244 = arith.mulf %240, %232 : vector<8x128xf32>
    %245 = arith.addf %219, %244 : vector<8x128xf32>
    %c9_i32 = arith.constant 9 : i32
    %c8_i32_83 = arith.constant 8 : i32
    %246 = arith.muli %c9_i32, %c8_i32_83 : i32
    %247 = tpu.assume_multiple %246, 8 : i32
    %c0_84 = arith.constant 0 : index
    %248 = arith.index_cast %247 : i32 to index
    %c0_85 = arith.constant 0 : index
    %249 = vector.load %arg2[%c0_84, %248, %c0_85] : memref<3x392x128xf32, #tpu.memory_space<vmem>>, vector<1x8x128xf32>
    %250 = vector.shape_cast %249 : vector<1x8x128xf32> to vector<8x128xf32>
    %c1_86 = arith.constant 1 : index
    %251 = arith.index_cast %247 : i32 to index
    %c0_87 = arith.constant 0 : index
    %252 = vector.load %arg2[%c1_86, %251, %c0_87] : memref<3x392x128xf32, #tpu.memory_space<vmem>>, vector<1x8x128xf32>
    %253 = vector.shape_cast %252 : vector<1x8x128xf32> to vector<8x128xf32>
    %c2_88 = arith.constant 2 : index
    %254 = arith.index_cast %247 : i32 to index
    %c0_89 = arith.constant 0 : index
    %255 = vector.load %arg2[%c2_88, %254, %c0_89] : memref<3x392x128xf32, #tpu.memory_space<vmem>>, vector<1x8x128xf32>
    %256 = vector.shape_cast %255 : vector<1x8x128xf32> to vector<8x128xf32>
    %257 = arith.index_cast %247 : i32 to index
    %c0_90 = arith.constant 0 : index
    %258 = vector.load %arg3[%257, %c0_90] : memref<392x128xf32, #tpu.memory_space<vmem>>, vector<8x128xf32>
    %259 = arith.mulf %250, %4 : vector<8x128xf32>
    %260 = arith.mulf %253, %6 : vector<8x128xf32>
    %261 = arith.addf %259, %260 : vector<8x128xf32>
    %262 = arith.mulf %256, %8 : vector<8x128xf32>
    %263 = arith.addf %261, %262 : vector<8x128xf32>
    %264 = arith.addf %263, %10 : vector<8x128xf32>
    %cst_91 = arith.constant 0.000000e+00 : f32
    %265 = vector.broadcast %cst_91 : f32 to vector<8x128xf32>
    %266 = arith.maximumf %264, %265 : vector<8x128xf32>
    %267 = arith.addf %241, %266 : vector<8x128xf32>
    %268 = arith.mulf %266, %266 : vector<8x128xf32>
    %269 = arith.addf %243, %268 : vector<8x128xf32>
    %270 = arith.mulf %266, %258 : vector<8x128xf32>
    %271 = arith.addf %245, %270 : vector<8x128xf32>
    %c10_i32 = arith.constant 10 : i32
    %c8_i32_92 = arith.constant 8 : i32
    %272 = arith.muli %c10_i32, %c8_i32_92 : i32
    %273 = tpu.assume_multiple %272, 8 : i32
    %c0_93 = arith.constant 0 : index
    %274 = arith.index_cast %273 : i32 to index
    %c0_94 = arith.constant 0 : index
    %275 = vector.load %arg2[%c0_93, %274, %c0_94] : memref<3x392x128xf32, #tpu.memory_space<vmem>>, vector<1x8x128xf32>
    %276 = vector.shape_cast %275 : vector<1x8x128xf32> to vector<8x128xf32>
    %c1_95 = arith.constant 1 : index
    %277 = arith.index_cast %273 : i32 to index
    %c0_96 = arith.constant 0 : index
    %278 = vector.load %arg2[%c1_95, %277, %c0_96] : memref<3x392x128xf32, #tpu.memory_space<vmem>>, vector<1x8x128xf32>
    %279 = vector.shape_cast %278 : vector<1x8x128xf32> to vector<8x128xf32>
    %c2_97 = arith.constant 2 : index
    %280 = arith.index_cast %273 : i32 to index
    %c0_98 = arith.constant 0 : index
    %281 = vector.load %arg2[%c2_97, %280, %c0_98] : memref<3x392x128xf32, #tpu.memory_space<vmem>>, vector<1x8x128xf32>
    %282 = vector.shape_cast %281 : vector<1x8x128xf32> to vector<8x128xf32>
    %283 = arith.index_cast %273 : i32 to index
    %c0_99 = arith.constant 0 : index
    %284 = vector.load %arg3[%283, %c0_99] : memref<392x128xf32, #tpu.memory_space<vmem>>, vector<8x128xf32>
    %285 = arith.mulf %276, %4 : vector<8x128xf32>
    %286 = arith.mulf %279, %6 : vector<8x128xf32>
    %287 = arith.addf %285, %286 : vector<8x128xf32>
    %288 = arith.mulf %282, %8 : vector<8x128xf32>
    %289 = arith.addf %287, %288 : vector<8x128xf32>
    %290 = arith.addf %289, %10 : vector<8x128xf32>
    %cst_100 = arith.constant 0.000000e+00 : f32
    %291 = vector.broadcast %cst_100 : f32 to vector<8x128xf32>
    %292 = arith.maximumf %290, %291 : vector<8x128xf32>
    %293 = arith.addf %267, %292 : vector<8x128xf32>
    %294 = arith.mulf %292, %292 : vector<8x128xf32>
    %295 = arith.addf %269, %294 : vector<8x128xf32>
    %296 = arith.mulf %292, %284 : vector<8x128xf32>
    %297 = arith.addf %271, %296 : vector<8x128xf32>
    %c11_i32 = arith.constant 11 : i32
    %c8_i32_101 = arith.constant 8 : i32
    %298 = arith.muli %c11_i32, %c8_i32_101 : i32
    %299 = tpu.assume_multiple %298, 8 : i32
    %c0_102 = arith.constant 0 : index
    %300 = arith.index_cast %299 : i32 to index
    %c0_103 = arith.constant 0 : index
    %301 = vector.load %arg2[%c0_102, %300, %c0_103] : memref<3x392x128xf32, #tpu.memory_space<vmem>>, vector<1x8x128xf32>
    %302 = vector.shape_cast %301 : vector<1x8x128xf32> to vector<8x128xf32>
    %c1_104 = arith.constant 1 : index
    %303 = arith.index_cast %299 : i32 to index
    %c0_105 = arith.constant 0 : index
    %304 = vector.load %arg2[%c1_104, %303, %c0_105] : memref<3x392x128xf32, #tpu.memory_space<vmem>>, vector<1x8x128xf32>
    %305 = vector.shape_cast %304 : vector<1x8x128xf32> to vector<8x128xf32>
    %c2_106 = arith.constant 2 : index
    %306 = arith.index_cast %299 : i32 to index
    %c0_107 = arith.constant 0 : index
    %307 = vector.load %arg2[%c2_106, %306, %c0_107] : memref<3x392x128xf32, #tpu.memory_space<vmem>>, vector<1x8x128xf32>
    %308 = vector.shape_cast %307 : vector<1x8x128xf32> to vector<8x128xf32>
    %309 = arith.index_cast %299 : i32 to index
    %c0_108 = arith.constant 0 : index
    %310 = vector.load %arg3[%309, %c0_108] : memref<392x128xf32, #tpu.memory_space<vmem>>, vector<8x128xf32>
    %311 = arith.mulf %302, %4 : vector<8x128xf32>
    %312 = arith.mulf %305, %6 : vector<8x128xf32>
    %313 = arith.addf %311, %312 : vector<8x128xf32>
    %314 = arith.mulf %308, %8 : vector<8x128xf32>
    %315 = arith.addf %313, %314 : vector<8x128xf32>
    %316 = arith.addf %315, %10 : vector<8x128xf32>
    %cst_109 = arith.constant 0.000000e+00 : f32
    %317 = vector.broadcast %cst_109 : f32 to vector<8x128xf32>
    %318 = arith.maximumf %316, %317 : vector<8x128xf32>
    %319 = arith.addf %293, %318 : vector<8x128xf32>
    %320 = arith.mulf %318, %318 : vector<8x128xf32>
    %321 = arith.addf %295, %320 : vector<8x128xf32>
    %322 = arith.mulf %318, %310 : vector<8x128xf32>
    %323 = arith.addf %297, %322 : vector<8x128xf32>
    %c12_i32 = arith.constant 12 : i32
    %c8_i32_110 = arith.constant 8 : i32
    %324 = arith.muli %c12_i32, %c8_i32_110 : i32
    %325 = tpu.assume_multiple %324, 8 : i32
    %c0_111 = arith.constant 0 : index
    %326 = arith.index_cast %325 : i32 to index
    %c0_112 = arith.constant 0 : index
    %327 = vector.load %arg2[%c0_111, %326, %c0_112] : memref<3x392x128xf32, #tpu.memory_space<vmem>>, vector<1x8x128xf32>
    %328 = vector.shape_cast %327 : vector<1x8x128xf32> to vector<8x128xf32>
    %c1_113 = arith.constant 1 : index
    %329 = arith.index_cast %325 : i32 to index
    %c0_114 = arith.constant 0 : index
    %330 = vector.load %arg2[%c1_113, %329, %c0_114] : memref<3x392x128xf32, #tpu.memory_space<vmem>>, vector<1x8x128xf32>
    %331 = vector.shape_cast %330 : vector<1x8x128xf32> to vector<8x128xf32>
    %c2_115 = arith.constant 2 : index
    %332 = arith.index_cast %325 : i32 to index
    %c0_116 = arith.constant 0 : index
    %333 = vector.load %arg2[%c2_115, %332, %c0_116] : memref<3x392x128xf32, #tpu.memory_space<vmem>>, vector<1x8x128xf32>
    %334 = vector.shape_cast %333 : vector<1x8x128xf32> to vector<8x128xf32>
    %335 = arith.index_cast %325 : i32 to index
    %c0_117 = arith.constant 0 : index
    %336 = vector.load %arg3[%335, %c0_117] : memref<392x128xf32, #tpu.memory_space<vmem>>, vector<8x128xf32>
    %337 = arith.mulf %328, %4 : vector<8x128xf32>
    %338 = arith.mulf %331, %6 : vector<8x128xf32>
    %339 = arith.addf %337, %338 : vector<8x128xf32>
    %340 = arith.mulf %334, %8 : vector<8x128xf32>
    %341 = arith.addf %339, %340 : vector<8x128xf32>
    %342 = arith.addf %341, %10 : vector<8x128xf32>
    %cst_118 = arith.constant 0.000000e+00 : f32
    %343 = vector.broadcast %cst_118 : f32 to vector<8x128xf32>
    %344 = arith.maximumf %342, %343 : vector<8x128xf32>
    %345 = arith.addf %319, %344 : vector<8x128xf32>
    %346 = arith.mulf %344, %344 : vector<8x128xf32>
    %347 = arith.addf %321, %346 : vector<8x128xf32>
    %348 = arith.mulf %344, %336 : vector<8x128xf32>
    %349 = arith.addf %323, %348 : vector<8x128xf32>
    %c13_i32 = arith.constant 13 : i32
    %c8_i32_119 = arith.constant 8 : i32
    %350 = arith.muli %c13_i32, %c8_i32_119 : i32
    %351 = tpu.assume_multiple %350, 8 : i32
    %c0_120 = arith.constant 0 : index
    %352 = arith.index_cast %351 : i32 to index
    %c0_121 = arith.constant 0 : index
    %353 = vector.load %arg2[%c0_120, %352, %c0_121] : memref<3x392x128xf32, #tpu.memory_space<vmem>>, vector<1x8x128xf32>
    %354 = vector.shape_cast %353 : vector<1x8x128xf32> to vector<8x128xf32>
    %c1_122 = arith.constant 1 : index
    %355 = arith.index_cast %351 : i32 to index
    %c0_123 = arith.constant 0 : index
    %356 = vector.load %arg2[%c1_122, %355, %c0_123] : memref<3x392x128xf32, #tpu.memory_space<vmem>>, vector<1x8x128xf32>
    %357 = vector.shape_cast %356 : vector<1x8x128xf32> to vector<8x128xf32>
    %c2_124 = arith.constant 2 : index
    %358 = arith.index_cast %351 : i32 to index
    %c0_125 = arith.constant 0 : index
    %359 = vector.load %arg2[%c2_124, %358, %c0_125] : memref<3x392x128xf32, #tpu.memory_space<vmem>>, vector<1x8x128xf32>
    %360 = vector.shape_cast %359 : vector<1x8x128xf32> to vector<8x128xf32>
    %361 = arith.index_cast %351 : i32 to index
    %c0_126 = arith.constant 0 : index
    %362 = vector.load %arg3[%361, %c0_126] : memref<392x128xf32, #tpu.memory_space<vmem>>, vector<8x128xf32>
    %363 = arith.mulf %354, %4 : vector<8x128xf32>
    %364 = arith.mulf %357, %6 : vector<8x128xf32>
    %365 = arith.addf %363, %364 : vector<8x128xf32>
    %366 = arith.mulf %360, %8 : vector<8x128xf32>
    %367 = arith.addf %365, %366 : vector<8x128xf32>
    %368 = arith.addf %367, %10 : vector<8x128xf32>
    %cst_127 = arith.constant 0.000000e+00 : f32
    %369 = vector.broadcast %cst_127 : f32 to vector<8x128xf32>
    %370 = arith.maximumf %368, %369 : vector<8x128xf32>
    %371 = arith.addf %345, %370 : vector<8x128xf32>
    %372 = arith.mulf %370, %370 : vector<8x128xf32>
    %373 = arith.addf %347, %372 : vector<8x128xf32>
    %374 = arith.mulf %370, %362 : vector<8x128xf32>
    %375 = arith.addf %349, %374 : vector<8x128xf32>
    %c14_i32 = arith.constant 14 : i32
    %c8_i32_128 = arith.constant 8 : i32
    %376 = arith.muli %c14_i32, %c8_i32_128 : i32
    %377 = tpu.assume_multiple %376, 8 : i32
    %c0_129 = arith.constant 0 : index
    %378 = arith.index_cast %377 : i32 to index
    %c0_130 = arith.constant 0 : index
    %379 = vector.load %arg2[%c0_129, %378, %c0_130] : memref<3x392x128xf32, #tpu.memory_space<vmem>>, vector<1x8x128xf32>
    %380 = vector.shape_cast %379 : vector<1x8x128xf32> to vector<8x128xf32>
    %c1_131 = arith.constant 1 : index
    %381 = arith.index_cast %377 : i32 to index
    %c0_132 = arith.constant 0 : index
    %382 = vector.load %arg2[%c1_131, %381, %c0_132] : memref<3x392x128xf32, #tpu.memory_space<vmem>>, vector<1x8x128xf32>
    %383 = vector.shape_cast %382 : vector<1x8x128xf32> to vector<8x128xf32>
    %c2_133 = arith.constant 2 : index
    %384 = arith.index_cast %377 : i32 to index
    %c0_134 = arith.constant 0 : index
    %385 = vector.load %arg2[%c2_133, %384, %c0_134] : memref<3x392x128xf32, #tpu.memory_space<vmem>>, vector<1x8x128xf32>
    %386 = vector.shape_cast %385 : vector<1x8x128xf32> to vector<8x128xf32>
    %387 = arith.index_cast %377 : i32 to index
    %c0_135 = arith.constant 0 : index
    %388 = vector.load %arg3[%387, %c0_135] : memref<392x128xf32, #tpu.memory_space<vmem>>, vector<8x128xf32>
    %389 = arith.mulf %380, %4 : vector<8x128xf32>
    %390 = arith.mulf %383, %6 : vector<8x128xf32>
    %391 = arith.addf %389, %390 : vector<8x128xf32>
    %392 = arith.mulf %386, %8 : vector<8x128xf32>
    %393 = arith.addf %391, %392 : vector<8x128xf32>
    %394 = arith.addf %393, %10 : vector<8x128xf32>
    %cst_136 = arith.constant 0.000000e+00 : f32
    %395 = vector.broadcast %cst_136 : f32 to vector<8x128xf32>
    %396 = arith.maximumf %394, %395 : vector<8x128xf32>
    %397 = arith.addf %371, %396 : vector<8x128xf32>
    %398 = arith.mulf %396, %396 : vector<8x128xf32>
    %399 = arith.addf %373, %398 : vector<8x128xf32>
    %400 = arith.mulf %396, %388 : vector<8x128xf32>
    %401 = arith.addf %375, %400 : vector<8x128xf32>
    %c15_i32 = arith.constant 15 : i32
    %c8_i32_137 = arith.constant 8 : i32
    %402 = arith.muli %c15_i32, %c8_i32_137 : i32
    %403 = tpu.assume_multiple %402, 8 : i32
    %c0_138 = arith.constant 0 : index
    %404 = arith.index_cast %403 : i32 to index
    %c0_139 = arith.constant 0 : index
    %405 = vector.load %arg2[%c0_138, %404, %c0_139] : memref<3x392x128xf32, #tpu.memory_space<vmem>>, vector<1x8x128xf32>
    %406 = vector.shape_cast %405 : vector<1x8x128xf32> to vector<8x128xf32>
    %c1_140 = arith.constant 1 : index
    %407 = arith.index_cast %403 : i32 to index
    %c0_141 = arith.constant 0 : index
    %408 = vector.load %arg2[%c1_140, %407, %c0_141] : memref<3x392x128xf32, #tpu.memory_space<vmem>>, vector<1x8x128xf32>
    %409 = vector.shape_cast %408 : vector<1x8x128xf32> to vector<8x128xf32>
    %c2_142 = arith.constant 2 : index
    %410 = arith.index_cast %403 : i32 to index
    %c0_143 = arith.constant 0 : index
    %411 = vector.load %arg2[%c2_142, %410, %c0_143] : memref<3x392x128xf32, #tpu.memory_space<vmem>>, vector<1x8x128xf32>
    %412 = vector.shape_cast %411 : vector<1x8x128xf32> to vector<8x128xf32>
    %413 = arith.index_cast %403 : i32 to index
    %c0_144 = arith.constant 0 : index
    %414 = vector.load %arg3[%413, %c0_144] : memref<392x128xf32, #tpu.memory_space<vmem>>, vector<8x128xf32>
    %415 = arith.mulf %406, %4 : vector<8x128xf32>
    %416 = arith.mulf %409, %6 : vector<8x128xf32>
    %417 = arith.addf %415, %416 : vector<8x128xf32>
    %418 = arith.mulf %412, %8 : vector<8x128xf32>
    %419 = arith.addf %417, %418 : vector<8x128xf32>
    %420 = arith.addf %419, %10 : vector<8x128xf32>
    %cst_145 = arith.constant 0.000000e+00 : f32
    %421 = vector.broadcast %cst_145 : f32 to vector<8x128xf32>
    %422 = arith.maximumf %420, %421 : vector<8x128xf32>
    %423 = arith.addf %397, %422 : vector<8x128xf32>
    %424 = arith.mulf %422, %422 : vector<8x128xf32>
    %425 = arith.addf %399, %424 : vector<8x128xf32>
    %426 = arith.mulf %422, %414 : vector<8x128xf32>
    %427 = arith.addf %401, %426 : vector<8x128xf32>
    %c16_i32 = arith.constant 16 : i32
    %c8_i32_146 = arith.constant 8 : i32
    %428 = arith.muli %c16_i32, %c8_i32_146 : i32
    %429 = tpu.assume_multiple %428, 8 : i32
    %c0_147 = arith.constant 0 : index
    %430 = arith.index_cast %429 : i32 to index
    %c0_148 = arith.constant 0 : index
    %431 = vector.load %arg2[%c0_147, %430, %c0_148] : memref<3x392x128xf32, #tpu.memory_space<vmem>>, vector<1x8x128xf32>
    %432 = vector.shape_cast %431 : vector<1x8x128xf32> to vector<8x128xf32>
    %c1_149 = arith.constant 1 : index
    %433 = arith.index_cast %429 : i32 to index
    %c0_150 = arith.constant 0 : index
    %434 = vector.load %arg2[%c1_149, %433, %c0_150] : memref<3x392x128xf32, #tpu.memory_space<vmem>>, vector<1x8x128xf32>
    %435 = vector.shape_cast %434 : vector<1x8x128xf32> to vector<8x128xf32>
    %c2_151 = arith.constant 2 : index
    %436 = arith.index_cast %429 : i32 to index
    %c0_152 = arith.constant 0 : index
    %437 = vector.load %arg2[%c2_151, %436, %c0_152] : memref<3x392x128xf32, #tpu.memory_space<vmem>>, vector<1x8x128xf32>
    %438 = vector.shape_cast %437 : vector<1x8x128xf32> to vector<8x128xf32>
    %439 = arith.index_cast %429 : i32 to index
    %c0_153 = arith.constant 0 : index
    %440 = vector.load %arg3[%439, %c0_153] : memref<392x128xf32, #tpu.memory_space<vmem>>, vector<8x128xf32>
    %441 = arith.mulf %432, %4 : vector<8x128xf32>
    %442 = arith.mulf %435, %6 : vector<8x128xf32>
    %443 = arith.addf %441, %442 : vector<8x128xf32>
    %444 = arith.mulf %438, %8 : vector<8x128xf32>
    %445 = arith.addf %443, %444 : vector<8x128xf32>
    %446 = arith.addf %445, %10 : vector<8x128xf32>
    %cst_154 = arith.constant 0.000000e+00 : f32
    %447 = vector.broadcast %cst_154 : f32 to vector<8x128xf32>
    %448 = arith.maximumf %446, %447 : vector<8x128xf32>
    %449 = arith.addf %423, %448 : vector<8x128xf32>
    %450 = arith.mulf %448, %448 : vector<8x128xf32>
    %451 = arith.addf %425, %450 : vector<8x128xf32>
    %452 = arith.mulf %448, %440 : vector<8x128xf32>
    %453 = arith.addf %427, %452 : vector<8x128xf32>
    %c17_i32 = arith.constant 17 : i32
    %c8_i32_155 = arith.constant 8 : i32
    %454 = arith.muli %c17_i32, %c8_i32_155 : i32
    %455 = tpu.assume_multiple %454, 8 : i32
    %c0_156 = arith.constant 0 : index
    %456 = arith.index_cast %455 : i32 to index
    %c0_157 = arith.constant 0 : index
    %457 = vector.load %arg2[%c0_156, %456, %c0_157] : memref<3x392x128xf32, #tpu.memory_space<vmem>>, vector<1x8x128xf32>
    %458 = vector.shape_cast %457 : vector<1x8x128xf32> to vector<8x128xf32>
    %c1_158 = arith.constant 1 : index
    %459 = arith.index_cast %455 : i32 to index
    %c0_159 = arith.constant 0 : index
    %460 = vector.load %arg2[%c1_158, %459, %c0_159] : memref<3x392x128xf32, #tpu.memory_space<vmem>>, vector<1x8x128xf32>
    %461 = vector.shape_cast %460 : vector<1x8x128xf32> to vector<8x128xf32>
    %c2_160 = arith.constant 2 : index
    %462 = arith.index_cast %455 : i32 to index
    %c0_161 = arith.constant 0 : index
    %463 = vector.load %arg2[%c2_160, %462, %c0_161] : memref<3x392x128xf32, #tpu.memory_space<vmem>>, vector<1x8x128xf32>
    %464 = vector.shape_cast %463 : vector<1x8x128xf32> to vector<8x128xf32>
    %465 = arith.index_cast %455 : i32 to index
    %c0_162 = arith.constant 0 : index
    %466 = vector.load %arg3[%465, %c0_162] : memref<392x128xf32, #tpu.memory_space<vmem>>, vector<8x128xf32>
    %467 = arith.mulf %458, %4 : vector<8x128xf32>
    %468 = arith.mulf %461, %6 : vector<8x128xf32>
    %469 = arith.addf %467, %468 : vector<8x128xf32>
    %470 = arith.mulf %464, %8 : vector<8x128xf32>
    %471 = arith.addf %469, %470 : vector<8x128xf32>
    %472 = arith.addf %471, %10 : vector<8x128xf32>
    %cst_163 = arith.constant 0.000000e+00 : f32
    %473 = vector.broadcast %cst_163 : f32 to vector<8x128xf32>
    %474 = arith.maximumf %472, %473 : vector<8x128xf32>
    %475 = arith.addf %449, %474 : vector<8x128xf32>
    %476 = arith.mulf %474, %474 : vector<8x128xf32>
    %477 = arith.addf %451, %476 : vector<8x128xf32>
    %478 = arith.mulf %474, %466 : vector<8x128xf32>
    %479 = arith.addf %453, %478 : vector<8x128xf32>
    %c18_i32 = arith.constant 18 : i32
    %c8_i32_164 = arith.constant 8 : i32
    %480 = arith.muli %c18_i32, %c8_i32_164 : i32
    %481 = tpu.assume_multiple %480, 8 : i32
    %c0_165 = arith.constant 0 : index
    %482 = arith.index_cast %481 : i32 to index
    %c0_166 = arith.constant 0 : index
    %483 = vector.load %arg2[%c0_165, %482, %c0_166] : memref<3x392x128xf32, #tpu.memory_space<vmem>>, vector<1x8x128xf32>
    %484 = vector.shape_cast %483 : vector<1x8x128xf32> to vector<8x128xf32>
    %c1_167 = arith.constant 1 : index
    %485 = arith.index_cast %481 : i32 to index
    %c0_168 = arith.constant 0 : index
    %486 = vector.load %arg2[%c1_167, %485, %c0_168] : memref<3x392x128xf32, #tpu.memory_space<vmem>>, vector<1x8x128xf32>
    %487 = vector.shape_cast %486 : vector<1x8x128xf32> to vector<8x128xf32>
    %c2_169 = arith.constant 2 : index
    %488 = arith.index_cast %481 : i32 to index
    %c0_170 = arith.constant 0 : index
    %489 = vector.load %arg2[%c2_169, %488, %c0_170] : memref<3x392x128xf32, #tpu.memory_space<vmem>>, vector<1x8x128xf32>
    %490 = vector.shape_cast %489 : vector<1x8x128xf32> to vector<8x128xf32>
    %491 = arith.index_cast %481 : i32 to index
    %c0_171 = arith.constant 0 : index
    %492 = vector.load %arg3[%491, %c0_171] : memref<392x128xf32, #tpu.memory_space<vmem>>, vector<8x128xf32>
    %493 = arith.mulf %484, %4 : vector<8x128xf32>
    %494 = arith.mulf %487, %6 : vector<8x128xf32>
    %495 = arith.addf %493, %494 : vector<8x128xf32>
    %496 = arith.mulf %490, %8 : vector<8x128xf32>
    %497 = arith.addf %495, %496 : vector<8x128xf32>
    %498 = arith.addf %497, %10 : vector<8x128xf32>
    %cst_172 = arith.constant 0.000000e+00 : f32
    %499 = vector.broadcast %cst_172 : f32 to vector<8x128xf32>
    %500 = arith.maximumf %498, %499 : vector<8x128xf32>
    %501 = arith.addf %475, %500 : vector<8x128xf32>
    %502 = arith.mulf %500, %500 : vector<8x128xf32>
    %503 = arith.addf %477, %502 : vector<8x128xf32>
    %504 = arith.mulf %500, %492 : vector<8x128xf32>
    %505 = arith.addf %479, %504 : vector<8x128xf32>
    %c19_i32 = arith.constant 19 : i32
    %c8_i32_173 = arith.constant 8 : i32
    %506 = arith.muli %c19_i32, %c8_i32_173 : i32
    %507 = tpu.assume_multiple %506, 8 : i32
    %c0_174 = arith.constant 0 : index
    %508 = arith.index_cast %507 : i32 to index
    %c0_175 = arith.constant 0 : index
    %509 = vector.load %arg2[%c0_174, %508, %c0_175] : memref<3x392x128xf32, #tpu.memory_space<vmem>>, vector<1x8x128xf32>
    %510 = vector.shape_cast %509 : vector<1x8x128xf32> to vector<8x128xf32>
    %c1_176 = arith.constant 1 : index
    %511 = arith.index_cast %507 : i32 to index
    %c0_177 = arith.constant 0 : index
    %512 = vector.load %arg2[%c1_176, %511, %c0_177] : memref<3x392x128xf32, #tpu.memory_space<vmem>>, vector<1x8x128xf32>
    %513 = vector.shape_cast %512 : vector<1x8x128xf32> to vector<8x128xf32>
    %c2_178 = arith.constant 2 : index
    %514 = arith.index_cast %507 : i32 to index
    %c0_179 = arith.constant 0 : index
    %515 = vector.load %arg2[%c2_178, %514, %c0_179] : memref<3x392x128xf32, #tpu.memory_space<vmem>>, vector<1x8x128xf32>
    %516 = vector.shape_cast %515 : vector<1x8x128xf32> to vector<8x128xf32>
    %517 = arith.index_cast %507 : i32 to index
    %c0_180 = arith.constant 0 : index
    %518 = vector.load %arg3[%517, %c0_180] : memref<392x128xf32, #tpu.memory_space<vmem>>, vector<8x128xf32>
    %519 = arith.mulf %510, %4 : vector<8x128xf32>
    %520 = arith.mulf %513, %6 : vector<8x128xf32>
    %521 = arith.addf %519, %520 : vector<8x128xf32>
    %522 = arith.mulf %516, %8 : vector<8x128xf32>
    %523 = arith.addf %521, %522 : vector<8x128xf32>
    %524 = arith.addf %523, %10 : vector<8x128xf32>
    %cst_181 = arith.constant 0.000000e+00 : f32
    %525 = vector.broadcast %cst_181 : f32 to vector<8x128xf32>
    %526 = arith.maximumf %524, %525 : vector<8x128xf32>
    %527 = arith.addf %501, %526 : vector<8x128xf32>
    %528 = arith.mulf %526, %526 : vector<8x128xf32>
    %529 = arith.addf %503, %528 : vector<8x128xf32>
    %530 = arith.mulf %526, %518 : vector<8x128xf32>
    %531 = arith.addf %505, %530 : vector<8x128xf32>
    %c20_i32 = arith.constant 20 : i32
    %c8_i32_182 = arith.constant 8 : i32
    %532 = arith.muli %c20_i32, %c8_i32_182 : i32
    %533 = tpu.assume_multiple %532, 8 : i32
    %c0_183 = arith.constant 0 : index
    %534 = arith.index_cast %533 : i32 to index
    %c0_184 = arith.constant 0 : index
    %535 = vector.load %arg2[%c0_183, %534, %c0_184] : memref<3x392x128xf32, #tpu.memory_space<vmem>>, vector<1x8x128xf32>
    %536 = vector.shape_cast %535 : vector<1x8x128xf32> to vector<8x128xf32>
    %c1_185 = arith.constant 1 : index
    %537 = arith.index_cast %533 : i32 to index
    %c0_186 = arith.constant 0 : index
    %538 = vector.load %arg2[%c1_185, %537, %c0_186] : memref<3x392x128xf32, #tpu.memory_space<vmem>>, vector<1x8x128xf32>
    %539 = vector.shape_cast %538 : vector<1x8x128xf32> to vector<8x128xf32>
    %c2_187 = arith.constant 2 : index
    %540 = arith.index_cast %533 : i32 to index
    %c0_188 = arith.constant 0 : index
    %541 = vector.load %arg2[%c2_187, %540, %c0_188] : memref<3x392x128xf32, #tpu.memory_space<vmem>>, vector<1x8x128xf32>
    %542 = vector.shape_cast %541 : vector<1x8x128xf32> to vector<8x128xf32>
    %543 = arith.index_cast %533 : i32 to index
    %c0_189 = arith.constant 0 : index
    %544 = vector.load %arg3[%543, %c0_189] : memref<392x128xf32, #tpu.memory_space<vmem>>, vector<8x128xf32>
    %545 = arith.mulf %536, %4 : vector<8x128xf32>
    %546 = arith.mulf %539, %6 : vector<8x128xf32>
    %547 = arith.addf %545, %546 : vector<8x128xf32>
    %548 = arith.mulf %542, %8 : vector<8x128xf32>
    %549 = arith.addf %547, %548 : vector<8x128xf32>
    %550 = arith.addf %549, %10 : vector<8x128xf32>
    %cst_190 = arith.constant 0.000000e+00 : f32
    %551 = vector.broadcast %cst_190 : f32 to vector<8x128xf32>
    %552 = arith.maximumf %550, %551 : vector<8x128xf32>
    %553 = arith.addf %527, %552 : vector<8x128xf32>
    %554 = arith.mulf %552, %552 : vector<8x128xf32>
    %555 = arith.addf %529, %554 : vector<8x128xf32>
    %556 = arith.mulf %552, %544 : vector<8x128xf32>
    %557 = arith.addf %531, %556 : vector<8x128xf32>
    %c21_i32 = arith.constant 21 : i32
    %c8_i32_191 = arith.constant 8 : i32
    %558 = arith.muli %c21_i32, %c8_i32_191 : i32
    %559 = tpu.assume_multiple %558, 8 : i32
    %c0_192 = arith.constant 0 : index
    %560 = arith.index_cast %559 : i32 to index
    %c0_193 = arith.constant 0 : index
    %561 = vector.load %arg2[%c0_192, %560, %c0_193] : memref<3x392x128xf32, #tpu.memory_space<vmem>>, vector<1x8x128xf32>
    %562 = vector.shape_cast %561 : vector<1x8x128xf32> to vector<8x128xf32>
    %c1_194 = arith.constant 1 : index
    %563 = arith.index_cast %559 : i32 to index
    %c0_195 = arith.constant 0 : index
    %564 = vector.load %arg2[%c1_194, %563, %c0_195] : memref<3x392x128xf32, #tpu.memory_space<vmem>>, vector<1x8x128xf32>
    %565 = vector.shape_cast %564 : vector<1x8x128xf32> to vector<8x128xf32>
    %c2_196 = arith.constant 2 : index
    %566 = arith.index_cast %559 : i32 to index
    %c0_197 = arith.constant 0 : index
    %567 = vector.load %arg2[%c2_196, %566, %c0_197] : memref<3x392x128xf32, #tpu.memory_space<vmem>>, vector<1x8x128xf32>
    %568 = vector.shape_cast %567 : vector<1x8x128xf32> to vector<8x128xf32>
    %569 = arith.index_cast %559 : i32 to index
    %c0_198 = arith.constant 0 : index
    %570 = vector.load %arg3[%569, %c0_198] : memref<392x128xf32, #tpu.memory_space<vmem>>, vector<8x128xf32>
    %571 = arith.mulf %562, %4 : vector<8x128xf32>
    %572 = arith.mulf %565, %6 : vector<8x128xf32>
    %573 = arith.addf %571, %572 : vector<8x128xf32>
    %574 = arith.mulf %568, %8 : vector<8x128xf32>
    %575 = arith.addf %573, %574 : vector<8x128xf32>
    %576 = arith.addf %575, %10 : vector<8x128xf32>
    %cst_199 = arith.constant 0.000000e+00 : f32
    %577 = vector.broadcast %cst_199 : f32 to vector<8x128xf32>
    %578 = arith.maximumf %576, %577 : vector<8x128xf32>
    %579 = arith.addf %553, %578 : vector<8x128xf32>
    %580 = arith.mulf %578, %578 : vector<8x128xf32>
    %581 = arith.addf %555, %580 : vector<8x128xf32>
    %582 = arith.mulf %578, %570 : vector<8x128xf32>
    %583 = arith.addf %557, %582 : vector<8x128xf32>
    %c22_i32 = arith.constant 22 : i32
    %c8_i32_200 = arith.constant 8 : i32
    %584 = arith.muli %c22_i32, %c8_i32_200 : i32
    %585 = tpu.assume_multiple %584, 8 : i32
    %c0_201 = arith.constant 0 : index
    %586 = arith.index_cast %585 : i32 to index
    %c0_202 = arith.constant 0 : index
    %587 = vector.load %arg2[%c0_201, %586, %c0_202] : memref<3x392x128xf32, #tpu.memory_space<vmem>>, vector<1x8x128xf32>
    %588 = vector.shape_cast %587 : vector<1x8x128xf32> to vector<8x128xf32>
    %c1_203 = arith.constant 1 : index
    %589 = arith.index_cast %585 : i32 to index
    %c0_204 = arith.constant 0 : index
    %590 = vector.load %arg2[%c1_203, %589, %c0_204] : memref<3x392x128xf32, #tpu.memory_space<vmem>>, vector<1x8x128xf32>
    %591 = vector.shape_cast %590 : vector<1x8x128xf32> to vector<8x128xf32>
    %c2_205 = arith.constant 2 : index
    %592 = arith.index_cast %585 : i32 to index
    %c0_206 = arith.constant 0 : index
    %593 = vector.load %arg2[%c2_205, %592, %c0_206] : memref<3x392x128xf32, #tpu.memory_space<vmem>>, vector<1x8x128xf32>
    %594 = vector.shape_cast %593 : vector<1x8x128xf32> to vector<8x128xf32>
    %595 = arith.index_cast %585 : i32 to index
    %c0_207 = arith.constant 0 : index
    %596 = vector.load %arg3[%595, %c0_207] : memref<392x128xf32, #tpu.memory_space<vmem>>, vector<8x128xf32>
    %597 = arith.mulf %588, %4 : vector<8x128xf32>
    %598 = arith.mulf %591, %6 : vector<8x128xf32>
    %599 = arith.addf %597, %598 : vector<8x128xf32>
    %600 = arith.mulf %594, %8 : vector<8x128xf32>
    %601 = arith.addf %599, %600 : vector<8x128xf32>
    %602 = arith.addf %601, %10 : vector<8x128xf32>
    %cst_208 = arith.constant 0.000000e+00 : f32
    %603 = vector.broadcast %cst_208 : f32 to vector<8x128xf32>
    %604 = arith.maximumf %602, %603 : vector<8x128xf32>
    %605 = arith.addf %579, %604 : vector<8x128xf32>
    %606 = arith.mulf %604, %604 : vector<8x128xf32>
    %607 = arith.addf %581, %606 : vector<8x128xf32>
    %608 = arith.mulf %604, %596 : vector<8x128xf32>
    %609 = arith.addf %583, %608 : vector<8x128xf32>
    %c23_i32 = arith.constant 23 : i32
    %c8_i32_209 = arith.constant 8 : i32
    %610 = arith.muli %c23_i32, %c8_i32_209 : i32
    %611 = tpu.assume_multiple %610, 8 : i32
    %c0_210 = arith.constant 0 : index
    %612 = arith.index_cast %611 : i32 to index
    %c0_211 = arith.constant 0 : index
    %613 = vector.load %arg2[%c0_210, %612, %c0_211] : memref<3x392x128xf32, #tpu.memory_space<vmem>>, vector<1x8x128xf32>
    %614 = vector.shape_cast %613 : vector<1x8x128xf32> to vector<8x128xf32>
    %c1_212 = arith.constant 1 : index
    %615 = arith.index_cast %611 : i32 to index
    %c0_213 = arith.constant 0 : index
    %616 = vector.load %arg2[%c1_212, %615, %c0_213] : memref<3x392x128xf32, #tpu.memory_space<vmem>>, vector<1x8x128xf32>
    %617 = vector.shape_cast %616 : vector<1x8x128xf32> to vector<8x128xf32>
    %c2_214 = arith.constant 2 : index
    %618 = arith.index_cast %611 : i32 to index
    %c0_215 = arith.constant 0 : index
    %619 = vector.load %arg2[%c2_214, %618, %c0_215] : memref<3x392x128xf32, #tpu.memory_space<vmem>>, vector<1x8x128xf32>
    %620 = vector.shape_cast %619 : vector<1x8x128xf32> to vector<8x128xf32>
    %621 = arith.index_cast %611 : i32 to index
    %c0_216 = arith.constant 0 : index
    %622 = vector.load %arg3[%621, %c0_216] : memref<392x128xf32, #tpu.memory_space<vmem>>, vector<8x128xf32>
    %623 = arith.mulf %614, %4 : vector<8x128xf32>
    %624 = arith.mulf %617, %6 : vector<8x128xf32>
    %625 = arith.addf %623, %624 : vector<8x128xf32>
    %626 = arith.mulf %620, %8 : vector<8x128xf32>
    %627 = arith.addf %625, %626 : vector<8x128xf32>
    %628 = arith.addf %627, %10 : vector<8x128xf32>
    %cst_217 = arith.constant 0.000000e+00 : f32
    %629 = vector.broadcast %cst_217 : f32 to vector<8x128xf32>
    %630 = arith.maximumf %628, %629 : vector<8x128xf32>
    %631 = arith.addf %605, %630 : vector<8x128xf32>
    %632 = arith.mulf %630, %630 : vector<8x128xf32>
    %633 = arith.addf %607, %632 : vector<8x128xf32>
    %634 = arith.mulf %630, %622 : vector<8x128xf32>
    %635 = arith.addf %609, %634 : vector<8x128xf32>
    %c24_i32 = arith.constant 24 : i32
    %c8_i32_218 = arith.constant 8 : i32
    %636 = arith.muli %c24_i32, %c8_i32_218 : i32
    %637 = tpu.assume_multiple %636, 8 : i32
    %c0_219 = arith.constant 0 : index
    %638 = arith.index_cast %637 : i32 to index
    %c0_220 = arith.constant 0 : index
    %639 = vector.load %arg2[%c0_219, %638, %c0_220] : memref<3x392x128xf32, #tpu.memory_space<vmem>>, vector<1x8x128xf32>
    %640 = vector.shape_cast %639 : vector<1x8x128xf32> to vector<8x128xf32>
    %c1_221 = arith.constant 1 : index
    %641 = arith.index_cast %637 : i32 to index
    %c0_222 = arith.constant 0 : index
    %642 = vector.load %arg2[%c1_221, %641, %c0_222] : memref<3x392x128xf32, #tpu.memory_space<vmem>>, vector<1x8x128xf32>
    %643 = vector.shape_cast %642 : vector<1x8x128xf32> to vector<8x128xf32>
    %c2_223 = arith.constant 2 : index
    %644 = arith.index_cast %637 : i32 to index
    %c0_224 = arith.constant 0 : index
    %645 = vector.load %arg2[%c2_223, %644, %c0_224] : memref<3x392x128xf32, #tpu.memory_space<vmem>>, vector<1x8x128xf32>
    %646 = vector.shape_cast %645 : vector<1x8x128xf32> to vector<8x128xf32>
    %647 = arith.index_cast %637 : i32 to index
    %c0_225 = arith.constant 0 : index
    %648 = vector.load %arg3[%647, %c0_225] : memref<392x128xf32, #tpu.memory_space<vmem>>, vector<8x128xf32>
    %649 = arith.mulf %640, %4 : vector<8x128xf32>
    %650 = arith.mulf %643, %6 : vector<8x128xf32>
    %651 = arith.addf %649, %650 : vector<8x128xf32>
    %652 = arith.mulf %646, %8 : vector<8x128xf32>
    %653 = arith.addf %651, %652 : vector<8x128xf32>
    %654 = arith.addf %653, %10 : vector<8x128xf32>
    %cst_226 = arith.constant 0.000000e+00 : f32
    %655 = vector.broadcast %cst_226 : f32 to vector<8x128xf32>
    %656 = arith.maximumf %654, %655 : vector<8x128xf32>
    %657 = arith.addf %631, %656 : vector<8x128xf32>
    %658 = arith.mulf %656, %656 : vector<8x128xf32>
    %659 = arith.addf %633, %658 : vector<8x128xf32>
    %660 = arith.mulf %656, %648 : vector<8x128xf32>
    %661 = arith.addf %635, %660 : vector<8x128xf32>
    %c25_i32 = arith.constant 25 : i32
    %c8_i32_227 = arith.constant 8 : i32
    %662 = arith.muli %c25_i32, %c8_i32_227 : i32
    %663 = tpu.assume_multiple %662, 8 : i32
    %c0_228 = arith.constant 0 : index
    %664 = arith.index_cast %663 : i32 to index
    %c0_229 = arith.constant 0 : index
    %665 = vector.load %arg2[%c0_228, %664, %c0_229] : memref<3x392x128xf32, #tpu.memory_space<vmem>>, vector<1x8x128xf32>
    %666 = vector.shape_cast %665 : vector<1x8x128xf32> to vector<8x128xf32>
    %c1_230 = arith.constant 1 : index
    %667 = arith.index_cast %663 : i32 to index
    %c0_231 = arith.constant 0 : index
    %668 = vector.load %arg2[%c1_230, %667, %c0_231] : memref<3x392x128xf32, #tpu.memory_space<vmem>>, vector<1x8x128xf32>
    %669 = vector.shape_cast %668 : vector<1x8x128xf32> to vector<8x128xf32>
    %c2_232 = arith.constant 2 : index
    %670 = arith.index_cast %663 : i32 to index
    %c0_233 = arith.constant 0 : index
    %671 = vector.load %arg2[%c2_232, %670, %c0_233] : memref<3x392x128xf32, #tpu.memory_space<vmem>>, vector<1x8x128xf32>
    %672 = vector.shape_cast %671 : vector<1x8x128xf32> to vector<8x128xf32>
    %673 = arith.index_cast %663 : i32 to index
    %c0_234 = arith.constant 0 : index
    %674 = vector.load %arg3[%673, %c0_234] : memref<392x128xf32, #tpu.memory_space<vmem>>, vector<8x128xf32>
    %675 = arith.mulf %666, %4 : vector<8x128xf32>
    %676 = arith.mulf %669, %6 : vector<8x128xf32>
    %677 = arith.addf %675, %676 : vector<8x128xf32>
    %678 = arith.mulf %672, %8 : vector<8x128xf32>
    %679 = arith.addf %677, %678 : vector<8x128xf32>
    %680 = arith.addf %679, %10 : vector<8x128xf32>
    %cst_235 = arith.constant 0.000000e+00 : f32
    %681 = vector.broadcast %cst_235 : f32 to vector<8x128xf32>
    %682 = arith.maximumf %680, %681 : vector<8x128xf32>
    %683 = arith.addf %657, %682 : vector<8x128xf32>
    %684 = arith.mulf %682, %682 : vector<8x128xf32>
    %685 = arith.addf %659, %684 : vector<8x128xf32>
    %686 = arith.mulf %682, %674 : vector<8x128xf32>
    %687 = arith.addf %661, %686 : vector<8x128xf32>
    %c26_i32 = arith.constant 26 : i32
    %c8_i32_236 = arith.constant 8 : i32
    %688 = arith.muli %c26_i32, %c8_i32_236 : i32
    %689 = tpu.assume_multiple %688, 8 : i32
    %c0_237 = arith.constant 0 : index
    %690 = arith.index_cast %689 : i32 to index
    %c0_238 = arith.constant 0 : index
    %691 = vector.load %arg2[%c0_237, %690, %c0_238] : memref<3x392x128xf32, #tpu.memory_space<vmem>>, vector<1x8x128xf32>
    %692 = vector.shape_cast %691 : vector<1x8x128xf32> to vector<8x128xf32>
    %c1_239 = arith.constant 1 : index
    %693 = arith.index_cast %689 : i32 to index
    %c0_240 = arith.constant 0 : index
    %694 = vector.load %arg2[%c1_239, %693, %c0_240] : memref<3x392x128xf32, #tpu.memory_space<vmem>>, vector<1x8x128xf32>
    %695 = vector.shape_cast %694 : vector<1x8x128xf32> to vector<8x128xf32>
    %c2_241 = arith.constant 2 : index
    %696 = arith.index_cast %689 : i32 to index
    %c0_242 = arith.constant 0 : index
    %697 = vector.load %arg2[%c2_241, %696, %c0_242] : memref<3x392x128xf32, #tpu.memory_space<vmem>>, vector<1x8x128xf32>
    %698 = vector.shape_cast %697 : vector<1x8x128xf32> to vector<8x128xf32>
    %699 = arith.index_cast %689 : i32 to index
    %c0_243 = arith.constant 0 : index
    %700 = vector.load %arg3[%699, %c0_243] : memref<392x128xf32, #tpu.memory_space<vmem>>, vector<8x128xf32>
    %701 = arith.mulf %692, %4 : vector<8x128xf32>
    %702 = arith.mulf %695, %6 : vector<8x128xf32>
    %703 = arith.addf %701, %702 : vector<8x128xf32>
    %704 = arith.mulf %698, %8 : vector<8x128xf32>
    %705 = arith.addf %703, %704 : vector<8x128xf32>
    %706 = arith.addf %705, %10 : vector<8x128xf32>
    %cst_244 = arith.constant 0.000000e+00 : f32
    %707 = vector.broadcast %cst_244 : f32 to vector<8x128xf32>
    %708 = arith.maximumf %706, %707 : vector<8x128xf32>
    %709 = arith.addf %683, %708 : vector<8x128xf32>
    %710 = arith.mulf %708, %708 : vector<8x128xf32>
    %711 = arith.addf %685, %710 : vector<8x128xf32>
    %712 = arith.mulf %708, %700 : vector<8x128xf32>
    %713 = arith.addf %687, %712 : vector<8x128xf32>
    %c27_i32 = arith.constant 27 : i32
    %c8_i32_245 = arith.constant 8 : i32
    %714 = arith.muli %c27_i32, %c8_i32_245 : i32
    %715 = tpu.assume_multiple %714, 8 : i32
    %c0_246 = arith.constant 0 : index
    %716 = arith.index_cast %715 : i32 to index
    %c0_247 = arith.constant 0 : index
    %717 = vector.load %arg2[%c0_246, %716, %c0_247] : memref<3x392x128xf32, #tpu.memory_space<vmem>>, vector<1x8x128xf32>
    %718 = vector.shape_cast %717 : vector<1x8x128xf32> to vector<8x128xf32>
    %c1_248 = arith.constant 1 : index
    %719 = arith.index_cast %715 : i32 to index
    %c0_249 = arith.constant 0 : index
    %720 = vector.load %arg2[%c1_248, %719, %c0_249] : memref<3x392x128xf32, #tpu.memory_space<vmem>>, vector<1x8x128xf32>
    %721 = vector.shape_cast %720 : vector<1x8x128xf32> to vector<8x128xf32>
    %c2_250 = arith.constant 2 : index
    %722 = arith.index_cast %715 : i32 to index
    %c0_251 = arith.constant 0 : index
    %723 = vector.load %arg2[%c2_250, %722, %c0_251] : memref<3x392x128xf32, #tpu.memory_space<vmem>>, vector<1x8x128xf32>
    %724 = vector.shape_cast %723 : vector<1x8x128xf32> to vector<8x128xf32>
    %725 = arith.index_cast %715 : i32 to index
    %c0_252 = arith.constant 0 : index
    %726 = vector.load %arg3[%725, %c0_252] : memref<392x128xf32, #tpu.memory_space<vmem>>, vector<8x128xf32>
    %727 = arith.mulf %718, %4 : vector<8x128xf32>
    %728 = arith.mulf %721, %6 : vector<8x128xf32>
    %729 = arith.addf %727, %728 : vector<8x128xf32>
    %730 = arith.mulf %724, %8 : vector<8x128xf32>
    %731 = arith.addf %729, %730 : vector<8x128xf32>
    %732 = arith.addf %731, %10 : vector<8x128xf32>
    %cst_253 = arith.constant 0.000000e+00 : f32
    %733 = vector.broadcast %cst_253 : f32 to vector<8x128xf32>
    %734 = arith.maximumf %732, %733 : vector<8x128xf32>
    %735 = arith.addf %709, %734 : vector<8x128xf32>
    %736 = arith.mulf %734, %734 : vector<8x128xf32>
    %737 = arith.addf %711, %736 : vector<8x128xf32>
    %738 = arith.mulf %734, %726 : vector<8x128xf32>
    %739 = arith.addf %713, %738 : vector<8x128xf32>
    %c28_i32 = arith.constant 28 : i32
    %c8_i32_254 = arith.constant 8 : i32
    %740 = arith.muli %c28_i32, %c8_i32_254 : i32
    %741 = tpu.assume_multiple %740, 8 : i32
    %c0_255 = arith.constant 0 : index
    %742 = arith.index_cast %741 : i32 to index
    %c0_256 = arith.constant 0 : index
    %743 = vector.load %arg2[%c0_255, %742, %c0_256] : memref<3x392x128xf32, #tpu.memory_space<vmem>>, vector<1x8x128xf32>
    %744 = vector.shape_cast %743 : vector<1x8x128xf32> to vector<8x128xf32>
    %c1_257 = arith.constant 1 : index
    %745 = arith.index_cast %741 : i32 to index
    %c0_258 = arith.constant 0 : index
    %746 = vector.load %arg2[%c1_257, %745, %c0_258] : memref<3x392x128xf32, #tpu.memory_space<vmem>>, vector<1x8x128xf32>
    %747 = vector.shape_cast %746 : vector<1x8x128xf32> to vector<8x128xf32>
    %c2_259 = arith.constant 2 : index
    %748 = arith.index_cast %741 : i32 to index
    %c0_260 = arith.constant 0 : index
    %749 = vector.load %arg2[%c2_259, %748, %c0_260] : memref<3x392x128xf32, #tpu.memory_space<vmem>>, vector<1x8x128xf32>
    %750 = vector.shape_cast %749 : vector<1x8x128xf32> to vector<8x128xf32>
    %751 = arith.index_cast %741 : i32 to index
    %c0_261 = arith.constant 0 : index
    %752 = vector.load %arg3[%751, %c0_261] : memref<392x128xf32, #tpu.memory_space<vmem>>, vector<8x128xf32>
    %753 = arith.mulf %744, %4 : vector<8x128xf32>
    %754 = arith.mulf %747, %6 : vector<8x128xf32>
    %755 = arith.addf %753, %754 : vector<8x128xf32>
    %756 = arith.mulf %750, %8 : vector<8x128xf32>
    %757 = arith.addf %755, %756 : vector<8x128xf32>
    %758 = arith.addf %757, %10 : vector<8x128xf32>
    %cst_262 = arith.constant 0.000000e+00 : f32
    %759 = vector.broadcast %cst_262 : f32 to vector<8x128xf32>
    %760 = arith.maximumf %758, %759 : vector<8x128xf32>
    %761 = arith.addf %735, %760 : vector<8x128xf32>
    %762 = arith.mulf %760, %760 : vector<8x128xf32>
    %763 = arith.addf %737, %762 : vector<8x128xf32>
    %764 = arith.mulf %760, %752 : vector<8x128xf32>
    %765 = arith.addf %739, %764 : vector<8x128xf32>
    %c29_i32 = arith.constant 29 : i32
    %c8_i32_263 = arith.constant 8 : i32
    %766 = arith.muli %c29_i32, %c8_i32_263 : i32
    %767 = tpu.assume_multiple %766, 8 : i32
    %c0_264 = arith.constant 0 : index
    %768 = arith.index_cast %767 : i32 to index
    %c0_265 = arith.constant 0 : index
    %769 = vector.load %arg2[%c0_264, %768, %c0_265] : memref<3x392x128xf32, #tpu.memory_space<vmem>>, vector<1x8x128xf32>
    %770 = vector.shape_cast %769 : vector<1x8x128xf32> to vector<8x128xf32>
    %c1_266 = arith.constant 1 : index
    %771 = arith.index_cast %767 : i32 to index
    %c0_267 = arith.constant 0 : index
    %772 = vector.load %arg2[%c1_266, %771, %c0_267] : memref<3x392x128xf32, #tpu.memory_space<vmem>>, vector<1x8x128xf32>
    %773 = vector.shape_cast %772 : vector<1x8x128xf32> to vector<8x128xf32>
    %c2_268 = arith.constant 2 : index
    %774 = arith.index_cast %767 : i32 to index
    %c0_269 = arith.constant 0 : index
    %775 = vector.load %arg2[%c2_268, %774, %c0_269] : memref<3x392x128xf32, #tpu.memory_space<vmem>>, vector<1x8x128xf32>
    %776 = vector.shape_cast %775 : vector<1x8x128xf32> to vector<8x128xf32>
    %777 = arith.index_cast %767 : i32 to index
    %c0_270 = arith.constant 0 : index
    %778 = vector.load %arg3[%777, %c0_270] : memref<392x128xf32, #tpu.memory_space<vmem>>, vector<8x128xf32>
    %779 = arith.mulf %770, %4 : vector<8x128xf32>
    %780 = arith.mulf %773, %6 : vector<8x128xf32>
    %781 = arith.addf %779, %780 : vector<8x128xf32>
    %782 = arith.mulf %776, %8 : vector<8x128xf32>
    %783 = arith.addf %781, %782 : vector<8x128xf32>
    %784 = arith.addf %783, %10 : vector<8x128xf32>
    %cst_271 = arith.constant 0.000000e+00 : f32
    %785 = vector.broadcast %cst_271 : f32 to vector<8x128xf32>
    %786 = arith.maximumf %784, %785 : vector<8x128xf32>
    %787 = arith.addf %761, %786 : vector<8x128xf32>
    %788 = arith.mulf %786, %786 : vector<8x128xf32>
    %789 = arith.addf %763, %788 : vector<8x128xf32>
    %790 = arith.mulf %786, %778 : vector<8x128xf32>
    %791 = arith.addf %765, %790 : vector<8x128xf32>
    %c30_i32 = arith.constant 30 : i32
    %c8_i32_272 = arith.constant 8 : i32
    %792 = arith.muli %c30_i32, %c8_i32_272 : i32
    %793 = tpu.assume_multiple %792, 8 : i32
    %c0_273 = arith.constant 0 : index
    %794 = arith.index_cast %793 : i32 to index
    %c0_274 = arith.constant 0 : index
    %795 = vector.load %arg2[%c0_273, %794, %c0_274] : memref<3x392x128xf32, #tpu.memory_space<vmem>>, vector<1x8x128xf32>
    %796 = vector.shape_cast %795 : vector<1x8x128xf32> to vector<8x128xf32>
    %c1_275 = arith.constant 1 : index
    %797 = arith.index_cast %793 : i32 to index
    %c0_276 = arith.constant 0 : index
    %798 = vector.load %arg2[%c1_275, %797, %c0_276] : memref<3x392x128xf32, #tpu.memory_space<vmem>>, vector<1x8x128xf32>
    %799 = vector.shape_cast %798 : vector<1x8x128xf32> to vector<8x128xf32>
    %c2_277 = arith.constant 2 : index
    %800 = arith.index_cast %793 : i32 to index
    %c0_278 = arith.constant 0 : index
    %801 = vector.load %arg2[%c2_277, %800, %c0_278] : memref<3x392x128xf32, #tpu.memory_space<vmem>>, vector<1x8x128xf32>
    %802 = vector.shape_cast %801 : vector<1x8x128xf32> to vector<8x128xf32>
    %803 = arith.index_cast %793 : i32 to index
    %c0_279 = arith.constant 0 : index
    %804 = vector.load %arg3[%803, %c0_279] : memref<392x128xf32, #tpu.memory_space<vmem>>, vector<8x128xf32>
    %805 = arith.mulf %796, %4 : vector<8x128xf32>
    %806 = arith.mulf %799, %6 : vector<8x128xf32>
    %807 = arith.addf %805, %806 : vector<8x128xf32>
    %808 = arith.mulf %802, %8 : vector<8x128xf32>
    %809 = arith.addf %807, %808 : vector<8x128xf32>
    %810 = arith.addf %809, %10 : vector<8x128xf32>
    %cst_280 = arith.constant 0.000000e+00 : f32
    %811 = vector.broadcast %cst_280 : f32 to vector<8x128xf32>
    %812 = arith.maximumf %810, %811 : vector<8x128xf32>
    %813 = arith.addf %787, %812 : vector<8x128xf32>
    %814 = arith.mulf %812, %812 : vector<8x128xf32>
    %815 = arith.addf %789, %814 : vector<8x128xf32>
    %816 = arith.mulf %812, %804 : vector<8x128xf32>
    %817 = arith.addf %791, %816 : vector<8x128xf32>
    %c31_i32 = arith.constant 31 : i32
    %c8_i32_281 = arith.constant 8 : i32
    %818 = arith.muli %c31_i32, %c8_i32_281 : i32
    %819 = tpu.assume_multiple %818, 8 : i32
    %c0_282 = arith.constant 0 : index
    %820 = arith.index_cast %819 : i32 to index
    %c0_283 = arith.constant 0 : index
    %821 = vector.load %arg2[%c0_282, %820, %c0_283] : memref<3x392x128xf32, #tpu.memory_space<vmem>>, vector<1x8x128xf32>
    %822 = vector.shape_cast %821 : vector<1x8x128xf32> to vector<8x128xf32>
    %c1_284 = arith.constant 1 : index
    %823 = arith.index_cast %819 : i32 to index
    %c0_285 = arith.constant 0 : index
    %824 = vector.load %arg2[%c1_284, %823, %c0_285] : memref<3x392x128xf32, #tpu.memory_space<vmem>>, vector<1x8x128xf32>
    %825 = vector.shape_cast %824 : vector<1x8x128xf32> to vector<8x128xf32>
    %c2_286 = arith.constant 2 : index
    %826 = arith.index_cast %819 : i32 to index
    %c0_287 = arith.constant 0 : index
    %827 = vector.load %arg2[%c2_286, %826, %c0_287] : memref<3x392x128xf32, #tpu.memory_space<vmem>>, vector<1x8x128xf32>
    %828 = vector.shape_cast %827 : vector<1x8x128xf32> to vector<8x128xf32>
    %829 = arith.index_cast %819 : i32 to index
    %c0_288 = arith.constant 0 : index
    %830 = vector.load %arg3[%829, %c0_288] : memref<392x128xf32, #tpu.memory_space<vmem>>, vector<8x128xf32>
    %831 = arith.mulf %822, %4 : vector<8x128xf32>
    %832 = arith.mulf %825, %6 : vector<8x128xf32>
    %833 = arith.addf %831, %832 : vector<8x128xf32>
    %834 = arith.mulf %828, %8 : vector<8x128xf32>
    %835 = arith.addf %833, %834 : vector<8x128xf32>
    %836 = arith.addf %835, %10 : vector<8x128xf32>
    %cst_289 = arith.constant 0.000000e+00 : f32
    %837 = vector.broadcast %cst_289 : f32 to vector<8x128xf32>
    %838 = arith.maximumf %836, %837 : vector<8x128xf32>
    %839 = arith.addf %813, %838 : vector<8x128xf32>
    %840 = arith.mulf %838, %838 : vector<8x128xf32>
    %841 = arith.addf %815, %840 : vector<8x128xf32>
    %842 = arith.mulf %838, %830 : vector<8x128xf32>
    %843 = arith.addf %817, %842 : vector<8x128xf32>
    %c32_i32 = arith.constant 32 : i32
    %c8_i32_290 = arith.constant 8 : i32
    %844 = arith.muli %c32_i32, %c8_i32_290 : i32
    %845 = tpu.assume_multiple %844, 8 : i32
    %c0_291 = arith.constant 0 : index
    %846 = arith.index_cast %845 : i32 to index
    %c0_292 = arith.constant 0 : index
    %847 = vector.load %arg2[%c0_291, %846, %c0_292] : memref<3x392x128xf32, #tpu.memory_space<vmem>>, vector<1x8x128xf32>
    %848 = vector.shape_cast %847 : vector<1x8x128xf32> to vector<8x128xf32>
    %c1_293 = arith.constant 1 : index
    %849 = arith.index_cast %845 : i32 to index
    %c0_294 = arith.constant 0 : index
    %850 = vector.load %arg2[%c1_293, %849, %c0_294] : memref<3x392x128xf32, #tpu.memory_space<vmem>>, vector<1x8x128xf32>
    %851 = vector.shape_cast %850 : vector<1x8x128xf32> to vector<8x128xf32>
    %c2_295 = arith.constant 2 : index
    %852 = arith.index_cast %845 : i32 to index
    %c0_296 = arith.constant 0 : index
    %853 = vector.load %arg2[%c2_295, %852, %c0_296] : memref<3x392x128xf32, #tpu.memory_space<vmem>>, vector<1x8x128xf32>
    %854 = vector.shape_cast %853 : vector<1x8x128xf32> to vector<8x128xf32>
    %855 = arith.index_cast %845 : i32 to index
    %c0_297 = arith.constant 0 : index
    %856 = vector.load %arg3[%855, %c0_297] : memref<392x128xf32, #tpu.memory_space<vmem>>, vector<8x128xf32>
    %857 = arith.mulf %848, %4 : vector<8x128xf32>
    %858 = arith.mulf %851, %6 : vector<8x128xf32>
    %859 = arith.addf %857, %858 : vector<8x128xf32>
    %860 = arith.mulf %854, %8 : vector<8x128xf32>
    %861 = arith.addf %859, %860 : vector<8x128xf32>
    %862 = arith.addf %861, %10 : vector<8x128xf32>
    %cst_298 = arith.constant 0.000000e+00 : f32
    %863 = vector.broadcast %cst_298 : f32 to vector<8x128xf32>
    %864 = arith.maximumf %862, %863 : vector<8x128xf32>
    %865 = arith.addf %839, %864 : vector<8x128xf32>
    %866 = arith.mulf %864, %864 : vector<8x128xf32>
    %867 = arith.addf %841, %866 : vector<8x128xf32>
    %868 = arith.mulf %864, %856 : vector<8x128xf32>
    %869 = arith.addf %843, %868 : vector<8x128xf32>
    %c33_i32 = arith.constant 33 : i32
    %c8_i32_299 = arith.constant 8 : i32
    %870 = arith.muli %c33_i32, %c8_i32_299 : i32
    %871 = tpu.assume_multiple %870, 8 : i32
    %c0_300 = arith.constant 0 : index
    %872 = arith.index_cast %871 : i32 to index
    %c0_301 = arith.constant 0 : index
    %873 = vector.load %arg2[%c0_300, %872, %c0_301] : memref<3x392x128xf32, #tpu.memory_space<vmem>>, vector<1x8x128xf32>
    %874 = vector.shape_cast %873 : vector<1x8x128xf32> to vector<8x128xf32>
    %c1_302 = arith.constant 1 : index
    %875 = arith.index_cast %871 : i32 to index
    %c0_303 = arith.constant 0 : index
    %876 = vector.load %arg2[%c1_302, %875, %c0_303] : memref<3x392x128xf32, #tpu.memory_space<vmem>>, vector<1x8x128xf32>
    %877 = vector.shape_cast %876 : vector<1x8x128xf32> to vector<8x128xf32>
    %c2_304 = arith.constant 2 : index
    %878 = arith.index_cast %871 : i32 to index
    %c0_305 = arith.constant 0 : index
    %879 = vector.load %arg2[%c2_304, %878, %c0_305] : memref<3x392x128xf32, #tpu.memory_space<vmem>>, vector<1x8x128xf32>
    %880 = vector.shape_cast %879 : vector<1x8x128xf32> to vector<8x128xf32>
    %881 = arith.index_cast %871 : i32 to index
    %c0_306 = arith.constant 0 : index
    %882 = vector.load %arg3[%881, %c0_306] : memref<392x128xf32, #tpu.memory_space<vmem>>, vector<8x128xf32>
    %883 = arith.mulf %874, %4 : vector<8x128xf32>
    %884 = arith.mulf %877, %6 : vector<8x128xf32>
    %885 = arith.addf %883, %884 : vector<8x128xf32>
    %886 = arith.mulf %880, %8 : vector<8x128xf32>
    %887 = arith.addf %885, %886 : vector<8x128xf32>
    %888 = arith.addf %887, %10 : vector<8x128xf32>
    %cst_307 = arith.constant 0.000000e+00 : f32
    %889 = vector.broadcast %cst_307 : f32 to vector<8x128xf32>
    %890 = arith.maximumf %888, %889 : vector<8x128xf32>
    %891 = arith.addf %865, %890 : vector<8x128xf32>
    %892 = arith.mulf %890, %890 : vector<8x128xf32>
    %893 = arith.addf %867, %892 : vector<8x128xf32>
    %894 = arith.mulf %890, %882 : vector<8x128xf32>
    %895 = arith.addf %869, %894 : vector<8x128xf32>
    %c34_i32 = arith.constant 34 : i32
    %c8_i32_308 = arith.constant 8 : i32
    %896 = arith.muli %c34_i32, %c8_i32_308 : i32
    %897 = tpu.assume_multiple %896, 8 : i32
    %c0_309 = arith.constant 0 : index
    %898 = arith.index_cast %897 : i32 to index
    %c0_310 = arith.constant 0 : index
    %899 = vector.load %arg2[%c0_309, %898, %c0_310] : memref<3x392x128xf32, #tpu.memory_space<vmem>>, vector<1x8x128xf32>
    %900 = vector.shape_cast %899 : vector<1x8x128xf32> to vector<8x128xf32>
    %c1_311 = arith.constant 1 : index
    %901 = arith.index_cast %897 : i32 to index
    %c0_312 = arith.constant 0 : index
    %902 = vector.load %arg2[%c1_311, %901, %c0_312] : memref<3x392x128xf32, #tpu.memory_space<vmem>>, vector<1x8x128xf32>
    %903 = vector.shape_cast %902 : vector<1x8x128xf32> to vector<8x128xf32>
    %c2_313 = arith.constant 2 : index
    %904 = arith.index_cast %897 : i32 to index
    %c0_314 = arith.constant 0 : index
    %905 = vector.load %arg2[%c2_313, %904, %c0_314] : memref<3x392x128xf32, #tpu.memory_space<vmem>>, vector<1x8x128xf32>
    %906 = vector.shape_cast %905 : vector<1x8x128xf32> to vector<8x128xf32>
    %907 = arith.index_cast %897 : i32 to index
    %c0_315 = arith.constant 0 : index
    %908 = vector.load %arg3[%907, %c0_315] : memref<392x128xf32, #tpu.memory_space<vmem>>, vector<8x128xf32>
    %909 = arith.mulf %900, %4 : vector<8x128xf32>
    %910 = arith.mulf %903, %6 : vector<8x128xf32>
    %911 = arith.addf %909, %910 : vector<8x128xf32>
    %912 = arith.mulf %906, %8 : vector<8x128xf32>
    %913 = arith.addf %911, %912 : vector<8x128xf32>
    %914 = arith.addf %913, %10 : vector<8x128xf32>
    %cst_316 = arith.constant 0.000000e+00 : f32
    %915 = vector.broadcast %cst_316 : f32 to vector<8x128xf32>
    %916 = arith.maximumf %914, %915 : vector<8x128xf32>
    %917 = arith.addf %891, %916 : vector<8x128xf32>
    %918 = arith.mulf %916, %916 : vector<8x128xf32>
    %919 = arith.addf %893, %918 : vector<8x128xf32>
    %920 = arith.mulf %916, %908 : vector<8x128xf32>
    %921 = arith.addf %895, %920 : vector<8x128xf32>
    %c35_i32 = arith.constant 35 : i32
    %c8_i32_317 = arith.constant 8 : i32
    %922 = arith.muli %c35_i32, %c8_i32_317 : i32
    %923 = tpu.assume_multiple %922, 8 : i32
    %c0_318 = arith.constant 0 : index
    %924 = arith.index_cast %923 : i32 to index
    %c0_319 = arith.constant 0 : index
    %925 = vector.load %arg2[%c0_318, %924, %c0_319] : memref<3x392x128xf32, #tpu.memory_space<vmem>>, vector<1x8x128xf32>
    %926 = vector.shape_cast %925 : vector<1x8x128xf32> to vector<8x128xf32>
    %c1_320 = arith.constant 1 : index
    %927 = arith.index_cast %923 : i32 to index
    %c0_321 = arith.constant 0 : index
    %928 = vector.load %arg2[%c1_320, %927, %c0_321] : memref<3x392x128xf32, #tpu.memory_space<vmem>>, vector<1x8x128xf32>
    %929 = vector.shape_cast %928 : vector<1x8x128xf32> to vector<8x128xf32>
    %c2_322 = arith.constant 2 : index
    %930 = arith.index_cast %923 : i32 to index
    %c0_323 = arith.constant 0 : index
    %931 = vector.load %arg2[%c2_322, %930, %c0_323] : memref<3x392x128xf32, #tpu.memory_space<vmem>>, vector<1x8x128xf32>
    %932 = vector.shape_cast %931 : vector<1x8x128xf32> to vector<8x128xf32>
    %933 = arith.index_cast %923 : i32 to index
    %c0_324 = arith.constant 0 : index
    %934 = vector.load %arg3[%933, %c0_324] : memref<392x128xf32, #tpu.memory_space<vmem>>, vector<8x128xf32>
    %935 = arith.mulf %926, %4 : vector<8x128xf32>
    %936 = arith.mulf %929, %6 : vector<8x128xf32>
    %937 = arith.addf %935, %936 : vector<8x128xf32>
    %938 = arith.mulf %932, %8 : vector<8x128xf32>
    %939 = arith.addf %937, %938 : vector<8x128xf32>
    %940 = arith.addf %939, %10 : vector<8x128xf32>
    %cst_325 = arith.constant 0.000000e+00 : f32
    %941 = vector.broadcast %cst_325 : f32 to vector<8x128xf32>
    %942 = arith.maximumf %940, %941 : vector<8x128xf32>
    %943 = arith.addf %917, %942 : vector<8x128xf32>
    %944 = arith.mulf %942, %942 : vector<8x128xf32>
    %945 = arith.addf %919, %944 : vector<8x128xf32>
    %946 = arith.mulf %942, %934 : vector<8x128xf32>
    %947 = arith.addf %921, %946 : vector<8x128xf32>
    %c36_i32 = arith.constant 36 : i32
    %c8_i32_326 = arith.constant 8 : i32
    %948 = arith.muli %c36_i32, %c8_i32_326 : i32
    %949 = tpu.assume_multiple %948, 8 : i32
    %c0_327 = arith.constant 0 : index
    %950 = arith.index_cast %949 : i32 to index
    %c0_328 = arith.constant 0 : index
    %951 = vector.load %arg2[%c0_327, %950, %c0_328] : memref<3x392x128xf32, #tpu.memory_space<vmem>>, vector<1x8x128xf32>
    %952 = vector.shape_cast %951 : vector<1x8x128xf32> to vector<8x128xf32>
    %c1_329 = arith.constant 1 : index
    %953 = arith.index_cast %949 : i32 to index
    %c0_330 = arith.constant 0 : index
    %954 = vector.load %arg2[%c1_329, %953, %c0_330] : memref<3x392x128xf32, #tpu.memory_space<vmem>>, vector<1x8x128xf32>
    %955 = vector.shape_cast %954 : vector<1x8x128xf32> to vector<8x128xf32>
    %c2_331 = arith.constant 2 : index
    %956 = arith.index_cast %949 : i32 to index
    %c0_332 = arith.constant 0 : index
    %957 = vector.load %arg2[%c2_331, %956, %c0_332] : memref<3x392x128xf32, #tpu.memory_space<vmem>>, vector<1x8x128xf32>
    %958 = vector.shape_cast %957 : vector<1x8x128xf32> to vector<8x128xf32>
    %959 = arith.index_cast %949 : i32 to index
    %c0_333 = arith.constant 0 : index
    %960 = vector.load %arg3[%959, %c0_333] : memref<392x128xf32, #tpu.memory_space<vmem>>, vector<8x128xf32>
    %961 = arith.mulf %952, %4 : vector<8x128xf32>
    %962 = arith.mulf %955, %6 : vector<8x128xf32>
    %963 = arith.addf %961, %962 : vector<8x128xf32>
    %964 = arith.mulf %958, %8 : vector<8x128xf32>
    %965 = arith.addf %963, %964 : vector<8x128xf32>
    %966 = arith.addf %965, %10 : vector<8x128xf32>
    %cst_334 = arith.constant 0.000000e+00 : f32
    %967 = vector.broadcast %cst_334 : f32 to vector<8x128xf32>
    %968 = arith.maximumf %966, %967 : vector<8x128xf32>
    %969 = arith.addf %943, %968 : vector<8x128xf32>
    %970 = arith.mulf %968, %968 : vector<8x128xf32>
    %971 = arith.addf %945, %970 : vector<8x128xf32>
    %972 = arith.mulf %968, %960 : vector<8x128xf32>
    %973 = arith.addf %947, %972 : vector<8x128xf32>
    %c37_i32 = arith.constant 37 : i32
    %c8_i32_335 = arith.constant 8 : i32
    %974 = arith.muli %c37_i32, %c8_i32_335 : i32
    %975 = tpu.assume_multiple %974, 8 : i32
    %c0_336 = arith.constant 0 : index
    %976 = arith.index_cast %975 : i32 to index
    %c0_337 = arith.constant 0 : index
    %977 = vector.load %arg2[%c0_336, %976, %c0_337] : memref<3x392x128xf32, #tpu.memory_space<vmem>>, vector<1x8x128xf32>
    %978 = vector.shape_cast %977 : vector<1x8x128xf32> to vector<8x128xf32>
    %c1_338 = arith.constant 1 : index
    %979 = arith.index_cast %975 : i32 to index
    %c0_339 = arith.constant 0 : index
    %980 = vector.load %arg2[%c1_338, %979, %c0_339] : memref<3x392x128xf32, #tpu.memory_space<vmem>>, vector<1x8x128xf32>
    %981 = vector.shape_cast %980 : vector<1x8x128xf32> to vector<8x128xf32>
    %c2_340 = arith.constant 2 : index
    %982 = arith.index_cast %975 : i32 to index
    %c0_341 = arith.constant 0 : index
    %983 = vector.load %arg2[%c2_340, %982, %c0_341] : memref<3x392x128xf32, #tpu.memory_space<vmem>>, vector<1x8x128xf32>
    %984 = vector.shape_cast %983 : vector<1x8x128xf32> to vector<8x128xf32>
    %985 = arith.index_cast %975 : i32 to index
    %c0_342 = arith.constant 0 : index
    %986 = vector.load %arg3[%985, %c0_342] : memref<392x128xf32, #tpu.memory_space<vmem>>, vector<8x128xf32>
    %987 = arith.mulf %978, %4 : vector<8x128xf32>
    %988 = arith.mulf %981, %6 : vector<8x128xf32>
    %989 = arith.addf %987, %988 : vector<8x128xf32>
    %990 = arith.mulf %984, %8 : vector<8x128xf32>
    %991 = arith.addf %989, %990 : vector<8x128xf32>
    %992 = arith.addf %991, %10 : vector<8x128xf32>
    %cst_343 = arith.constant 0.000000e+00 : f32
    %993 = vector.broadcast %cst_343 : f32 to vector<8x128xf32>
    %994 = arith.maximumf %992, %993 : vector<8x128xf32>
    %995 = arith.addf %969, %994 : vector<8x128xf32>
    %996 = arith.mulf %994, %994 : vector<8x128xf32>
    %997 = arith.addf %971, %996 : vector<8x128xf32>
    %998 = arith.mulf %994, %986 : vector<8x128xf32>
    %999 = arith.addf %973, %998 : vector<8x128xf32>
    %c38_i32 = arith.constant 38 : i32
    %c8_i32_344 = arith.constant 8 : i32
    %1000 = arith.muli %c38_i32, %c8_i32_344 : i32
    %1001 = tpu.assume_multiple %1000, 8 : i32
    %c0_345 = arith.constant 0 : index
    %1002 = arith.index_cast %1001 : i32 to index
    %c0_346 = arith.constant 0 : index
    %1003 = vector.load %arg2[%c0_345, %1002, %c0_346] : memref<3x392x128xf32, #tpu.memory_space<vmem>>, vector<1x8x128xf32>
    %1004 = vector.shape_cast %1003 : vector<1x8x128xf32> to vector<8x128xf32>
    %c1_347 = arith.constant 1 : index
    %1005 = arith.index_cast %1001 : i32 to index
    %c0_348 = arith.constant 0 : index
    %1006 = vector.load %arg2[%c1_347, %1005, %c0_348] : memref<3x392x128xf32, #tpu.memory_space<vmem>>, vector<1x8x128xf32>
    %1007 = vector.shape_cast %1006 : vector<1x8x128xf32> to vector<8x128xf32>
    %c2_349 = arith.constant 2 : index
    %1008 = arith.index_cast %1001 : i32 to index
    %c0_350 = arith.constant 0 : index
    %1009 = vector.load %arg2[%c2_349, %1008, %c0_350] : memref<3x392x128xf32, #tpu.memory_space<vmem>>, vector<1x8x128xf32>
    %1010 = vector.shape_cast %1009 : vector<1x8x128xf32> to vector<8x128xf32>
    %1011 = arith.index_cast %1001 : i32 to index
    %c0_351 = arith.constant 0 : index
    %1012 = vector.load %arg3[%1011, %c0_351] : memref<392x128xf32, #tpu.memory_space<vmem>>, vector<8x128xf32>
    %1013 = arith.mulf %1004, %4 : vector<8x128xf32>
    %1014 = arith.mulf %1007, %6 : vector<8x128xf32>
    %1015 = arith.addf %1013, %1014 : vector<8x128xf32>
    %1016 = arith.mulf %1010, %8 : vector<8x128xf32>
    %1017 = arith.addf %1015, %1016 : vector<8x128xf32>
    %1018 = arith.addf %1017, %10 : vector<8x128xf32>
    %cst_352 = arith.constant 0.000000e+00 : f32
    %1019 = vector.broadcast %cst_352 : f32 to vector<8x128xf32>
    %1020 = arith.maximumf %1018, %1019 : vector<8x128xf32>
    %1021 = arith.addf %995, %1020 : vector<8x128xf32>
    %1022 = arith.mulf %1020, %1020 : vector<8x128xf32>
    %1023 = arith.addf %997, %1022 : vector<8x128xf32>
    %1024 = arith.mulf %1020, %1012 : vector<8x128xf32>
    %1025 = arith.addf %999, %1024 : vector<8x128xf32>
    %c39_i32 = arith.constant 39 : i32
    %c8_i32_353 = arith.constant 8 : i32
    %1026 = arith.muli %c39_i32, %c8_i32_353 : i32
    %1027 = tpu.assume_multiple %1026, 8 : i32
    %c0_354 = arith.constant 0 : index
    %1028 = arith.index_cast %1027 : i32 to index
    %c0_355 = arith.constant 0 : index
    %1029 = vector.load %arg2[%c0_354, %1028, %c0_355] : memref<3x392x128xf32, #tpu.memory_space<vmem>>, vector<1x8x128xf32>
    %1030 = vector.shape_cast %1029 : vector<1x8x128xf32> to vector<8x128xf32>
    %c1_356 = arith.constant 1 : index
    %1031 = arith.index_cast %1027 : i32 to index
    %c0_357 = arith.constant 0 : index
    %1032 = vector.load %arg2[%c1_356, %1031, %c0_357] : memref<3x392x128xf32, #tpu.memory_space<vmem>>, vector<1x8x128xf32>
    %1033 = vector.shape_cast %1032 : vector<1x8x128xf32> to vector<8x128xf32>
    %c2_358 = arith.constant 2 : index
    %1034 = arith.index_cast %1027 : i32 to index
    %c0_359 = arith.constant 0 : index
    %1035 = vector.load %arg2[%c2_358, %1034, %c0_359] : memref<3x392x128xf32, #tpu.memory_space<vmem>>, vector<1x8x128xf32>
    %1036 = vector.shape_cast %1035 : vector<1x8x128xf32> to vector<8x128xf32>
    %1037 = arith.index_cast %1027 : i32 to index
    %c0_360 = arith.constant 0 : index
    %1038 = vector.load %arg3[%1037, %c0_360] : memref<392x128xf32, #tpu.memory_space<vmem>>, vector<8x128xf32>
    %1039 = arith.mulf %1030, %4 : vector<8x128xf32>
    %1040 = arith.mulf %1033, %6 : vector<8x128xf32>
    %1041 = arith.addf %1039, %1040 : vector<8x128xf32>
    %1042 = arith.mulf %1036, %8 : vector<8x128xf32>
    %1043 = arith.addf %1041, %1042 : vector<8x128xf32>
    %1044 = arith.addf %1043, %10 : vector<8x128xf32>
    %cst_361 = arith.constant 0.000000e+00 : f32
    %1045 = vector.broadcast %cst_361 : f32 to vector<8x128xf32>
    %1046 = arith.maximumf %1044, %1045 : vector<8x128xf32>
    %1047 = arith.addf %1021, %1046 : vector<8x128xf32>
    %1048 = arith.mulf %1046, %1046 : vector<8x128xf32>
    %1049 = arith.addf %1023, %1048 : vector<8x128xf32>
    %1050 = arith.mulf %1046, %1038 : vector<8x128xf32>
    %1051 = arith.addf %1025, %1050 : vector<8x128xf32>
    %c40_i32 = arith.constant 40 : i32
    %c8_i32_362 = arith.constant 8 : i32
    %1052 = arith.muli %c40_i32, %c8_i32_362 : i32
    %1053 = tpu.assume_multiple %1052, 8 : i32
    %c0_363 = arith.constant 0 : index
    %1054 = arith.index_cast %1053 : i32 to index
    %c0_364 = arith.constant 0 : index
    %1055 = vector.load %arg2[%c0_363, %1054, %c0_364] : memref<3x392x128xf32, #tpu.memory_space<vmem>>, vector<1x8x128xf32>
    %1056 = vector.shape_cast %1055 : vector<1x8x128xf32> to vector<8x128xf32>
    %c1_365 = arith.constant 1 : index
    %1057 = arith.index_cast %1053 : i32 to index
    %c0_366 = arith.constant 0 : index
    %1058 = vector.load %arg2[%c1_365, %1057, %c0_366] : memref<3x392x128xf32, #tpu.memory_space<vmem>>, vector<1x8x128xf32>
    %1059 = vector.shape_cast %1058 : vector<1x8x128xf32> to vector<8x128xf32>
    %c2_367 = arith.constant 2 : index
    %1060 = arith.index_cast %1053 : i32 to index
    %c0_368 = arith.constant 0 : index
    %1061 = vector.load %arg2[%c2_367, %1060, %c0_368] : memref<3x392x128xf32, #tpu.memory_space<vmem>>, vector<1x8x128xf32>
    %1062 = vector.shape_cast %1061 : vector<1x8x128xf32> to vector<8x128xf32>
    %1063 = arith.index_cast %1053 : i32 to index
    %c0_369 = arith.constant 0 : index
    %1064 = vector.load %arg3[%1063, %c0_369] : memref<392x128xf32, #tpu.memory_space<vmem>>, vector<8x128xf32>
    %1065 = arith.mulf %1056, %4 : vector<8x128xf32>
    %1066 = arith.mulf %1059, %6 : vector<8x128xf32>
    %1067 = arith.addf %1065, %1066 : vector<8x128xf32>
    %1068 = arith.mulf %1062, %8 : vector<8x128xf32>
    %1069 = arith.addf %1067, %1068 : vector<8x128xf32>
    %1070 = arith.addf %1069, %10 : vector<8x128xf32>
    %cst_370 = arith.constant 0.000000e+00 : f32
    %1071 = vector.broadcast %cst_370 : f32 to vector<8x128xf32>
    %1072 = arith.maximumf %1070, %1071 : vector<8x128xf32>
    %1073 = arith.addf %1047, %1072 : vector<8x128xf32>
    %1074 = arith.mulf %1072, %1072 : vector<8x128xf32>
    %1075 = arith.addf %1049, %1074 : vector<8x128xf32>
    %1076 = arith.mulf %1072, %1064 : vector<8x128xf32>
    %1077 = arith.addf %1051, %1076 : vector<8x128xf32>
    %c41_i32 = arith.constant 41 : i32
    %c8_i32_371 = arith.constant 8 : i32
    %1078 = arith.muli %c41_i32, %c8_i32_371 : i32
    %1079 = tpu.assume_multiple %1078, 8 : i32
    %c0_372 = arith.constant 0 : index
    %1080 = arith.index_cast %1079 : i32 to index
    %c0_373 = arith.constant 0 : index
    %1081 = vector.load %arg2[%c0_372, %1080, %c0_373] : memref<3x392x128xf32, #tpu.memory_space<vmem>>, vector<1x8x128xf32>
    %1082 = vector.shape_cast %1081 : vector<1x8x128xf32> to vector<8x128xf32>
    %c1_374 = arith.constant 1 : index
    %1083 = arith.index_cast %1079 : i32 to index
    %c0_375 = arith.constant 0 : index
    %1084 = vector.load %arg2[%c1_374, %1083, %c0_375] : memref<3x392x128xf32, #tpu.memory_space<vmem>>, vector<1x8x128xf32>
    %1085 = vector.shape_cast %1084 : vector<1x8x128xf32> to vector<8x128xf32>
    %c2_376 = arith.constant 2 : index
    %1086 = arith.index_cast %1079 : i32 to index
    %c0_377 = arith.constant 0 : index
    %1087 = vector.load %arg2[%c2_376, %1086, %c0_377] : memref<3x392x128xf32, #tpu.memory_space<vmem>>, vector<1x8x128xf32>
    %1088 = vector.shape_cast %1087 : vector<1x8x128xf32> to vector<8x128xf32>
    %1089 = arith.index_cast %1079 : i32 to index
    %c0_378 = arith.constant 0 : index
    %1090 = vector.load %arg3[%1089, %c0_378] : memref<392x128xf32, #tpu.memory_space<vmem>>, vector<8x128xf32>
    %1091 = arith.mulf %1082, %4 : vector<8x128xf32>
    %1092 = arith.mulf %1085, %6 : vector<8x128xf32>
    %1093 = arith.addf %1091, %1092 : vector<8x128xf32>
    %1094 = arith.mulf %1088, %8 : vector<8x128xf32>
    %1095 = arith.addf %1093, %1094 : vector<8x128xf32>
    %1096 = arith.addf %1095, %10 : vector<8x128xf32>
    %cst_379 = arith.constant 0.000000e+00 : f32
    %1097 = vector.broadcast %cst_379 : f32 to vector<8x128xf32>
    %1098 = arith.maximumf %1096, %1097 : vector<8x128xf32>
    %1099 = arith.addf %1073, %1098 : vector<8x128xf32>
    %1100 = arith.mulf %1098, %1098 : vector<8x128xf32>
    %1101 = arith.addf %1075, %1100 : vector<8x128xf32>
    %1102 = arith.mulf %1098, %1090 : vector<8x128xf32>
    %1103 = arith.addf %1077, %1102 : vector<8x128xf32>
    %c42_i32 = arith.constant 42 : i32
    %c8_i32_380 = arith.constant 8 : i32
    %1104 = arith.muli %c42_i32, %c8_i32_380 : i32
    %1105 = tpu.assume_multiple %1104, 8 : i32
    %c0_381 = arith.constant 0 : index
    %1106 = arith.index_cast %1105 : i32 to index
    %c0_382 = arith.constant 0 : index
    %1107 = vector.load %arg2[%c0_381, %1106, %c0_382] : memref<3x392x128xf32, #tpu.memory_space<vmem>>, vector<1x8x128xf32>
    %1108 = vector.shape_cast %1107 : vector<1x8x128xf32> to vector<8x128xf32>
    %c1_383 = arith.constant 1 : index
    %1109 = arith.index_cast %1105 : i32 to index
    %c0_384 = arith.constant 0 : index
    %1110 = vector.load %arg2[%c1_383, %1109, %c0_384] : memref<3x392x128xf32, #tpu.memory_space<vmem>>, vector<1x8x128xf32>
    %1111 = vector.shape_cast %1110 : vector<1x8x128xf32> to vector<8x128xf32>
    %c2_385 = arith.constant 2 : index
    %1112 = arith.index_cast %1105 : i32 to index
    %c0_386 = arith.constant 0 : index
    %1113 = vector.load %arg2[%c2_385, %1112, %c0_386] : memref<3x392x128xf32, #tpu.memory_space<vmem>>, vector<1x8x128xf32>
    %1114 = vector.shape_cast %1113 : vector<1x8x128xf32> to vector<8x128xf32>
    %1115 = arith.index_cast %1105 : i32 to index
    %c0_387 = arith.constant 0 : index
    %1116 = vector.load %arg3[%1115, %c0_387] : memref<392x128xf32, #tpu.memory_space<vmem>>, vector<8x128xf32>
    %1117 = arith.mulf %1108, %4 : vector<8x128xf32>
    %1118 = arith.mulf %1111, %6 : vector<8x128xf32>
    %1119 = arith.addf %1117, %1118 : vector<8x128xf32>
    %1120 = arith.mulf %1114, %8 : vector<8x128xf32>
    %1121 = arith.addf %1119, %1120 : vector<8x128xf32>
    %1122 = arith.addf %1121, %10 : vector<8x128xf32>
    %cst_388 = arith.constant 0.000000e+00 : f32
    %1123 = vector.broadcast %cst_388 : f32 to vector<8x128xf32>
    %1124 = arith.maximumf %1122, %1123 : vector<8x128xf32>
    %1125 = arith.addf %1099, %1124 : vector<8x128xf32>
    %1126 = arith.mulf %1124, %1124 : vector<8x128xf32>
    %1127 = arith.addf %1101, %1126 : vector<8x128xf32>
    %1128 = arith.mulf %1124, %1116 : vector<8x128xf32>
    %1129 = arith.addf %1103, %1128 : vector<8x128xf32>
    %c43_i32 = arith.constant 43 : i32
    %c8_i32_389 = arith.constant 8 : i32
    %1130 = arith.muli %c43_i32, %c8_i32_389 : i32
    %1131 = tpu.assume_multiple %1130, 8 : i32
    %c0_390 = arith.constant 0 : index
    %1132 = arith.index_cast %1131 : i32 to index
    %c0_391 = arith.constant 0 : index
    %1133 = vector.load %arg2[%c0_390, %1132, %c0_391] : memref<3x392x128xf32, #tpu.memory_space<vmem>>, vector<1x8x128xf32>
    %1134 = vector.shape_cast %1133 : vector<1x8x128xf32> to vector<8x128xf32>
    %c1_392 = arith.constant 1 : index
    %1135 = arith.index_cast %1131 : i32 to index
    %c0_393 = arith.constant 0 : index
    %1136 = vector.load %arg2[%c1_392, %1135, %c0_393] : memref<3x392x128xf32, #tpu.memory_space<vmem>>, vector<1x8x128xf32>
    %1137 = vector.shape_cast %1136 : vector<1x8x128xf32> to vector<8x128xf32>
    %c2_394 = arith.constant 2 : index
    %1138 = arith.index_cast %1131 : i32 to index
    %c0_395 = arith.constant 0 : index
    %1139 = vector.load %arg2[%c2_394, %1138, %c0_395] : memref<3x392x128xf32, #tpu.memory_space<vmem>>, vector<1x8x128xf32>
    %1140 = vector.shape_cast %1139 : vector<1x8x128xf32> to vector<8x128xf32>
    %1141 = arith.index_cast %1131 : i32 to index
    %c0_396 = arith.constant 0 : index
    %1142 = vector.load %arg3[%1141, %c0_396] : memref<392x128xf32, #tpu.memory_space<vmem>>, vector<8x128xf32>
    %1143 = arith.mulf %1134, %4 : vector<8x128xf32>
    %1144 = arith.mulf %1137, %6 : vector<8x128xf32>
    %1145 = arith.addf %1143, %1144 : vector<8x128xf32>
    %1146 = arith.mulf %1140, %8 : vector<8x128xf32>
    %1147 = arith.addf %1145, %1146 : vector<8x128xf32>
    %1148 = arith.addf %1147, %10 : vector<8x128xf32>
    %cst_397 = arith.constant 0.000000e+00 : f32
    %1149 = vector.broadcast %cst_397 : f32 to vector<8x128xf32>
    %1150 = arith.maximumf %1148, %1149 : vector<8x128xf32>
    %1151 = arith.addf %1125, %1150 : vector<8x128xf32>
    %1152 = arith.mulf %1150, %1150 : vector<8x128xf32>
    %1153 = arith.addf %1127, %1152 : vector<8x128xf32>
    %1154 = arith.mulf %1150, %1142 : vector<8x128xf32>
    %1155 = arith.addf %1129, %1154 : vector<8x128xf32>
    %c44_i32 = arith.constant 44 : i32
    %c8_i32_398 = arith.constant 8 : i32
    %1156 = arith.muli %c44_i32, %c8_i32_398 : i32
    %1157 = tpu.assume_multiple %1156, 8 : i32
    %c0_399 = arith.constant 0 : index
    %1158 = arith.index_cast %1157 : i32 to index
    %c0_400 = arith.constant 0 : index
    %1159 = vector.load %arg2[%c0_399, %1158, %c0_400] : memref<3x392x128xf32, #tpu.memory_space<vmem>>, vector<1x8x128xf32>
    %1160 = vector.shape_cast %1159 : vector<1x8x128xf32> to vector<8x128xf32>
    %c1_401 = arith.constant 1 : index
    %1161 = arith.index_cast %1157 : i32 to index
    %c0_402 = arith.constant 0 : index
    %1162 = vector.load %arg2[%c1_401, %1161, %c0_402] : memref<3x392x128xf32, #tpu.memory_space<vmem>>, vector<1x8x128xf32>
    %1163 = vector.shape_cast %1162 : vector<1x8x128xf32> to vector<8x128xf32>
    %c2_403 = arith.constant 2 : index
    %1164 = arith.index_cast %1157 : i32 to index
    %c0_404 = arith.constant 0 : index
    %1165 = vector.load %arg2[%c2_403, %1164, %c0_404] : memref<3x392x128xf32, #tpu.memory_space<vmem>>, vector<1x8x128xf32>
    %1166 = vector.shape_cast %1165 : vector<1x8x128xf32> to vector<8x128xf32>
    %1167 = arith.index_cast %1157 : i32 to index
    %c0_405 = arith.constant 0 : index
    %1168 = vector.load %arg3[%1167, %c0_405] : memref<392x128xf32, #tpu.memory_space<vmem>>, vector<8x128xf32>
    %1169 = arith.mulf %1160, %4 : vector<8x128xf32>
    %1170 = arith.mulf %1163, %6 : vector<8x128xf32>
    %1171 = arith.addf %1169, %1170 : vector<8x128xf32>
    %1172 = arith.mulf %1166, %8 : vector<8x128xf32>
    %1173 = arith.addf %1171, %1172 : vector<8x128xf32>
    %1174 = arith.addf %1173, %10 : vector<8x128xf32>
    %cst_406 = arith.constant 0.000000e+00 : f32
    %1175 = vector.broadcast %cst_406 : f32 to vector<8x128xf32>
    %1176 = arith.maximumf %1174, %1175 : vector<8x128xf32>
    %1177 = arith.addf %1151, %1176 : vector<8x128xf32>
    %1178 = arith.mulf %1176, %1176 : vector<8x128xf32>
    %1179 = arith.addf %1153, %1178 : vector<8x128xf32>
    %1180 = arith.mulf %1176, %1168 : vector<8x128xf32>
    %1181 = arith.addf %1155, %1180 : vector<8x128xf32>
    %c45_i32 = arith.constant 45 : i32
    %c8_i32_407 = arith.constant 8 : i32
    %1182 = arith.muli %c45_i32, %c8_i32_407 : i32
    %1183 = tpu.assume_multiple %1182, 8 : i32
    %c0_408 = arith.constant 0 : index
    %1184 = arith.index_cast %1183 : i32 to index
    %c0_409 = arith.constant 0 : index
    %1185 = vector.load %arg2[%c0_408, %1184, %c0_409] : memref<3x392x128xf32, #tpu.memory_space<vmem>>, vector<1x8x128xf32>
    %1186 = vector.shape_cast %1185 : vector<1x8x128xf32> to vector<8x128xf32>
    %c1_410 = arith.constant 1 : index
    %1187 = arith.index_cast %1183 : i32 to index
    %c0_411 = arith.constant 0 : index
    %1188 = vector.load %arg2[%c1_410, %1187, %c0_411] : memref<3x392x128xf32, #tpu.memory_space<vmem>>, vector<1x8x128xf32>
    %1189 = vector.shape_cast %1188 : vector<1x8x128xf32> to vector<8x128xf32>
    %c2_412 = arith.constant 2 : index
    %1190 = arith.index_cast %1183 : i32 to index
    %c0_413 = arith.constant 0 : index
    %1191 = vector.load %arg2[%c2_412, %1190, %c0_413] : memref<3x392x128xf32, #tpu.memory_space<vmem>>, vector<1x8x128xf32>
    %1192 = vector.shape_cast %1191 : vector<1x8x128xf32> to vector<8x128xf32>
    %1193 = arith.index_cast %1183 : i32 to index
    %c0_414 = arith.constant 0 : index
    %1194 = vector.load %arg3[%1193, %c0_414] : memref<392x128xf32, #tpu.memory_space<vmem>>, vector<8x128xf32>
    %1195 = arith.mulf %1186, %4 : vector<8x128xf32>
    %1196 = arith.mulf %1189, %6 : vector<8x128xf32>
    %1197 = arith.addf %1195, %1196 : vector<8x128xf32>
    %1198 = arith.mulf %1192, %8 : vector<8x128xf32>
    %1199 = arith.addf %1197, %1198 : vector<8x128xf32>
    %1200 = arith.addf %1199, %10 : vector<8x128xf32>
    %cst_415 = arith.constant 0.000000e+00 : f32
    %1201 = vector.broadcast %cst_415 : f32 to vector<8x128xf32>
    %1202 = arith.maximumf %1200, %1201 : vector<8x128xf32>
    %1203 = arith.addf %1177, %1202 : vector<8x128xf32>
    %1204 = arith.mulf %1202, %1202 : vector<8x128xf32>
    %1205 = arith.addf %1179, %1204 : vector<8x128xf32>
    %1206 = arith.mulf %1202, %1194 : vector<8x128xf32>
    %1207 = arith.addf %1181, %1206 : vector<8x128xf32>
    %c46_i32 = arith.constant 46 : i32
    %c8_i32_416 = arith.constant 8 : i32
    %1208 = arith.muli %c46_i32, %c8_i32_416 : i32
    %1209 = tpu.assume_multiple %1208, 8 : i32
    %c0_417 = arith.constant 0 : index
    %1210 = arith.index_cast %1209 : i32 to index
    %c0_418 = arith.constant 0 : index
    %1211 = vector.load %arg2[%c0_417, %1210, %c0_418] : memref<3x392x128xf32, #tpu.memory_space<vmem>>, vector<1x8x128xf32>
    %1212 = vector.shape_cast %1211 : vector<1x8x128xf32> to vector<8x128xf32>
    %c1_419 = arith.constant 1 : index
    %1213 = arith.index_cast %1209 : i32 to index
    %c0_420 = arith.constant 0 : index
    %1214 = vector.load %arg2[%c1_419, %1213, %c0_420] : memref<3x392x128xf32, #tpu.memory_space<vmem>>, vector<1x8x128xf32>
    %1215 = vector.shape_cast %1214 : vector<1x8x128xf32> to vector<8x128xf32>
    %c2_421 = arith.constant 2 : index
    %1216 = arith.index_cast %1209 : i32 to index
    %c0_422 = arith.constant 0 : index
    %1217 = vector.load %arg2[%c2_421, %1216, %c0_422] : memref<3x392x128xf32, #tpu.memory_space<vmem>>, vector<1x8x128xf32>
    %1218 = vector.shape_cast %1217 : vector<1x8x128xf32> to vector<8x128xf32>
    %1219 = arith.index_cast %1209 : i32 to index
    %c0_423 = arith.constant 0 : index
    %1220 = vector.load %arg3[%1219, %c0_423] : memref<392x128xf32, #tpu.memory_space<vmem>>, vector<8x128xf32>
    %1221 = arith.mulf %1212, %4 : vector<8x128xf32>
    %1222 = arith.mulf %1215, %6 : vector<8x128xf32>
    %1223 = arith.addf %1221, %1222 : vector<8x128xf32>
    %1224 = arith.mulf %1218, %8 : vector<8x128xf32>
    %1225 = arith.addf %1223, %1224 : vector<8x128xf32>
    %1226 = arith.addf %1225, %10 : vector<8x128xf32>
    %cst_424 = arith.constant 0.000000e+00 : f32
    %1227 = vector.broadcast %cst_424 : f32 to vector<8x128xf32>
    %1228 = arith.maximumf %1226, %1227 : vector<8x128xf32>
    %1229 = arith.addf %1203, %1228 : vector<8x128xf32>
    %1230 = arith.mulf %1228, %1228 : vector<8x128xf32>
    %1231 = arith.addf %1205, %1230 : vector<8x128xf32>
    %1232 = arith.mulf %1228, %1220 : vector<8x128xf32>
    %1233 = arith.addf %1207, %1232 : vector<8x128xf32>
    %c47_i32 = arith.constant 47 : i32
    %c8_i32_425 = arith.constant 8 : i32
    %1234 = arith.muli %c47_i32, %c8_i32_425 : i32
    %1235 = tpu.assume_multiple %1234, 8 : i32
    %c0_426 = arith.constant 0 : index
    %1236 = arith.index_cast %1235 : i32 to index
    %c0_427 = arith.constant 0 : index
    %1237 = vector.load %arg2[%c0_426, %1236, %c0_427] : memref<3x392x128xf32, #tpu.memory_space<vmem>>, vector<1x8x128xf32>
    %1238 = vector.shape_cast %1237 : vector<1x8x128xf32> to vector<8x128xf32>
    %c1_428 = arith.constant 1 : index
    %1239 = arith.index_cast %1235 : i32 to index
    %c0_429 = arith.constant 0 : index
    %1240 = vector.load %arg2[%c1_428, %1239, %c0_429] : memref<3x392x128xf32, #tpu.memory_space<vmem>>, vector<1x8x128xf32>
    %1241 = vector.shape_cast %1240 : vector<1x8x128xf32> to vector<8x128xf32>
    %c2_430 = arith.constant 2 : index
    %1242 = arith.index_cast %1235 : i32 to index
    %c0_431 = arith.constant 0 : index
    %1243 = vector.load %arg2[%c2_430, %1242, %c0_431] : memref<3x392x128xf32, #tpu.memory_space<vmem>>, vector<1x8x128xf32>
    %1244 = vector.shape_cast %1243 : vector<1x8x128xf32> to vector<8x128xf32>
    %1245 = arith.index_cast %1235 : i32 to index
    %c0_432 = arith.constant 0 : index
    %1246 = vector.load %arg3[%1245, %c0_432] : memref<392x128xf32, #tpu.memory_space<vmem>>, vector<8x128xf32>
    %1247 = arith.mulf %1238, %4 : vector<8x128xf32>
    %1248 = arith.mulf %1241, %6 : vector<8x128xf32>
    %1249 = arith.addf %1247, %1248 : vector<8x128xf32>
    %1250 = arith.mulf %1244, %8 : vector<8x128xf32>
    %1251 = arith.addf %1249, %1250 : vector<8x128xf32>
    %1252 = arith.addf %1251, %10 : vector<8x128xf32>
    %cst_433 = arith.constant 0.000000e+00 : f32
    %1253 = vector.broadcast %cst_433 : f32 to vector<8x128xf32>
    %1254 = arith.maximumf %1252, %1253 : vector<8x128xf32>
    %1255 = arith.addf %1229, %1254 : vector<8x128xf32>
    %1256 = arith.mulf %1254, %1254 : vector<8x128xf32>
    %1257 = arith.addf %1231, %1256 : vector<8x128xf32>
    %1258 = arith.mulf %1254, %1246 : vector<8x128xf32>
    %1259 = arith.addf %1233, %1258 : vector<8x128xf32>
    %c48_i32 = arith.constant 48 : i32
    %c8_i32_434 = arith.constant 8 : i32
    %1260 = arith.muli %c48_i32, %c8_i32_434 : i32
    %1261 = tpu.assume_multiple %1260, 8 : i32
    %c0_435 = arith.constant 0 : index
    %1262 = arith.index_cast %1261 : i32 to index
    %c0_436 = arith.constant 0 : index
    %1263 = vector.load %arg2[%c0_435, %1262, %c0_436] : memref<3x392x128xf32, #tpu.memory_space<vmem>>, vector<1x8x128xf32>
    %1264 = vector.shape_cast %1263 : vector<1x8x128xf32> to vector<8x128xf32>
    %c1_437 = arith.constant 1 : index
    %1265 = arith.index_cast %1261 : i32 to index
    %c0_438 = arith.constant 0 : index
    %1266 = vector.load %arg2[%c1_437, %1265, %c0_438] : memref<3x392x128xf32, #tpu.memory_space<vmem>>, vector<1x8x128xf32>
    %1267 = vector.shape_cast %1266 : vector<1x8x128xf32> to vector<8x128xf32>
    %c2_439 = arith.constant 2 : index
    %1268 = arith.index_cast %1261 : i32 to index
    %c0_440 = arith.constant 0 : index
    %1269 = vector.load %arg2[%c2_439, %1268, %c0_440] : memref<3x392x128xf32, #tpu.memory_space<vmem>>, vector<1x8x128xf32>
    %1270 = vector.shape_cast %1269 : vector<1x8x128xf32> to vector<8x128xf32>
    %1271 = arith.index_cast %1261 : i32 to index
    %c0_441 = arith.constant 0 : index
    %1272 = vector.load %arg3[%1271, %c0_441] : memref<392x128xf32, #tpu.memory_space<vmem>>, vector<8x128xf32>
    %1273 = arith.mulf %1264, %4 : vector<8x128xf32>
    %1274 = arith.mulf %1267, %6 : vector<8x128xf32>
    %1275 = arith.addf %1273, %1274 : vector<8x128xf32>
    %1276 = arith.mulf %1270, %8 : vector<8x128xf32>
    %1277 = arith.addf %1275, %1276 : vector<8x128xf32>
    %1278 = arith.addf %1277, %10 : vector<8x128xf32>
    %cst_442 = arith.constant 0.000000e+00 : f32
    %1279 = vector.broadcast %cst_442 : f32 to vector<8x128xf32>
    %1280 = arith.maximumf %1278, %1279 : vector<8x128xf32>
    %1281 = arith.addf %1255, %1280 : vector<8x128xf32>
    %1282 = arith.mulf %1280, %1280 : vector<8x128xf32>
    %1283 = arith.addf %1257, %1282 : vector<8x128xf32>
    %1284 = arith.mulf %1280, %1272 : vector<8x128xf32>
    %1285 = arith.addf %1259, %1284 : vector<8x128xf32>
    %c49_i32 = arith.constant 49 : i32
    %c0_443 = arith.constant 0 : index
    %1286 = memref.load %arg5[%c0_443] : memref<3xf32, #tpu.memory_space<smem>>
    %1287 = vector.shape_cast %1281 : vector<8x128xf32> to vector<1x8x128xf32>
    %cst_444 = arith.constant dense<0.000000e+00> : vector<1xf32>
    %1288 = vector.multi_reduction <add>, %1287, %cst_444 [1, 2] : vector<1x8x128xf32> to vector<1xf32>
    %1289 = vector.shape_cast %1288 : vector<1xf32> to vector<1x1x1xf32>
    %1290 = vector.extract %1289[0, 0, 0] : f32 from vector<1x1x1xf32>
    %1291 = arith.addf %1286, %1290 : f32
    %c0_445 = arith.constant 0 : index
    %1292 = memref.load %arg5[%c0_445] : memref<3xf32, #tpu.memory_space<smem>>
    memref.store %1291, %arg5[%c0_445] : memref<3xf32, #tpu.memory_space<smem>>
    %c1_446 = arith.constant 1 : index
    %1293 = memref.load %arg5[%c1_446] : memref<3xf32, #tpu.memory_space<smem>>
    %1294 = vector.shape_cast %1283 : vector<8x128xf32> to vector<1x8x128xf32>
    %cst_447 = arith.constant dense<0.000000e+00> : vector<1xf32>
    %1295 = vector.multi_reduction <add>, %1294, %cst_447 [1, 2] : vector<1x8x128xf32> to vector<1xf32>
    %1296 = vector.shape_cast %1295 : vector<1xf32> to vector<1x1x1xf32>
    %1297 = vector.extract %1296[0, 0, 0] : f32 from vector<1x1x1xf32>
    %1298 = arith.addf %1293, %1297 : f32
    %c1_448 = arith.constant 1 : index
    %1299 = memref.load %arg5[%c1_448] : memref<3xf32, #tpu.memory_space<smem>>
    memref.store %1298, %arg5[%c1_448] : memref<3xf32, #tpu.memory_space<smem>>
    %c2_449 = arith.constant 2 : index
    %1300 = memref.load %arg5[%c2_449] : memref<3xf32, #tpu.memory_space<smem>>
    %1301 = vector.shape_cast %1285 : vector<8x128xf32> to vector<1x8x128xf32>
    %cst_450 = arith.constant dense<0.000000e+00> : vector<1xf32>
    %1302 = vector.multi_reduction <add>, %1301, %cst_450 [1, 2] : vector<1x8x128xf32> to vector<1xf32>
    %1303 = vector.shape_cast %1302 : vector<1xf32> to vector<1x1x1xf32>
    %1304 = vector.extract %1303[0, 0, 0] : f32 from vector<1x1x1xf32>
    %1305 = arith.addf %1300, %1304 : f32
    %c2_451 = arith.constant 2 : index
    %1306 = memref.load %arg5[%c2_451] : memref<3xf32, #tpu.memory_space<smem>>
    memref.store %1305, %arg5[%c2_451] : memref<3xf32, #tpu.memory_space<smem>>
    %c0_i32_452 = arith.constant 0 : i32
    %1307 = arith.cmpi eq, %arg0, %c0_i32_452 : i32
    %1308 = arith.extui %1307 : i1 to i32
    %c0_i32_453 = arith.constant 0 : i32
    %1309 = arith.cmpi ne, %1308, %c0_i32_453 : i32
    scf.if %1309 {
      %c4 = arith.constant 4 : index
      %1310 = memref.load %arg1[%c4] : memref<8xf32, #tpu.memory_space<smem>>
      %c5 = arith.constant 5 : index
      %1311 = memref.load %arg1[%c5] : memref<8xf32, #tpu.memory_space<smem>>
      %c6 = arith.constant 6 : index
      %1312 = memref.load %arg1[%c6] : memref<8xf32, #tpu.memory_space<smem>>
      %c7 = arith.constant 7 : index
      %1313 = memref.load %arg1[%c7] : memref<8xf32, #tpu.memory_space<smem>>
      %c0_454 = arith.constant 0 : index
      %1314 = memref.load %arg5[%c0_454] : memref<3xf32, #tpu.memory_space<smem>>
      %c1_455 = arith.constant 1 : index
      %1315 = memref.load %arg5[%c1_455] : memref<3xf32, #tpu.memory_space<smem>>
      %c2_456 = arith.constant 2 : index
      %1316 = memref.load %arg5[%c2_456] : memref<3xf32, #tpu.memory_space<smem>>
      %cst_457 = arith.constant 1.99298465E-5 : f32
      %1317 = arith.mulf %1314, %cst_457 : f32
      %cst_458 = arith.constant 1.99298465E-5 : f32
      %1318 = arith.mulf %1315, %cst_458 : f32
      %1319 = arith.mulf %1317, %1317 : f32
      %1320 = arith.subf %1318, %1319 : f32
      %cst_459 = arith.constant 0.000000e+00 : f32
      %1321 = arith.maximumf %1320, %cst_459 : f32
      %1322 = arith.mulf %1310, %1310 : f32
      %1323 = arith.mulf %1322, %1321 : f32
      %cst_460 = arith.constant 9.99999974E-6 : f32
      %1324 = arith.addf %1323, %cst_460 : f32
      %1325 = math.rsqrt %1324 : f32
      %1326 = arith.mulf %1311, %1310 : f32
      %1327 = arith.mulf %1326, %1325 : f32
      %1328 = arith.mulf %1317, %1312 : f32
      %1329 = arith.subf %1316, %1328 : f32
      %1330 = arith.mulf %1327, %1329 : f32
      %1331 = arith.addf %1330, %1313 : f32
      %c0_461 = arith.constant 0 : index
      %c0_462 = arith.constant 0 : index
      %1332 = memref.load %arg4[%c0_461, %c0_462] : memref<1x1xf32, #tpu.memory_space<smem>>
      memref.store %1331, %arg4[%c0_461, %c0_462] : memref<1x1xf32, #tpu.memory_space<smem>>
    } else {
    }
    return
  }
  func.func @transform_0(%arg0: i32, %arg1: memref<8xf32, #tpu.memory_space<smem>>) -> (i32, i32, i32) {
    %c0_i32 = arith.constant 0 : i32
    %c0_i32_0 = arith.constant 0 : i32
    %c0_i32_1 = arith.constant 0 : i32
    return %c0_i32, %c0_i32_0, %arg0 : i32, i32, i32
  }
  func.func @transform_1(%arg0: i32, %arg1: memref<8xf32, #tpu.memory_space<smem>>) -> (i32, i32) {
    %c0_i32 = arith.constant 0 : i32
    %c0_i32_0 = arith.constant 0 : i32
    return %c0_i32, %arg0 : i32, i32
  }
  func.func @transform_2(%arg0: i32, %arg1: memref<8xf32, #tpu.memory_space<smem>>) -> (i32, i32) {
    %c0_i32 = arith.constant 0 : i32
    %c0_i32_0 = arith.constant 0 : i32
    %c0_i32_1 = arith.constant 0 : i32
    return %c0_i32, %c0_i32_0 : i32, i32
  }
}

</mosaic_0001>

<bundles_post_ra>
// kernel: partial_quant_forward.1
= control target key start
LH: loop header
LB: loop body
LE: loop exit
PB: predicated region body
PF: predicated region fallthrough
CT: control target
= control target key end

     0   :  { %s1551_s15 = smov [#allocation4]   ;;  %s2676_s0 = inlined_call_operand.vmem [shape: f32[8], index: 0, kind: input, shape index: {}]   ;;  %s2677_s1 = inlined_call_operand.vmem [shape: f32[3,392,128], index: 1, kind: input, shape index: {}]   ;;  %s2678_s2 = inlined_call_operand.vmem [shape: f32[392,128], index: 2, kind: input, shape index: {}]   ;;  %s2679_s3 = inlined_call_operand.hbm [shape: f32[1,1], index: 3, kind: output, shape index: {}]  }
   0x1   :  { %s9_s14 = sshll.u32 %s2676_s0, 4  ;;  %s10_s14 = int_to_ptr.vmem [resolvable:$true] %s9_s14 }
   0x2   :  { %12 = dma.vmem_to_smem %s10_s14, 16, %s1551_s15, [#allocation3] }
   0x3   :  { %1547 = dma.done.wait [#allocation3], 16 }
   0x4   :  { %1548 = vsyncadd [#allocation3], 4294967280 }
   0x5   :  { %15 = sfence }
   0x6   :  { %s31_s16 = sld [smem:[#allocation4]]  ;;  %v39_v0 = vld [vmem:[%s2677_s1] sm:$0xff]  ;;  %v1310_v1 = vld [vmem:[%s2677_s1 + $0x8] sm:$0xff]  ;;  %v1314_v2 = vld [vmem:[%s2677_s1 + $0x10] sm:$0xff] }
   0x7   :  { %s1305_s17 = sld [smem:[#allocation4 + $0x1]]  ;;  %v1308_v3 = vld [vmem:[%s2677_s1 + $0x188] sm:$0xff]  ;;  %v1311_v4 = vld [vmem:[%s2677_s1 + $0x190] sm:$0xff]  ;;  %v1315_v5 = vld [vmem:[%s2677_s1 + $0x198] sm:$0xff] }
   0x8   :  { %s1306_s18 = sld [smem:[#allocation4 + $0x2]]  ;;  %v1309_v7 = vld [vmem:[%s2677_s1 + $0x310] sm:$0xff]  ;;  %v1312_v8 = vld [vmem:[%s2677_s1 + $0x318] sm:$0xff]  ;;  %v1316_v9 = vld [vmem:[%s2677_s1 + $0x320] sm:$0xff] }
   0x9   :  { %s1307_s19 = sld [smem:[#allocation4 + $0x3]]  ;;  %v1318_v14 = vld [vmem:[%s2677_s1 + $0x18] sm:$0xff]  ;;  %v1319_v15 = vld [vmem:[%s2677_s1 + $0x1a0] sm:$0xff]  ;;  %v1320_v20 = vld [vmem:[%s2677_s1 + $0x328] sm:$0xff] }
   0xa   :  { %v1322_v21 = vld [vmem:[%s2677_s1 + $0x20] sm:$0xff]  ;;  %v1323_v22 = vld [vmem:[%s2677_s1 + $0x1a8] sm:$0xff]  ;;  %v1324_v27 = vld [vmem:[%s2677_s1 + $0x330] sm:$0xff] }
   0xb   :  { %v1326_v32 = vld [vmem:[%s2677_s1 + $0x28] sm:$0xff]  ;;  %v1327_v33 = vld [vmem:[%s2677_s1 + $0x1b0] sm:$0xff]  ;;  %v1328_v38 = vld [vmem:[%s2677_s1 + $0x338] sm:$0xff] }
   0xc   :  { %v1595_v6 = vstv %s31_s16  ;;  %v1330_v43 = vld [vmem:[%s2677_s1 + $0x30] sm:$0xff]  ;;  %v1331_v48 = vld [vmem:[%s2677_s1 + $0x1b8] sm:$0xff]  ;;  %v1332_v53 = vld [vmem:[%s2677_s1 + $0x340] sm:$0xff] }
   0xd   :  { %v1606_v10 = vstv %s1305_s17  ;;  %v47_v11 = vmul.f32 %v39_v0, %v1595_v6  ;;  %v69_v12 = vmul.f32 %v1310_v1, %v1595_v6  ;;  %v91_v13 = vmul.f32 %v1314_v2, %v1595_v6  ;;  %v1334_v58 = vld [vmem:[%s2677_s1 + $0x38] sm:$0xff]  ;;  %v1335_v59 = vld [vmem:[%s2677_s1 + $0x1c0] sm:$0xff]  ;;  %v1336_v0 = vld [vmem:[%s2677_s1 + $0x348] sm:$0xff] }
   0xe   :  { %v1617_v16 = vstv %s1306_s18  ;;  %v48_v17 = vmul.f32 %v1308_v3, %v1606_v10  ;;  %v70_v18 = vmul.f32 %v1311_v4, %v1606_v10  ;;  %v92_v19 = vmul.f32 %v1315_v5, %v1606_v10  ;;  %v1338_v5 = vld [vmem:[%s2677_s1 + $0x40] sm:$0xff] }
   0xf   :  { %v1631_v23 = vstv %s1307_s19  ;;  %v50_v24 = vmul.f32 %v1309_v7, %v1617_v16  ;;  %v72_v25 = vmul.f32 %v1312_v8, %v1617_v16  ;;  %v94_v26 = vmul.f32 %v1316_v9, %v1617_v16 }
  0x10   :  { %v49_v28 = vadd.f32 %v48_v17, %v47_v11  ;;  %v71_v29 = vadd.f32 %v70_v18, %v69_v12  ;;  %v93_v30 = vadd.f32 %v92_v19, %v91_v13  ;;  %v113_v31 = vmul.f32 %v1318_v14, %v1595_v6  ;;  %v1339_v12 = vld [vmem:[%s2677_s1 + $0x1c8] sm:$0xff]  ;;  %v1340_v13 = vld [vmem:[%s2677_s1 + $0x350] sm:$0xff] }
  0x11   :  { %v114_v34 = vmul.f32 %v1319_v15, %v1606_v10  ;;  %v116_v35 = vmul.f32 %v1320_v20, %v1617_v16  ;;  %v135_v36 = vmul.f32 %v1322_v21, %v1595_v6  ;;  %v136_v37 = vmul.f32 %v1323_v22, %v1606_v10  ;;  %v1342_v14 = vld [vmem:[%s2677_s1 + $0x48] sm:$0xff]  ;;  %v1343_v20 = vld [vmem:[%s2677_s1 + $0x1d0] sm:$0xff] }
  0x12   :  { %v51_v39 = vadd.f32 %v50_v24, %v49_v28  ;;  %v73_v40 = vadd.f32 %v72_v25, %v71_v29  ;;  %v95_v41 = vadd.f32 %v94_v26, %v93_v30  ;;  %v138_v42 = vmul.f32 %v1324_v27, %v1617_v16  ;;  %v1344_v26 = vld [vmem:[%s2677_s1 + $0x358] sm:$0xff]  ;;  %v1346_v27 = vld [vmem:[%s2677_s1 + $0x50] sm:$0xff] }
  0x13   :  { %v115_v44 = vadd.f32 %v114_v34, %v113_v31  ;;  %v137_v45 = vadd.f32 %v136_v37, %v135_v36  ;;  %v157_v46 = vmul.f32 %v1326_v32, %v1595_v6  ;;  %v158_v47 = vmul.f32 %v1327_v33, %v1606_v10  ;;  %v1347_v28 = vld [vmem:[%s2677_s1 + $0x1d8] sm:$0xff]  ;;  %v1348_v37 = vld [vmem:[%s2677_s1 + $0x360] sm:$0xff] }
  0x14   :  { %v52_v49 = vadd.f32 %v51_v39, %v1631_v23  ;;  %v74_v50 = vadd.f32 %v73_v40, %v1631_v23  ;;  %v96_v51 = vadd.f32 %v95_v41, %v1631_v23  ;;  %v160_v52 = vmul.f32 %v1328_v38, %v1617_v16  ;;  %v1350_v38 = vld [vmem:[%s2677_s1 + $0x58] sm:$0xff] }
  0x15   :  { %v117_v54 = vadd.f32 %v116_v35, %v115_v44  ;;  %v139_v55 = vadd.f32 %v138_v42, %v137_v45  ;;  %v159_v56 = vadd.f32 %v158_v47, %v157_v46  ;;  %v179_v57 = vmul.f32 %v1330_v43, %v1595_v6  ;;  %v1351_v43 = vld [vmem:[%s2677_s1 + $0x1e0] sm:$0xff] }
  0x16   :  { %v1676_v60 = vmax.f32 %v52_v49, 0.0  ;;  %v1678_v61 = vmax.f32 %v74_v50, 0.0  ;;  %v1680_v62 = vmax.f32 %v96_v51, 0.0  ;;  %v180_v63 = vmul.f32 %v1331_v48, %v1606_v10  ;;  %v1352_v48 = vld [vmem:[%s2677_s1 + $0x368] sm:$0xff]  ;;  %v1354_v49 = vld [vmem:[%s2677_s1 + $0x60] sm:$0xff] }
  0x17   :  { %v118_v1 = vadd.f32 %v117_v54, %v1631_v23  ;;  %v140_v2 = vadd.f32 %v139_v55, %v1631_v23  ;;  %v161_v3 = vadd.f32 %v160_v52, %v159_v56  ;;  %v182_v4 = vmul.f32 %v1332_v53, %v1617_v16  ;;  %v1355_v54 = vld [vmem:[%s2677_s1 + $0x1e8] sm:$0xff] }
  0x18   :  { %v76_v7 = vadd.f32 %v1678_v61, %v1676_v60  ;;  %v181_v8 = vadd.f32 %v180_v63, %v179_v57  ;;  %v201_v9 = vmul.f32 %v1334_v58, %v1595_v6  ;;  %v202_v11 = vmul.f32 %v1335_v59, %v1606_v10  ;;  %v1356_v59 = vld [vmem:[%s2677_s1 + $0x370] sm:$0xff]  ;;  %v1358_v63 = vld [vmem:[%s2677_s1 + $0x68] sm:$0xff] }
  0x19   :  { %v1705_v15 = vmax.f32 %v118_v1, 0.0  ;;  %v1707_v17 = vmax.f32 %v140_v2, 0.0  ;;  %v162_v18 = vadd.f32 %v161_v3, %v1631_v23  ;;  %v204_v19 = vmul.f32 %v1336_v0, %v1617_v16 }
  0x1a   :  { %v98_v21 = vadd.f32 %v1680_v62, %v76_v7  ;;  %v183_v22 = vadd.f32 %v182_v4, %v181_v8  ;;  %v203_v24 = vadd.f32 %v202_v11, %v201_v9  ;;  %v223_v25 = vmul.f32 %v1338_v5, %v1595_v6  ;;  %v1359_v4 = vld [vmem:[%s2677_s1 + $0x1f0] sm:$0xff]  ;;  %v1360_v11 = vld [vmem:[%s2677_s1 + $0x378] sm:$0xff] }
  0x1b   :  { %v1725_v29 = vmax.f32 %v162_v18, 0.0  ;;  %v224_v30 = vmul.f32 %v1339_v12, %v1606_v10  ;;  %v226_v31 = vmul.f32 %v1340_v13, %v1617_v16  ;;  %v245_v32 = vmul.f32 %v1342_v14, %v1595_v6  ;;  %v1362_v12 = vld [vmem:[%s2677_s1 + $0x70] sm:$0xff] }
  0x1c   :  { %v120_v33 = vadd.f32 %v1705_v15, %v98_v21  ;;  %v184_v34 = vadd.f32 %v183_v22, %v1631_v23  ;;  %v205_v35 = vadd.f32 %v204_v19, %v203_v24  ;;  %v246_v36 = vmul.f32 %v1343_v20, %v1606_v10 }
  0x1d   :  { %v225_v39 = vadd.f32 %v224_v30, %v223_v25  ;;  %v248_v40 = vmul.f32 %v1344_v26, %v1617_v16  ;;  %v267_v41 = vmul.f32 %v1346_v27, %v1595_v6  ;;  %v268_v42 = vmul.f32 %v1347_v28, %v1606_v10 }
  0x1e   :  { %v142_v44 = vadd.f32 %v1707_v17, %v120_v33  ;;  %v1746_v45 = vmax.f32 %v184_v34, 0.0  ;;  %v206_v46 = vadd.f32 %v205_v35, %v1631_v23  ;;  %v247_v47 = vadd.f32 %v246_v36, %v245_v32 }
  0x1f   :  { %v227_v50 = vadd.f32 %v226_v31, %v225_v39  ;;  %v269_v51 = vadd.f32 %v268_v42, %v267_v41  ;;  %v270_v52 = vmul.f32 %v1348_v37, %v1617_v16  ;;  %v289_v53 = vmul.f32 %v1350_v38, %v1595_v6 }
  0x20   :  { %v164_v55 = vadd.f32 %v1725_v29, %v142_v44  ;;  %v1761_v56 = vmax.f32 %v206_v46, 0.0  ;;  %v249_v57 = vadd.f32 %v248_v40, %v247_v47  ;;  %v290_v58 = vmul.f32 %v1351_v43, %v1606_v10 }
  0x21   :  { %v228_v0 = vadd.f32 %v227_v50, %v1631_v23  ;;  %v271_v1 = vadd.f32 %v270_v52, %v269_v51  ;;  %v292_v2 = vmul.f32 %v1352_v48, %v1617_v16  ;;  %v311_v3 = vmul.f32 %v1354_v49, %v1595_v6 }
  0x22   :  { %v186_v5 = vadd.f32 %v1746_v45, %v164_v55  ;;  %v250_v7 = vadd.f32 %v249_v57, %v1631_v23  ;;  %v291_v8 = vadd.f32 %v290_v58, %v289_v53  ;;  %v312_v9 = vmul.f32 %v1355_v54, %v1606_v10 }
  0x23   :  { %16 = vsyncpa [#allocation6], 0  ;;  %v1785_v13 = vmax.f32 %v228_v0, 0.0  ;;  %v272_v14 = vadd.f32 %v271_v1, %v1631_v23  ;;  %v314_v18 = vmul.f32 %v1356_v59, %v1617_v16  ;;  %v333_v19 = vmul.f32 %v1358_v63, %v1595_v6  ;;  %v1363_v20 = vld [vmem:[%s2677_s1 + $0x1f8] sm:$0xff]  ;;  %v1364_v26 = vld [vmem:[%s2677_s1 + $0x380] sm:$0xff]  ;;  %s2663_s16 = sld [smem:[#allocation4 + $0x4]] }
  0x24   :  { %v208_v21 = vadd.f32 %v1761_v56, %v186_v5  ;;  %v1794_v22 = vmax.f32 %v250_v7, 0.0  ;;  %v293_v24 = vadd.f32 %v292_v2, %v291_v8  ;;  %v313_v25 = vadd.f32 %v312_v9, %v311_v3  ;;  %v1366_v27 = vld [vmem:[%s2677_s1 + $0x78] sm:$0xff]  ;;  %v1367_v28 = vld [vmem:[%s2677_s1 + $0x200] sm:$0xff]  ;;  %v1368_v38 = vld [vmem:[%s2677_s1 + $0x388] sm:$0xff]  ;;  %s1552_s24 = smov 0.0   ;;  %s1505_s26 = sld [smem:[#allocation4 + $0x5]] }
  0x25   :  { %v1805_v30 = vmax.f32 %v272_v14, 0.0  ;;  %v334_v31 = vmul.f32 %v1359_v4, %v1606_v10  ;;  %v336_v32 = vmul.f32 %v1360_v11, %v1617_v16  ;;  %v355_v33 = vmul.f32 %v1362_v12, %v1595_v6  ;;  %v1370_v39 = vld [vmem:[%s2677_s1 + $0x80] sm:$0xff]  ;;  %v1371_v44 = vld [vmem:[%s2677_s1 + $0x208] sm:$0xff]  ;;  %v1372_v50 = vld [vmem:[%s2677_s1 + $0x390] sm:$0xff]  ;;  %s1506_s27 = sld [smem:[#allocation4 + $0x6]]  ;;  %s1553_s12 = smov [#allocation5]  }
  0x26   :  { %v230_v34 = vadd.f32 %v1785_v13, %v208_v21  ;;  %v294_v35 = vadd.f32 %v293_v24, %v1631_v23  ;;  %v315_v36 = vadd.f32 %v314_v18, %v313_v25  ;;  %v356_v37 = vmul.f32 %v1363_v20, %v1606_v10  ;;  %v1374_v51 = vld [vmem:[%s2677_s1 + $0x88] sm:$0xff]  ;;  %v1375_v57 = vld [vmem:[%s2677_s1 + $0x210] sm:$0xff]  ;;  %v1376_v1 = vld [vmem:[%s2677_s1 + $0x398] sm:$0xff]  ;;  %s1507_s29 = sld [smem:[#allocation4 + $0x7]] }
  0x27   :  { %v335_v40 = vadd.f32 %v334_v31, %v333_v19  ;;  %v358_v41 = vmul.f32 %v1364_v26, %v1617_v16  ;;  %v377_v42 = vmul.f32 %v1366_v27, %v1595_v6  ;;  %v378_v43 = vmul.f32 %v1367_v28, %v1606_v10  ;;  %v1378_v2 = vld [vmem:[%s2677_s1 + $0x90] sm:$0xff]  ;;  %v1379_v14 = vld [vmem:[%s2677_s1 + $0x218] sm:$0xff]  ;;  %v1380_v18 = vld [vmem:[%s2677_s1 + $0x3a0] sm:$0xff] }
  0x28   :  { %v252_v46 = vadd.f32 %v1794_v22, %v230_v34  ;;  %v1826_v47 = vmax.f32 %v294_v35, 0.0  ;;  %v316_v48 = vadd.f32 %v315_v36, %v1631_v23  ;;  %v357_v49 = vadd.f32 %v356_v37, %v355_v33  ;;  %v1382_v19 = vld [vmem:[%s2677_s1 + $0x98] sm:$0xff]  ;;  %v1383_v26 = vld [vmem:[%s2677_s1 + $0x220] sm:$0xff]  ;;  %v1384_v33 = vld [vmem:[%s2677_s1 + $0x3a8] sm:$0xff] }
  0x29   :  { %v337_v52 = vadd.f32 %v336_v32, %v335_v40  ;;  %v379_v53 = vadd.f32 %v378_v43, %v377_v42  ;;  %v380_v54 = vmul.f32 %v1368_v38, %v1617_v16  ;;  %v399_v55 = vmul.f32 %v1370_v39, %v1595_v6  ;;  %v1386_v34 = vld [vmem:[%s2677_s1 + $0xa0] sm:$0xff]  ;;  %v1387_v35 = vld [vmem:[%s2677_s1 + $0x228] sm:$0xff]  ;;  %s1169_s22 = smul.f32 %s2663_s16, %s2663_s16 }
  0x2a   :  { %v274_v58 = vadd.f32 %v1805_v30, %v252_v46  ;;  %v1841_v59 = vmax.f32 %v316_v48, 0.0  ;;  %v359_v63 = vadd.f32 %v358_v41, %v357_v49  ;;  %v400_v0 = vmul.f32 %v1371_v44, %v1606_v10  ;;  %v1388_v44 = vld [vmem:[%s2677_s1 + $0x3b0] sm:$0xff]  ;;  %v1390_v46 = vld [vmem:[%s2677_s1 + $0xa8] sm:$0xff]  ;;  %s1184_s28 = smul.f32 %s1505_s26, %s2663_s16 }
  0x2b   :  { %v338_v3 = vadd.f32 %v337_v52, %v1631_v23  ;;  %v381_v4 = vadd.f32 %v380_v54, %v379_v53  ;;  %v402_v5 = vmul.f32 %v1372_v50, %v1617_v16  ;;  %v421_v7 = vmul.f32 %v1374_v51, %v1595_v6  ;;  %v1391_v52 = vld [vmem:[%s2677_s1 + $0x230] sm:$0xff] }
  0x2c   :  { %v296_v8 = vadd.f32 %v1826_v47, %v274_v58  ;;  %v360_v9 = vadd.f32 %v359_v63, %v1631_v23  ;;  %v401_v11 = vadd.f32 %v400_v0, %v399_v55  ;;  %v422_v12 = vmul.f32 %v1375_v57, %v1606_v10  ;;  %v1392_v58 = vld [vmem:[%s2677_s1 + $0x3b8] sm:$0xff]  ;;  %v1394_v63 = vld [vmem:[%s2677_s1 + $0xb0] sm:$0xff] }
  0x2d   :  { %v1865_v20 = vmax.f32 %v338_v3, 0.0  ;;  %v382_v21 = vadd.f32 %v381_v4, %v1631_v23  ;;  %v424_v24 = vmul.f32 %v1376_v1, %v1617_v16  ;;  %v443_v25 = vmul.f32 %v1378_v2, %v1595_v6  ;;  %v1395_v4 = vld [vmem:[%s2677_s1 + $0x238] sm:$0xff] }
  0x2e   :  { %v318_v27 = vadd.f32 %v1841_v59, %v296_v8  ;;  %v1874_v28 = vmax.f32 %v360_v9, 0.0  ;;  %v403_v31 = vadd.f32 %v402_v5, %v401_v11  ;;  %v423_v32 = vadd.f32 %v422_v12, %v421_v7  ;;  %v1396_v11 = vld [vmem:[%s2677_s1 + $0x3c0] sm:$0xff]  ;;  %v1398_v12 = vld [vmem:[%s2677_s1 + $0xb8] sm:$0xff] }
  0x2f   :  { %v1885_v36 = vmax.f32 %v382_v21, 0.0  ;;  %v444_v37 = vmul.f32 %v1379_v14, %v1606_v10  ;;  %v446_v38 = vmul.f32 %v1380_v18, %v1617_v16  ;;  %v465_v39 = vmul.f32 %v1382_v19, %v1595_v6 }
  0x30   :  { %v340_v40 = vadd.f32 %v1865_v20, %v318_v27  ;;  %v404_v41 = vadd.f32 %v403_v31, %v1631_v23  ;;  %v425_v42 = vadd.f32 %v424_v24, %v423_v32  ;;  %v466_v43 = vmul.f32 %v1383_v26, %v1606_v10  ;;  %v1399_v31 = vld [vmem:[%s2677_s1 + $0x240] sm:$0xff]  ;;  %v1400_v32 = vld [vmem:[%s2677_s1 + $0x3c8] sm:$0xff] }
  0x31   :  { %v445_v48 = vadd.f32 %v444_v37, %v443_v25  ;;  %v468_v49 = vmul.f32 %v1384_v33, %v1617_v16  ;;  %v487_v50 = vmul.f32 %v1386_v34, %v1595_v6  ;;  %v488_v51 = vmul.f32 %v1387_v35, %v1606_v10  ;;  %v1402_v33 = vld [vmem:[%s2677_s1 + $0xc0] sm:$0xff] }
  0x32   :  { %v362_v53 = vadd.f32 %v1874_v28, %v340_v40  ;;  %v1906_v54 = vmax.f32 %v404_v41, 0.0  ;;  %v426_v55 = vadd.f32 %v425_v42, %v1631_v23  ;;  %v467_v57 = vadd.f32 %v466_v43, %v465_v39  ;;  %v1403_v39 = vld [vmem:[%s2677_s1 + $0x248] sm:$0xff] }
  0x33   :  { %v447_v0 = vadd.f32 %v446_v38, %v445_v48  ;;  %v489_v1 = vadd.f32 %v488_v51, %v487_v50  ;;  %v490_v2 = vmul.f32 %v1388_v44, %v1617_v16  ;;  %v509_v3 = vmul.f32 %v1390_v46, %v1595_v6  ;;  %v1404_v44 = vld [vmem:[%s2677_s1 + $0x3d0] sm:$0xff]  ;;  %v1406_v46 = vld [vmem:[%s2677_s1 + $0xc8] sm:$0xff] }
  0x34   :  { %v384_v5 = vadd.f32 %v1885_v36, %v362_v53  ;;  %v1921_v7 = vmax.f32 %v426_v55, 0.0  ;;  %v469_v8 = vadd.f32 %v468_v49, %v467_v57  ;;  %v510_v9 = vmul.f32 %v1391_v52, %v1606_v10  ;;  %v1407_v48 = vld [vmem:[%s2677_s1 + $0x250] sm:$0xff] }
  0x35   :  { %v448_v14 = vadd.f32 %v447_v0, %v1631_v23  ;;  %v491_v18 = vadd.f32 %v490_v2, %v489_v1  ;;  %v512_v19 = vmul.f32 %v1392_v58, %v1617_v16  ;;  %v531_v21 = vmul.f32 %v1394_v63, %v1595_v6  ;;  %v1408_v63 = vld [vmem:[%s2677_s1 + $0x3d8] sm:$0xff]  ;;  %v1410_v0 = vld [vmem:[%s2677_s1 + $0xd0] sm:$0xff] }
  0x36   :  { %v406_v24 = vadd.f32 %v1906_v54, %v384_v5  ;;  %v470_v25 = vadd.f32 %v469_v8, %v1631_v23  ;;  %v511_v26 = vadd.f32 %v510_v9, %v509_v3  ;;  %v532_v27 = vmul.f32 %v1395_v4, %v1606_v10  ;;  %v1411_v5 = vld [vmem:[%s2677_s1 + $0x258] sm:$0xff] }
  0x37   :  { %v1945_v34 = vmax.f32 %v448_v14, 0.0  ;;  %v492_v35 = vadd.f32 %v491_v18, %v1631_v23  ;;  %v534_v37 = vmul.f32 %v1396_v11, %v1617_v16  ;;  %v553_v38 = vmul.f32 %v1398_v12, %v1595_v6  ;;  %v1412_v14 = vld [vmem:[%s2677_s1 + $0x3e0] sm:$0xff]  ;;  %v1414_v18 = vld [vmem:[%s2677_s1 + $0xd8] sm:$0xff] }
  0x38   :  { %v428_v40 = vadd.f32 %v1921_v7, %v406_v24  ;;  %v1954_v41 = vmax.f32 %v470_v25, 0.0  ;;  %v513_v42 = vadd.f32 %v512_v19, %v511_v26  ;;  %v533_v43 = vadd.f32 %v532_v27, %v531_v21  ;;  %v1415_v26 = vld [vmem:[%s2677_s1 + $0x260] sm:$0xff] }
  0x39   :  { %v1965_v49 = vmax.f32 %v492_v35, 0.0  ;;  %v554_v50 = vmul.f32 %v1399_v31, %v1606_v10  ;;  %v556_v51 = vmul.f32 %v1400_v32, %v1617_v16  ;;  %v575_v52 = vmul.f32 %v1402_v33, %v1595_v6  ;;  %v1416_v35 = vld [vmem:[%s2677_s1 + $0x3e8] sm:$0xff] }
  0x3a   :  { %v450_v53 = vadd.f32 %v1945_v34, %v428_v40  ;;  %v514_v55 = vadd.f32 %v513_v42, %v1631_v23  ;;  %v535_v57 = vadd.f32 %v534_v37, %v533_v43  ;;  %v576_v58 = vmul.f32 %v1403_v39, %v1606_v10  ;;  %v1418_v37 = vld [vmem:[%s2677_s1 + $0xe0] sm:$0xff] }
  0x3b   :  { %v555_v1 = vadd.f32 %v554_v50, %v553_v38  ;;  %v578_v2 = vmul.f32 %v1404_v44, %v1617_v16  ;;  %v597_v3 = vmul.f32 %v1406_v46, %v1595_v6  ;;  %v598_v4 = vmul.f32 %v1407_v48, %v1606_v10  ;;  %v1419_v50 = vld [vmem:[%s2677_s1 + $0x268] sm:$0xff] }
  0x3c   :  { %v472_v8 = vadd.f32 %v1954_v41, %v450_v53  ;;  %v1986_v9 = vmax.f32 %v514_v55, 0.0  ;;  %v536_v11 = vadd.f32 %v535_v57, %v1631_v23  ;;  %v577_v12 = vadd.f32 %v576_v58, %v575_v52  ;;  %v1422_v52 = vld [vmem:[%s2677_s1 + $0xe8] sm:$0xff] }
  0x3d   :  { %v557_v19 = vadd.f32 %v556_v51, %v555_v1  ;;  %v599_v21 = vadd.f32 %v598_v4, %v597_v3  ;;  %v600_v24 = vmul.f32 %v1408_v63, %v1617_v16  ;;  %v619_v25 = vmul.f32 %v1410_v0, %v1595_v6  ;;  %v1420_v51 = vld [vmem:[%s2677_s1 + $0x3f0] sm:$0xff]  ;;  %v1424_v4 = vld [vmem:[%s2677_s1 + $0x3f8] sm:$0xff] }
  0x3e   :  { %v494_v27 = vadd.f32 %v1965_v49, %v472_v8  ;;  %v2001_v31 = vmax.f32 %v536_v11, 0.0  ;;  %v579_v32 = vadd.f32 %v578_v2, %v577_v12  ;;  %v620_v33 = vmul.f32 %v1411_v5, %v1606_v10  ;;  %v1423_v63 = vld [vmem:[%s2677_s1 + $0x270] sm:$0xff]  ;;  %v1427_v8 = vld [vmem:[%s2677_s1 + $0x278] sm:$0xff] }
  0x3f   :  { %v558_v38 = vadd.f32 %v557_v19, %v1631_v23  ;;  %v601_v39 = vadd.f32 %v600_v24, %v599_v21  ;;  %v622_v40 = vmul.f32 %v1412_v14, %v1617_v16  ;;  %v641_v42 = vmul.f32 %v1414_v18, %v1595_v6  ;;  %v1426_v5 = vld [vmem:[%s2677_s1 + $0xf0] sm:$0xff] }
  0x40   :  { %v516_v43 = vadd.f32 %v1986_v9, %v494_v27  ;;  %v580_v44 = vadd.f32 %v579_v32, %v1631_v23  ;;  %v621_v46 = vadd.f32 %v620_v33, %v619_v25  ;;  %v642_v48 = vmul.f32 %v1415_v26, %v1606_v10  ;;  %v1428_v26 = vld [vmem:[%s2677_s1 + $0x400] sm:$0xff]  ;;  %v1430_v27 = vld [vmem:[%s2677_s1 + $0xf8] sm:$0xff] }
  0x41   :  { %v2025_v53 = vmax.f32 %v558_v38, 0.0  ;;  %v602_v55 = vadd.f32 %v601_v39, %v1631_v23  ;;  %v644_v57 = vmul.f32 %v1416_v35, %v1617_v16  ;;  %v663_v58 = vmul.f32 %v1418_v37, %v1595_v6  ;;  %v1431_v38 = vld [vmem:[%s2677_s1 + $0x280] sm:$0xff] }
  0x42   :  { %v538_v0 = vadd.f32 %v2001_v31, %v516_v43  ;;  %v2034_v1 = vmax.f32 %v580_v44, 0.0  ;;  %v623_v2 = vadd.f32 %v622_v40, %v621_v46  ;;  %v643_v3 = vadd.f32 %v642_v48, %v641_v42  ;;  %v1432_v44 = vld [vmem:[%s2677_s1 + $0x408] sm:$0xff]  ;;  %v1434_v46 = vld [vmem:[%s2677_s1 + $0x100] sm:$0xff] }
  0x43   :  { %v2045_v11 = vmax.f32 %v602_v55, 0.0  ;;  %v664_v12 = vmul.f32 %v1419_v50, %v1606_v10  ;;  %v666_v14 = vmul.f32 %v1420_v51, %v1617_v16  ;;  %v685_v18 = vmul.f32 %v1422_v52, %v1595_v6  ;;  %v1435_v55 = vld [vmem:[%s2677_s1 + $0x288] sm:$0xff] }
  0x44   :  { %v560_v19 = vadd.f32 %v2025_v53, %v538_v0  ;;  %v624_v21 = vadd.f32 %v623_v2, %v1631_v23  ;;  %v645_v24 = vadd.f32 %v644_v57, %v643_v3  ;;  %v686_v25 = vmul.f32 %v1423_v63, %v1606_v10  ;;  %v1436_v2 = vld [vmem:[%s2677_s1 + $0x410] sm:$0xff]  ;;  %v1438_v3 = vld [vmem:[%s2677_s1 + $0x108] sm:$0xff] }
  0x45   :  { %v665_v32 = vadd.f32 %v664_v12, %v663_v58  ;;  %v688_v33 = vmul.f32 %v1424_v4, %v1617_v16  ;;  %v707_v35 = vmul.f32 %v1426_v5, %v1595_v6  ;;  %v708_v37 = vmul.f32 %v1427_v8, %v1606_v10 }
  0x46   :  { %v582_v39 = vadd.f32 %v2034_v1, %v560_v19  ;;  %v2066_v40 = vmax.f32 %v624_v21, 0.0  ;;  %v646_v42 = vadd.f32 %v645_v24, %v1631_v23  ;;  %v687_v43 = vadd.f32 %v686_v25, %v685_v18  ;;  %v1439_v24 = vld [vmem:[%s2677_s1 + $0x290] sm:$0xff]  ;;  %v1440_v25 = vld [vmem:[%s2677_s1 + $0x418] sm:$0xff] }
  0x47   :  { %v667_v48 = vadd.f32 %v666_v14, %v665_v32  ;;  %v709_v50 = vadd.f32 %v708_v37, %v707_v35  ;;  %v710_v51 = vmul.f32 %v1428_v26, %v1617_v16  ;;  %v729_v52 = vmul.f32 %v1430_v27, %v1595_v6  ;;  %v1442_v26 = vld [vmem:[%s2677_s1 + $0x110] sm:$0xff]  ;;  %v1443_v37 = vld [vmem:[%s2677_s1 + $0x298] sm:$0xff] }
  0x48   :  { %v604_v57 = vadd.f32 %v2045_v11, %v582_v39  ;;  %v2081_v58 = vmax.f32 %v646_v42, 0.0  ;;  %v689_v63 = vadd.f32 %v688_v33, %v687_v43  ;;  %v730_v0 = vmul.f32 %v1431_v38, %v1606_v10 }
  0x49   :  { %v668_v4 = vadd.f32 %v667_v48, %v1631_v23  ;;  %v711_v5 = vadd.f32 %v710_v51, %v709_v50  ;;  %v732_v8 = vmul.f32 %v1432_v44, %v1617_v16  ;;  %v751_v12 = vmul.f32 %v1434_v46, %v1595_v6  ;;  %v1444_v44 = vld [vmem:[%s2677_s1 + $0x420] sm:$0xff]  ;;  %v1446_v46 = vld [vmem:[%s2677_s1 + $0x118] sm:$0xff] }
  0x4a   :  { %v626_v14 = vadd.f32 %v2066_v40, %v604_v57  ;;  %v690_v18 = vadd.f32 %v689_v63, %v1631_v23  ;;  %v731_v19 = vadd.f32 %v730_v0, %v729_v52  ;;  %v752_v21 = vmul.f32 %v1435_v55, %v1606_v10  ;;  %v1447_v48 = vld [vmem:[%s2677_s1 + $0x2a0] sm:$0xff] }
  0x4b   :  { %v2105_v27 = vmax.f32 %v668_v4, 0.0  ;;  %v712_v32 = vadd.f32 %v711_v5, %v1631_v23  ;;  %v754_v33 = vmul.f32 %v1436_v2, %v1617_v16  ;;  %v773_v35 = vmul.f32 %v1438_v3, %v1595_v6  ;;  %v1448_v3 = vld [vmem:[%s2677_s1 + $0x428] sm:$0xff]  ;;  %v1450_v4 = vld [vmem:[%s2677_s1 + $0x120] sm:$0xff] }
  0x4c   :  { %v648_v38 = vadd.f32 %v2081_v58, %v626_v14  ;;  %v2114_v39 = vmax.f32 %v690_v18, 0.0  ;;  %v733_v42 = vadd.f32 %v732_v8, %v731_v19  ;;  %v753_v43 = vadd.f32 %v752_v21, %v751_v12  ;;  %v1451_v18 = vld [vmem:[%s2677_s1 + $0x2a8] sm:$0xff] }
  0x4d   :  { %v2125_v50 = vmax.f32 %v712_v32, 0.0  ;;  %v774_v51 = vmul.f32 %v1439_v24, %v1606_v10  ;;  %v776_v52 = vmul.f32 %v1440_v25, %v1617_v16  ;;  %v795_v55 = vmul.f32 %v1442_v26, %v1595_v6  ;;  %v1452_v26 = vld [vmem:[%s2677_s1 + $0x430] sm:$0xff]  ;;  %v1454_v32 = vld [vmem:[%s2677_s1 + $0x128] sm:$0xff] }
  0x4e   :  { %v670_v57 = vadd.f32 %v2105_v27, %v648_v38  ;;  %v734_v63 = vadd.f32 %v733_v42, %v1631_v23  ;;  %v755_v0 = vadd.f32 %v754_v33, %v753_v43  ;;  %v796_v2 = vmul.f32 %v1443_v37, %v1606_v10  ;;  %v1455_v42 = vld [vmem:[%s2677_s1 + $0x2b0] sm:$0xff] }
  0x4f   :  { %v775_v5 = vadd.f32 %v774_v51, %v773_v35  ;;  %v798_v8 = vmul.f32 %v1444_v44, %v1617_v16  ;;  %v817_v12 = vmul.f32 %v1446_v46, %v1595_v6  ;;  %v818_v14 = vmul.f32 %v1447_v48, %v1606_v10  ;;  %v1456_v51 = vld [vmem:[%s2677_s1 + $0x438] sm:$0xff] }
  0x50   :  { %v692_v19 = vadd.f32 %v2114_v39, %v670_v57  ;;  %v2146_v21 = vmax.f32 %v734_v63, 0.0  ;;  %v756_v24 = vadd.f32 %v755_v0, %v1631_v23  ;;  %v797_v25 = vadd.f32 %v796_v2, %v795_v55 }
  0x51   :  { %v777_v33 = vadd.f32 %v776_v52, %v775_v5  ;;  %v819_v35 = vadd.f32 %v818_v14, %v817_v12  ;;  %v820_v37 = vmul.f32 %v1448_v3, %v1617_v16  ;;  %v839_v38 = vmul.f32 %v1450_v4, %v1595_v6  ;;  %v1458_v52 = vld [vmem:[%s2677_s1 + $0x130] sm:$0xff]  ;;  %v1460_v12 = vld [vmem:[%s2677_s1 + $0x440] sm:$0xff]  ;;  %v1462_v14 = vld [vmem:[%s2677_s1 + $0x138] sm:$0xff] }
  0x52   :  { %v714_v43 = vadd.f32 %v2125_v50, %v692_v19  ;;  %v2161_v44 = vmax.f32 %v756_v24, 0.0  ;;  %v799_v46 = vadd.f32 %v798_v8, %v797_v25  ;;  %v840_v48 = vmul.f32 %v1451_v18, %v1606_v10  ;;  %v1459_v8 = vld [vmem:[%s2677_s1 + $0x2b8] sm:$0xff] }
  0x53   :  { %v778_v55 = vadd.f32 %v777_v33, %v1631_v23  ;;  %v821_v57 = vadd.f32 %v820_v37, %v819_v35  ;;  %v842_v63 = vmul.f32 %v1452_v26, %v1617_v16  ;;  %v861_v0 = vmul.f32 %v1454_v32, %v1595_v6  ;;  %v1463_v26 = vld [vmem:[%s2677_s1 + $0x2c0] sm:$0xff] }
  0x54   :  { %v736_v2 = vadd.f32 %v2146_v21, %v714_v43  ;;  %v800_v3 = vadd.f32 %v799_v46, %v1631_v23  ;;  %v841_v4 = vadd.f32 %v840_v48, %v839_v38  ;;  %v862_v5 = vmul.f32 %v1455_v42, %v1606_v10  ;;  %v1464_v38 = vld [vmem:[%s2677_s1 + $0x448] sm:$0xff]  ;;  %v1466_v42 = vld [vmem:[%s2677_s1 + $0x140] sm:$0xff] }
  0x55   :  { %v2185_v18 = vmax.f32 %v778_v55, 0.0  ;;  %v822_v19 = vadd.f32 %v821_v57, %v1631_v23  ;;  %v864_v24 = vmul.f32 %v1456_v51, %v1617_v16  ;;  %v883_v25 = vmul.f32 %v1458_v52, %v1595_v6  ;;  %v1467_v43 = vld [vmem:[%s2677_s1 + $0x2c8] sm:$0xff] }
  0x56   :  { %v758_v32 = vadd.f32 %v2161_v44, %v736_v2  ;;  %v2194_v33 = vmax.f32 %v800_v3, 0.0  ;;  %v843_v35 = vadd.f32 %v842_v63, %v841_v4  ;;  %v863_v37 = vadd.f32 %v862_v5, %v861_v0  ;;  %v1468_v2 = vld [vmem:[%s2677_s1 + $0x450] sm:$0xff]  ;;  %v1470_v3 = vld [vmem:[%s2677_s1 + $0x148] sm:$0xff] }
  0x57   :  { %v2205_v46 = vmax.f32 %v822_v19, 0.0  ;;  %v884_v48 = vmul.f32 %v1459_v8, %v1606_v10  ;;  %v886_v51 = vmul.f32 %v1460_v12, %v1617_v16  ;;  %v905_v52 = vmul.f32 %v1462_v14, %v1595_v6  ;;  %v1471_v14 = vld [vmem:[%s2677_s1 + $0x2d0] sm:$0xff] }
  0x58   :  { %v780_v55 = vadd.f32 %v2185_v18, %v758_v32  ;;  %v844_v57 = vadd.f32 %v843_v35, %v1631_v23  ;;  %v865_v63 = vadd.f32 %v864_v24, %v863_v37  ;;  %v906_v0 = vmul.f32 %v1463_v26, %v1606_v10  ;;  %v1474_v35 = vld [vmem:[%s2677_s1 + $0x150] sm:$0xff] }
  0x59   :  { %2694 = vst [vmem:[#allocation9_spill] sm:$0xff] %v2205_v46  ;;  %v885_v4 = vadd.f32 %v884_v48, %v883_v25  ;;  %v908_v5 = vmul.f32 %v1464_v38, %v1617_v16  ;;  %v927_v8 = vmul.f32 %v1466_v42, %v1595_v6  ;;  %v928_v12 = vmul.f32 %v1467_v43, %v1606_v10  ;;  %v1472_v25 = vld [vmem:[%s2677_s1 + $0x458] sm:$0xff] }
  0x5a   :  { %v802_v19 = vadd.f32 %v2194_v33, %v780_v55  ;;  %v2226_v24 = vmax.f32 %v844_v57, 0.0  ;;  %v866_v26 = vadd.f32 %v865_v63, %v1631_v23  ;;  %v907_v32 = vadd.f32 %v906_v0, %v905_v52  ;;  %v1475_v48 = vld [vmem:[%s2677_s1 + $0x2d8] sm:$0xff] }
  0x5b   :  { %v887_v37 = vadd.f32 %v886_v51, %v885_v4  ;;  %v929_v38 = vadd.f32 %v928_v12, %v927_v8  ;;  %v930_v42 = vmul.f32 %v1468_v2, %v1617_v16  ;;  %v949_v43 = vmul.f32 %v1470_v3, %v1595_v6  ;;  %v1476_v51 = vld [vmem:[%s2677_s1 + $0x460] sm:$0xff]  ;;  %v1478_v0 = vld [vmem:[%s2677_s1 + $0x158] sm:$0xff] }
  0x5c   :  { %2695 = vst [vmem:[#allocation10_spill] sm:$0xff] %v2226_v24  ;;  %v824_v52 = vadd.f32 %v2205_v46, %v802_v19  ;;  %v2241_v55 = vmax.f32 %v866_v26, 0.0  ;;  %v909_v57 = vadd.f32 %v908_v5, %v907_v32  ;;  %v950_v63 = vmul.f32 %v1471_v14, %v1606_v10  ;;  %v1479_v26 = vld [vmem:[%s2677_s1 + $0x2e0] sm:$0xff]  ;;  %v1480_v32 = vld [vmem:[%s2677_s1 + $0x468] sm:$0xff] }
  0x5d   :  { %v888_v2 = vadd.f32 %v887_v37, %v1631_v23  ;;  %v931_v3 = vadd.f32 %v930_v42, %v929_v38  ;;  %v952_v4 = vmul.f32 %v1472_v25, %v1617_v16  ;;  %v971_v8 = vmul.f32 %v1474_v35, %v1595_v6  ;;  %v1482_v25 = vld [vmem:[%s2677_s1 + $0x160] sm:$0xff] }
  0x5e   :  { %2696 = vst [vmem:[#allocation11_spill] sm:$0xff] %v2241_v55  ;;  %v846_v12 = vadd.f32 %v2226_v24, %v824_v52  ;;  %v910_v5 = vadd.f32 %v909_v57, %v1631_v23  ;;  %v951_v14 = vadd.f32 %v950_v63, %v949_v43  ;;  %v972_v19 = vmul.f32 %v1475_v48, %v1606_v10  ;;  %v1483_v43 = vld [vmem:[%s2677_s1 + $0x2e8] sm:$0xff]  ;;  %v1488_v24 = vld [vmem:[%s2677_s1 + $0x478] sm:$0xff] }
  0x5f   :  { %v2265_v35 = vmax.f32 %v888_v2, 0.0  ;;  %v932_v37 = vadd.f32 %v931_v3, %v1631_v23  ;;  %v974_v38 = vmul.f32 %v1476_v51, %v1617_v16  ;;  %v993_v42 = vmul.f32 %v1478_v0, %v1595_v6  ;;  %v1484_v2 = vld [vmem:[%s2677_s1 + $0x470] sm:$0xff]  ;;  %v1486_v51 = vld [vmem:[%s2677_s1 + $0x168] sm:$0xff] }
  0x60   :  { %v868_v48 = vadd.f32 %v2241_v55, %v846_v12  ;;  %v2274_v52 = vmax.f32 %v910_v5, 0.0  ;;  %v953_v57 = vadd.f32 %v952_v4, %v951_v14  ;;  %v973_v63 = vadd.f32 %v972_v19, %v971_v8  ;;  %v1487_v0 = vld [vmem:[%s2677_s1 + $0x2f0] sm:$0xff] }
  0x61   :  { %2697 = vst [vmem:[#allocation12_spill] sm:$0xff] %v2265_v35  ;;  %v2285_v3 = vmax.f32 %v932_v37, 0.0  ;;  %v994_v12 = vmul.f32 %v1479_v26, %v1606_v10  ;;  %v996_v5 = vmul.f32 %v1480_v32, %v1617_v16  ;;  %v1015_v4 = vmul.f32 %v1482_v25, %v1595_v6  ;;  %v1490_v37 = vld [vmem:[%s2677_s1 + $0x170] sm:$0xff] }
  0x62   :  { %v890_v8 = vadd.f32 %v2265_v35, %v868_v48  ;;  %v954_v14 = vadd.f32 %v953_v57, %v1631_v23  ;;  %v975_v19 = vadd.f32 %v974_v38, %v973_v63  ;;  %v1016_v55 = vmul.f32 %v1483_v43, %v1606_v10  ;;  %v1491_v38 = vld [vmem:[%s2677_s1 + $0x2f8] sm:$0xff] }
  0x63   :  { %2698 = vst [vmem:[#allocation13_spill] sm:$0xff] %v2285_v3  ;;  %v995_v26 = vadd.f32 %v994_v12, %v993_v42  ;;  %v1018_v32 = vmul.f32 %v1484_v2, %v1617_v16  ;;  %v1037_v25 = vmul.f32 %v1486_v51, %v1595_v6  ;;  %v1038_v48 = vmul.f32 %v1487_v0, %v1606_v10  ;;  %v1492_v42 = vld [vmem:[%s2677_s1 + $0x480] sm:$0xff]  ;;  %v1494_v2 = vld [vmem:[%s2677_s1 + $0x178] sm:$0xff] }
  0x64   :  { %v912_v43 = vadd.f32 %v2274_v52, %v890_v8  ;;  %v2306_v57 = vmax.f32 %v954_v14, 0.0  ;;  %v976_v63 = vadd.f32 %v975_v19, %v1631_v23  ;;  %v1017_v35 = vadd.f32 %v1016_v55, %v1015_v4  ;;  %v1495_v8 = vld [vmem:[%s2677_s1 + $0x300] sm:$0xff] }
  0x65   :  { %v997_v51 = vadd.f32 %v996_v5, %v995_v26  ;;  %v1039_v0 = vadd.f32 %v1038_v48, %v1037_v25  ;;  %v1040_v12 = vmul.f32 %v1488_v24, %v1617_v16  ;;  %v1059_v46 = vmul.f32 %v1490_v37, %v1595_v6  ;;  %v1496_v5 = vld [vmem:[%s2677_s1 + $0x488] sm:$0xff]  ;;  %v1498_v24 = vld [vmem:[%s2677_s1 + $0x180] sm:$0xff] }
  0x66   :  { %2699 = vst [vmem:[#allocation14_spill] sm:$0xff] %v2306_v57  ;;  %v934_v55 = vadd.f32 %v2285_v3, %v912_v43  ;;  %v2321_v4 = vmax.f32 %v976_v63, 0.0  ;;  %v1019_v14 = vadd.f32 %v1018_v32, %v1017_v35  ;;  %v1060_v19 = vmul.f32 %v1491_v38, %v1606_v10  ;;  %v1499_v63 = vld [vmem:[%s2677_s1 + $0x308] sm:$0xff] }
  0x67   :  { %v998_v37 = vadd.f32 %v997_v51, %v1631_v23  ;;  %v1041_v26 = vadd.f32 %v1040_v12, %v1039_v0  ;;  %v1062_v25 = vmul.f32 %v1492_v42, %v1617_v16  ;;  %v1081_v48 = vmul.f32 %v1494_v2, %v1595_v6  ;;  %v1500_v51 = vld [vmem:[%s2677_s1 + $0x490] sm:$0xff]  ;;  %v46_v42 = vld [vmem:[%s2678_s2] sm:$0xff]  ;;  %s1197_s1 = sshll.u32 %s2679_s3, 4  ;;  %s1198_s1 = int_to_ptr.hbm [resolvable:$true] %s1197_s1 }
  0x68   :  { %2700 = vst [vmem:[#allocation15_spill] sm:$0xff] %v2321_v4  ;;  %v956_v43 = vadd.f32 %v2306_v57, %v934_v55  ;;  %v1020_v35 = vadd.f32 %v1019_v14, %v1631_v23  ;;  %v1061_v32 = vadd.f32 %v1060_v19, %v1059_v46  ;;  %v1082_v38 = vmul.f32 %v1495_v8, %v1606_v10  ;;  %v1313_v8 = vld [vmem:[%s2678_s2 + $0x8] sm:$0xff] }
  0x69   :  { %v2345_v2 = vmax.f32 %v998_v37, 0.0  ;;  %v1042_v0 = vadd.f32 %v1041_v26, %v1631_v23  ;;  %v1084_v46 = vmul.f32 %v1496_v5, %v1617_v16  ;;  %v1103_v12 = vmul.f32 %v1498_v24, %v1595_v6  ;;  %v1317_v37 = vld [vmem:[%s2678_s2 + $0x10] sm:$0xff]  ;;  %v1321_v5 = vld [vmem:[%s2678_s2 + $0x18] sm:$0xff] }
  0x6a   :  { %v978_v55 = vadd.f32 %v2321_v4, %v956_v43  ;;  %v2354_v14 = vmax.f32 %v1020_v35, 0.0  ;;  %v1063_v19 = vadd.f32 %v1062_v25, %v1061_v32  ;;  %v1083_v57 = vadd.f32 %v1082_v38, %v1081_v48 }
  0x6b   :  { %v2362_v26 = vmax.f32 %v1042_v0, 0.0  ;;  %v1104_v6 = vmul.f32 %v1499_v63, %v1606_v10  ;;  %v1106_v24 = vmul.f32 %v1500_v51, %v1617_v16  ;;  %v57_v43 = vmul.f32 %v1676_v60, %v46_v42  ;;  %v1325_v10 = vld [vmem:[%s2678_s2 + $0x20] sm:$0xff] }
  0x6c   :  { %v1000_v35 = vadd.f32 %v2345_v2, %v978_v55  ;;  %v1064_v25 = vadd.f32 %v1063_v19, %v1631_v23  ;;  %v1085_v48 = vadd.f32 %v1084_v46, %v1083_v57  ;;  %v79_v32 = vmul.f32 %v1313_v8, %v1678_v61  ;;  %v1329_v57 = vld [vmem:[%s2678_s2 + $0x28] sm:$0xff] }
  0x6d   :  { %v1105_v38 = vadd.f32 %v1104_v6, %v1103_v12  ;;  %v101_v4 = vmul.f32 %v1317_v37, %v1680_v62  ;;  %v123_v3 = vmul.f32 %v1321_v5, %v1705_v15  ;;  %v145_v55 = vmul.f32 %v1325_v10, %v1707_v17  ;;  %v1333_v37 = vld [vmem:[%s2678_s2 + $0x30] sm:$0xff] }
  0x6e   :  { %v1022_v16 = vadd.f32 %v2354_v14, %v1000_v35  ;;  %v2376_v63 = vmax.f32 %v1064_v25, 0.0  ;;  %v1086_v51 = vadd.f32 %v1085_v48, %v1631_v23  ;;  %v80_v42 = vadd.f32 %v79_v32, %v57_v43  ;;  %v1337_v35 = vld [vmem:[%s2678_s2 + $0x38] sm:$0xff]  ;;  %v1341_v48 = vld [vmem:[%s2678_s2 + $0x40] sm:$0xff] }
  0x6f   :  { %v1107_v0 = vadd.f32 %v1106_v24, %v1105_v38  ;;  %v167_v24 = vmul.f32 %v1329_v57, %v1725_v29  ;;  %v211_v10 = vmul.f32 %v1337_v35, %v1761_v56  ;;  %v233_v57 = vmul.f32 %v1341_v48, %v1785_v13  ;;  %v1357_v35 = vld [vmem:[%s2678_s2 + $0x60] sm:$0xff]  ;;  %v1361_v48 = vld [vmem:[%s2678_s2 + $0x68] sm:$0xff] }
  0x70   :  { %v1044_v46 = vadd.f32 %v2362_v26, %v1022_v16  ;;  %v2383_v12 = vmax.f32 %v1086_v51, 0.0  ;;  %v102_v8 = vadd.f32 %v101_v4, %v80_v42  ;;  %v77_v16 = vmul.f32 %v1678_v61, %v1678_v61  ;;  %v1345_v51 = vld [vmem:[%s2678_s2 + $0x48] sm:$0xff] }
  0x71   :  { %v1108_v19 = vadd.f32 %v1107_v0, %v1631_v23  ;;  %v189_v23 = vmul.f32 %v1333_v37, %v1746_v45  ;;  %v99_v42 = vmul.f32 %v1680_v62, %v1680_v62  ;;  %v143_v37 = vmul.f32 %v1707_v17, %v1707_v17  ;;  %v1353_v62 = vld [vmem:[%s2678_s2 + $0x58] sm:$0xff] }
  0x72   :  { %v1066_v5 = vadd.f32 %v2376_v63, %v1044_v46  ;;  %v124_v6 = vadd.f32 %v123_v3, %v102_v8  ;;  %v55_v3 = vmul.f32 %v1676_v60, %v1676_v60  ;;  %v121_v46 = vmul.f32 %v1705_v15, %v1705_v15  ;;  %v1349_v8 = vld [vmem:[%s2678_s2 + $0x50] sm:$0xff] }
  0x73   :  { %v2392_v43 = vmax.f32 %v1108_v19, 0.0  ;;  %v165_v15 = vmul.f32 %v1725_v29, %v1725_v29  ;;  %v187_v17 = vmul.f32 %v1746_v45, %v1746_v45  ;;  %v209_v29 = vmul.f32 %v1761_v56, %v1761_v56 }
  0x74   :  { %v1088_v4 = vadd.f32 %v2383_v12, %v1066_v5  ;;  %v146_v25 = vadd.f32 %v145_v55, %v124_v6  ;;  %v78_v60 = vadd.f32 %v77_v16, %v55_v3  ;;  %v255_v55 = vmul.f32 %v1345_v51, %v1794_v22 }
  0x75   :  { %v277_v6 = vmul.f32 %v1349_v8, %v1805_v30  ;;  %v343_v51 = vmul.f32 %v1361_v48, %v1865_v20  ;;  %v231_v45 = vmul.f32 %v1785_v13, %v1785_v13  ;;  %v253_v56 = vmul.f32 %v1794_v22, %v1794_v22  ;;  %v1373_v8 = vld [vmem:[%s2678_s2 + $0x80] sm:$0xff] }
  0x76   :  { %v1110_v32 = vadd.f32 %v2392_v43, %v1088_v4  ;;  %v168_v38 = vadd.f32 %v167_v24, %v146_v25  ;;  %v100_v19 = vadd.f32 %v99_v42, %v78_v60  ;;  %v299_v25 = vmul.f32 %v1353_v62, %v1826_v47 }
  0x77   :  { %v275_v13 = vmul.f32 %v1805_v30, %v1805_v30  ;;  %v297_v22 = vmul.f32 %v1826_v47, %v1826_v47  ;;  %v319_v30 = vmul.f32 %v1841_v59, %v1841_v59  ;;  %v341_v47 = vmul.f32 %v1865_v20, %v1865_v20 }
  0x78   :  { %1116 = vadd.xlane.f32.xlu0 %v1110_v32  ;;  %v190_v0 = vadd.f32 %v189_v23, %v168_v38  ;;  %v122_v24 = vadd.f32 %v121_v46, %v100_v19  ;;  %v321_v32 = vmul.f32 %v1357_v35, %v1841_v59  ;;  %v363_v59 = vmul.f32 %v1874_v28, %v1874_v28 }
  0x79   :  { %v385_v20 = vmul.f32 %v1885_v36, %v1885_v36 }
  0x7a   :  { %v212_v61 = vadd.f32 %v211_v10, %v190_v0  ;;  %v144_v23 = vadd.f32 %v143_v37, %v122_v24  ;;  %v1365_v10 = vld [vmem:[%s2678_s2 + $0x70] sm:$0xff]  ;;  %v1369_v0 = vld [vmem:[%s2678_s2 + $0x78] sm:$0xff]  ;;  %v1377_v37 = vld [vmem:[%s2678_s2 + $0x88] sm:$0xff] }
  0x7b   :  { %v365_v60 = vmul.f32 %v1365_v10, %v1874_v28  ;;  %v1381_v24 = vld [vmem:[%s2678_s2 + $0x90] sm:$0xff]  ;;  %v431_v35 = vmul.f32 %v1377_v37, %v1921_v7  ;;  %v1393_v10 = vld [vmem:[%s2678_s2 + $0xa8] sm:$0xff]  ;;  %v407_v28 = vmul.f32 %v1906_v54, %v1906_v54 }
  0x7c   :  { %v234_v5 = vadd.f32 %v233_v57, %v212_v61  ;;  %v166_v38 = vadd.f32 %v165_v15, %v144_v23 }
  0x7e   :  { %v256_v4 = vadd.f32 %v255_v55, %v234_v5  ;;  %v188_v42 = vadd.f32 %v187_v17, %v166_v38  ;;  %v387_v55 = vmul.f32 %v1369_v0, %v1885_v36  ;;  %v409_v5 = vmul.f32 %v1373_v8, %v1906_v54 }
  0x7f   :  { %v453_v17 = vmul.f32 %v1381_v24, %v1945_v34  ;;  %v429_v36 = vmul.f32 %v1921_v7, %v1921_v7  ;;  %v451_v54 = vmul.f32 %v1945_v34, %v1945_v34  ;;  %v473_v7 = vmul.f32 %v1954_v41, %v1954_v41  ;;  %v1413_v24 = vld [vmem:[%s2678_s2 + $0xd0] sm:$0xff] }
  0x80   :  { %v278_v3 = vadd.f32 %v277_v6, %v256_v4  ;;  %v210_v46 = vadd.f32 %v209_v29, %v188_v42  ;;  %v495_v34 = vmul.f32 %v1965_v49, %v1965_v49 }
  0x82   :  { %v300_v16 = vadd.f32 %v299_v25, %v278_v3  ;;  %v232_v19 = vadd.f32 %v231_v45, %v210_v46  ;;  %v1385_v25 = vld [vmem:[%s2678_s2 + $0x98] sm:$0xff]  ;;  %v1389_v3 = vld [vmem:[%s2678_s2 + $0xa0] sm:$0xff]  ;;  %v1397_v45 = vld [vmem:[%s2678_s2 + $0xb0] sm:$0xff] }
  0x83   :  { %v475_v38 = vmul.f32 %v1385_v25, %v1954_v41  ;;  %v1401_v46 = vld [vmem:[%s2678_s2 + $0xb8] sm:$0xff]  ;;  %v541_v8 = vmul.f32 %v1397_v45, %v2001_v31  ;;  %v517_v41 = vmul.f32 %v1986_v9, %v1986_v9 }
  0x84   :  { %v322_v57 = vadd.f32 %v321_v32, %v300_v16  ;;  %v254_v6 = vadd.f32 %v253_v56, %v232_v19  ;;  %v1433_v45 = vld [vmem:[%s2678_s2 + $0xf8] sm:$0xff] }
  0x86   :  { %v344_v61 = vadd.f32 %v343_v51, %v322_v57  ;;  %v276_v4 = vadd.f32 %v275_v13, %v254_v6  ;;  %v497_v51 = vmul.f32 %v1389_v3, %v1965_v49  ;;  %v519_v57 = vmul.f32 %v1393_v10, %v1986_v9 }
  0x87   :  { %v563_v13 = vmul.f32 %v1401_v46, %v2025_v53  ;;  %v539_v49 = vmul.f32 %v2001_v31, %v2001_v31  ;;  %v561_v9 = vmul.f32 %v2025_v53, %v2025_v53  ;;  %v583_v31 = vmul.f32 %v2034_v1, %v2034_v1 }
  0x88   :  { %v366_v62 = vadd.f32 %v365_v60, %v344_v61  ;;  %v298_v48 = vadd.f32 %v297_v22, %v276_v4  ;;  %v605_v53 = vmul.f32 %v2045_v11, %v2045_v11 }
  0x8a   :  { %v388_v15 = vadd.f32 %v387_v55, %v366_v62  ;;  %v320_v29 = vadd.f32 %v319_v30, %v298_v48  ;;  %v1405_v55 = vld [vmem:[%s2678_s2 + $0xc0] sm:$0xff]  ;;  %v1409_v62 = vld [vmem:[%s2678_s2 + $0xc8] sm:$0xff]  ;;  %v1417_v30 = vld [vmem:[%s2678_s2 + $0xd8] sm:$0xff] }
  0x8b   :  { %v585_v6 = vmul.f32 %v1405_v55, %v2034_v1  ;;  %v1421_v48 = vld [vmem:[%s2678_s2 + $0xe0] sm:$0xff]  ;;  %v651_v3 = vmul.f32 %v1417_v30, %v2081_v58  ;;  %v627_v1 = vmul.f32 %v2066_v40, %v2066_v40  ;;  %v1457_v30 = vld [vmem:[%s2678_s2 + $0x128] sm:$0xff] }
  0x8c   :  { %v410_v23 = vadd.f32 %v409_v5, %v388_v15  ;;  %v342_v42 = vadd.f32 %v341_v47, %v320_v29 }
  0x8e   :  { %v432_v32 = vadd.f32 %v431_v35, %v410_v23  ;;  %v364_v60 = vadd.f32 %v363_v59, %v342_v42  ;;  %v607_v35 = vmul.f32 %v1409_v62, %v2045_v11  ;;  %v629_v23 = vmul.f32 %v1413_v24, %v2066_v40  ;;  %v1453_v24 = vld [vmem:[%s2678_s2 + $0x120] sm:$0xff] }
  0x8f   :  { %v673_v59 = vmul.f32 %v1421_v48, %v2105_v27  ;;  %v649_v11 = vmul.f32 %v2081_v58, %v2081_v58  ;;  %v671_v40 = vmul.f32 %v2105_v27, %v2105_v27  ;;  %v693_v58 = vmul.f32 %v2114_v39, %v2114_v39  ;;  %v1461_v48 = vld [vmem:[%s2678_s2 + $0x130] sm:$0xff] }
  0x90   :  { %v454_v16 = vadd.f32 %v453_v17, %v432_v32  ;;  %v386_v61 = vadd.f32 %v385_v20, %v364_v60  ;;  %v715_v27 = vmul.f32 %v2125_v50, %v2125_v50 }
  0x92   :  { %v476_v0 = vadd.f32 %v475_v38, %v454_v16  ;;  %v408_v37 = vadd.f32 %v407_v28, %v386_v61  ;;  %v1425_v38 = vld [vmem:[%s2678_s2 + $0xe8] sm:$0xff]  ;;  %v1429_v16 = vld [vmem:[%s2678_s2 + $0xf0] sm:$0xff]  ;;  %v1437_v28 = vld [vmem:[%s2678_s2 + $0x100] sm:$0xff] }
  0x93   :  { %v695_v42 = vmul.f32 %v1425_v38, %v2114_v39  ;;  %v1441_v61 = vld [vmem:[%s2678_s2 + $0x108] sm:$0xff]  ;;  %v761_v55 = vmul.f32 %v1437_v28, %v2161_v44  ;;  %v737_v39 = vmul.f32 %v2146_v21, %v2146_v21  ;;  %v1465_v38 = vld [vmem:[%s2678_s2 + $0x138] sm:$0xff] }
  0x94   :  { %v498_v56 = vadd.f32 %v497_v51, %v476_v0  ;;  %v430_v22 = vadd.f32 %v429_v36, %v408_v37 }
  0x96   :  { %v520_v19 = vadd.f32 %v519_v57, %v498_v56  ;;  %v452_v4 = vadd.f32 %v451_v54, %v430_v22  ;;  %v717_v57 = vmul.f32 %v1429_v16, %v2125_v50  ;;  %v739_v56 = vmul.f32 %v1433_v45, %v2146_v21  ;;  %v1469_v16 = vld [vmem:[%s2678_s2 + $0x140] sm:$0xff] }
  0x97   :  { %v783_v54 = vmul.f32 %v1441_v61, %v2185_v18  ;;  %v759_v50 = vmul.f32 %v2161_v44, %v2161_v44  ;;  %v781_v21 = vmul.f32 %v2185_v18, %v2185_v18  ;;  %v803_v44 = vmul.f32 %v2194_v33, %v2194_v33 }
  0x98   :  { %v542_v5 = vadd.f32 %v541_v8, %v520_v19  ;;  %v474_v17 = vadd.f32 %v473_v7, %v452_v4 }
  0x9a   :  { %v564_v15 = vadd.f32 %v563_v13, %v542_v5  ;;  %v496_v32 = vadd.f32 %v495_v34, %v474_v17  ;;  %v1445_v13 = vld [vmem:[%s2678_s2 + $0x110] sm:$0xff]  ;;  %v1449_v5 = vld [vmem:[%s2678_s2 + $0x118] sm:$0xff] }
  0x9b   :  { %v805_v22 = vmul.f32 %v1445_v13, %v2194_v33  ;;  %v1485_v13 = vld [vmem:[%s2678_s2 + $0x160] sm:$0xff] }
  0x9c   :  { %v586_v25 = vadd.f32 %v585_v6, %v564_v15  ;;  %v518_v10 = vadd.f32 %v517_v41, %v496_v32 }
  0x9e   :  { %v608_v47 = vadd.f32 %v607_v35, %v586_v25  ;;  %v540_v20 = vadd.f32 %v539_v49, %v518_v10  ;;  %v2701_v35 = vld [vmem:[#allocation9_spill] sm:$0xff] }
  0x9f   :  { %v827_v4 = vmul.f32 %v1449_v5, %v2701_v35  ;;  %v825_v18 = vmul.f32 %v2701_v35, %v2701_v35  ;;  %v1489_v5 = vld [vmem:[%s2678_s2 + $0x168] sm:$0xff] }
  0xa0   :  { %v630_v29 = vadd.f32 %v629_v23, %v608_v47  ;;  %v562_v60 = vadd.f32 %v561_v9, %v540_v20  ;;  %v2702_v23 = vld [vmem:[#allocation10_spill] sm:$0xff]  ;;  %v1047_v35 = vmul.f32 %v1489_v5, %v2362_v26 }
  0xa1   :  { %v849_v17 = vmul.f32 %v1453_v24, %v2702_v23  ;;  %v847_v33 = vmul.f32 %v2702_v23, %v2702_v23  ;;  %v1493_v24 = vld [vmem:[%s2678_s2 + $0x170] sm:$0xff] }
  0xa2   :  { %v652_v51 = vadd.f32 %v651_v3, %v630_v29  ;;  %v584_v8 = vadd.f32 %v583_v31, %v562_v60  ;;  %v2703_v3 = vld [vmem:[#allocation11_spill] sm:$0xff]  ;;  %v1473_v31 = vld [vmem:[%s2678_s2 + $0x148] sm:$0xff] }
  0xa3   :  { %v871_v32 = vmul.f32 %v1457_v30, %v2703_v3 }
  0xa4   :  { %v674_v0 = vadd.f32 %v673_v59, %v652_v51  ;;  %v606_v19 = vadd.f32 %v605_v53, %v584_v8  ;;  %v2704_v59 = vld [vmem:[#allocation12_spill] sm:$0xff]  ;;  %v1477_v53 = vld [vmem:[%s2678_s2 + $0x150] sm:$0xff] }
  0xa5   :  { %v893_v10 = vmul.f32 %v1461_v48, %v2704_v59 }
  0xa6   :  { %v696_v46 = vadd.f32 %v695_v42, %v674_v0  ;;  %v628_v62 = vadd.f32 %v627_v1, %v606_v19  ;;  %v915_v42 = vmul.f32 %v1465_v38, %v2274_v52  ;;  %v2705_v0 = vld [vmem:[#allocation13_spill] sm:$0xff]  ;;  %v1481_v1 = vld [vmem:[%s2678_s2 + $0x158] sm:$0xff] }
  0xa8   :  { %v718_v36 = vadd.f32 %v717_v57, %v696_v46  ;;  %v650_v7 = vadd.f32 %v649_v11, %v628_v62  ;;  %v937_v57 = vmul.f32 %v1469_v16, %v2705_v0  ;;  %v2706_v46 = vld [vmem:[#allocation14_spill] sm:$0xff]  ;;  %v869_v11 = vmul.f32 %v2703_v3, %v2703_v3 }
  0xaa   :  { %v740_v37 = vadd.f32 %v739_v56, %v718_v36  ;;  %v672_v34 = vadd.f32 %v671_v40, %v650_v7  ;;  %v959_v56 = vmul.f32 %v1473_v31, %v2706_v46  ;;  %v2707_v36 = vld [vmem:[#allocation15_spill] sm:$0xff]  ;;  %v891_v40 = vmul.f32 %v2704_v59, %v2704_v59 }
  0xab   :  { %v1023_v59 = vmul.f32 %v2354_v14, %v2354_v14 }
  0xac   :  { %v762_v6 = vadd.f32 %v761_v55, %v740_v37  ;;  %v694_v41 = vadd.f32 %v693_v58, %v672_v34  ;;  %v981_v55 = vmul.f32 %v1477_v53, %v2707_v36  ;;  %v913_v58 = vmul.f32 %v2274_v52, %v2274_v52 }
  0xad   :  { %v935_v34 = vmul.f32 %v2705_v0, %v2705_v0  ;;  %v957_v52 = vmul.f32 %v2706_v46, %v2706_v46 }
  0xae   :  { %v784_v15 = vadd.f32 %v783_v54, %v762_v6  ;;  %v716_v49 = vadd.f32 %v715_v27, %v694_v41  ;;  %v1003_v54 = vmul.f32 %v1481_v1, %v2345_v2  ;;  %v1497_v27 = vld [vmem:[%s2678_s2 + $0x178] sm:$0xff] }
  0xb0   :  { %v806_v25 = vadd.f32 %v805_v22, %v784_v15  ;;  %v738_v9 = vadd.f32 %v737_v39, %v716_v49  ;;  %v1025_v22 = vmul.f32 %v1485_v13, %v2354_v14  ;;  %v1091_v39 = vmul.f32 %v1497_v27, %v2383_v12 }
  0xb2   :  { %v828_v47 = vadd.f32 %v827_v4, %v806_v25  ;;  %v760_v20 = vadd.f32 %v759_v50, %v738_v9  ;;  %v1069_v25 = vmul.f32 %v1493_v24, %v2376_v63  ;;  %v1001_v50 = vmul.f32 %v2345_v2, %v2345_v2 }
  0xb4   :  { %v850_v29 = vadd.f32 %v849_v17, %v828_v47  ;;  %v782_v60 = vadd.f32 %v781_v21, %v760_v20  ;;  %v1501_v17 = vld [vmem:[%s2678_s2 + $0x180] sm:$0xff]  ;;  %v979_v47 = vmul.f32 %v2707_v36, %v2707_v36  ;;  %v1045_v21 = vmul.f32 %v2362_v26, %v2362_v26 }
  0xb5   :  { %v1089_v20 = vmul.f32 %v2383_v12, %v2383_v12 }
  0xb6   :  { %v872_v51 = vadd.f32 %v871_v32, %v850_v29  ;;  %v804_v8 = vadd.f32 %v803_v44, %v782_v60  ;;  %v1113_v32 = vmul.f32 %v1501_v17, %v2392_v43  ;;  %v1111_v44 = vmul.f32 %v2392_v43, %v2392_v43 }
  0xb8   :  { %v894_v45 = vadd.f32 %v893_v10, %v872_v51  ;;  %v826_v19 = vadd.f32 %v825_v18, %v804_v8  ;;  %v1067_v51 = vmul.f32 %v2376_v63, %v2376_v63 }
  0xba   :  { %v916_v28 = vadd.f32 %v915_v42, %v894_v45  ;;  %v848_v62 = vadd.f32 %v847_v33, %v826_v19 }
  0xbc   :  { %v938_v61 = vadd.f32 %v937_v57, %v916_v28  ;;  %v870_v7 = vadd.f32 %v869_v11, %v848_v62 }
  0xbe   :  { %v960_v37 = vadd.f32 %v959_v56, %v938_v61  ;;  %v892_v4 = vadd.f32 %v891_v40, %v870_v7 }
  0xc0   :  { %v982_v6 = vadd.f32 %v981_v55, %v960_v37  ;;  %v914_v23 = vadd.f32 %v913_v58, %v892_v4 }
  0xc2   :  { %v1004_v15 = vadd.f32 %v1003_v54, %v982_v6  ;;  %v936_v48 = vadd.f32 %v935_v34, %v914_v23 }
  0xc4   :  { %v1026_v30 = vadd.f32 %v1025_v22, %v1004_v15  ;;  %v958_v49 = vadd.f32 %v957_v52, %v936_v48 }
  0xc6   :  { %v1048_v41 = vadd.f32 %v1047_v35, %v1026_v30  ;;  %v980_v29 = vadd.f32 %v979_v47, %v958_v49 }
  0xc8   :  { %v1070_v3 = vadd.f32 %v1069_v25, %v1048_v41  ;;  %v1002_v9 = vadd.f32 %v1001_v50, %v980_v29 }
  0xca   :  { %v1092_v38 = vadd.f32 %v1091_v39, %v1070_v3  ;;  %v1024_v16 = vadd.f32 %v1023_v59, %v1002_v9 }
  0xcc   :  { %v1114_v10 = vadd.f32 %v1113_v32, %v1092_v38  ;;  %v1046_v42 = vadd.f32 %v1045_v21, %v1024_v16 }
  0xce   :  { %1142 = vadd.xlane.f32.xlu1 %v1114_v10  ;;  %v1068_v2 = vadd.f32 %v1067_v51, %v1046_v42 }
  0xd0   :  { %v1090_v31 = vadd.f32 %v1089_v20, %v1068_v2 }
  0xd2   :  { %v1112_v14 = vadd.f32 %v1111_v44, %v1090_v31 }
  0xd4   :  { %1129 = vadd.xlane.f32.xlu0 %v1112_v14 }
  0xeb   :  { %v1117_v45 = vpop.xlane.xlu0 %1116 }
  0xec   :  { %v1118_v0 = vrot.slane %v1117_v45, 4 }
  0xee   :  { %v1119_v57 = vadd.f32 %v1118_v0, %v1117_v45 }
  0xf0   :  { %v1120_v26 = vrot.slane %v1119_v57, 2 }
  0xf2   :  { %v1121_v60 = vadd.f32 %v1120_v26, %v1119_v57 }
  0xf4   :  { %v1122_v18 = vrot.slane %v1121_v60, 1 }
  0xf6   :  { %v1123_v53 = vadd.f32 %v1122_v18, %v1121_v60 }
  0xf8   :  { %1510 = vpush %v1123_v53 }
 0x129   :  { %s1511_s2 = spop %1510 }
 0x12a   :  { %s2665_s17 = smul.f32 1.9929847e-05, %s1511_s2 }
 0x12c   :  { %s1166_s20 = smul.f32 %s2665_s17, %s2665_s17 }
 0x12d   :  { %s1186_s4 = smul.f32 %s1506_s27, %s2665_s17 }
 0x141   :  { %v1143_v63 = vpop.xlane.xlu1 %1142 }
 0x142   :  { %v1144_v28 = vrot.slane %v1143_v63, 4 }
 0x144   :  { %v1145_v46 = vadd.f32 %v1144_v28, %v1143_v63 }
 0x146   :  { %v1146_v56 = vrot.slane %v1145_v46, 2 }
 0x147   :  { %v1130_v12 = vpop.xlane.xlu0 %1129 }
 0x148   :  { %v1131_v8 = vrot.slane %v1130_v12, 4  ;;  %v1147_v33 = vadd.f32 %v1146_v56, %v1145_v46 }
 0x14a   :  { %v1132_v1 = vadd.f32 %v1131_v8, %v1130_v12  ;;  %v1148_v61 = vrot.slane %v1147_v33, 1 }
 0x14c   :  { %v1133_v43 = vrot.slane %v1132_v1, 2  ;;  %v1149_v19 = vadd.f32 %v1148_v61, %v1147_v33 }
 0x14e   :  { %v1134_v36 = vadd.f32 %v1133_v43, %v1132_v1 }
 0x150   :  { %v1135_v55 = vrot.slane %v1134_v36, 1 }
 0x152   :  { %v1136_v11 = vadd.f32 %v1135_v55, %v1134_v36 }
 0x154   :  { %1512 = vpush %v1136_v11 }
 0x155   :  { %1514 = vpush %v1149_v19 }
 0x185   :  { %s1513_s21 = spop %1512 }
 0x186   :  { %s1165_s18 = smul.f32 1.9929847e-05, %s1513_s21  ;;  %s1515_s30 = spop %1514 }
 0x187   :  { %s1187_s6 = ssub.f32 %s1515_s30, %s1186_s4 }
 0x188   :  { %s1167_s23 = ssub.f32 %s1165_s18, %s1166_s20 }
 0x18a   :  { %s1168_s19 = smax.f32 %s1552_s24, %s1167_s23 }
 0x18b   :  { %s1170_s0 = smul.f32 %s1169_s22, %s1168_s19 }
 0x18d   :  { %s1171_s25 = sadd.f32 1e-05, %s1170_s0 }
 0x18f   :  { %v1172_v13 = vstv %s1171_s25 }
 0x190   :  { %1521 = vrsqrt.f32 %v1172_v13  ;;  %vm1179_vm1 = vweird.f32 %v1172_v13 }
 0x196   :  { %v1522_v37 = vpop.eup %1521 }
 0x197   :  { %v1174_v54 = vmul.f32 %v1522_v37, %v1172_v13  ;;  %vm1180_vm0 = vweird.f32 %v1522_v37 }
 0x198   :  { %vm1181_vm2 = vmor %vm1179_vm1, %vm1180_vm0 }
 0x199   :  { %v1175_v62 = vmul.f32 %v1522_v37, %v1174_v54 }
 0x19b   :  { %v1176_v40 = vmul.f32 0.5, %v1175_v62 }
 0x19d   :  { %v1177_v5 = vsub.f32 1.5, %v1176_v40 }
 0x19f   :  { %v1178_v6 = vmul.f32 %v1522_v37, %v1177_v5 }
 0x1a1   :  { %v1182_v22 = vsel %vm1181_vm2, %v1522_v37, %v1178_v6 }
 0x1a2   :  { %1516 = vpush %v1182_v22 }
 0x1d3   :  { %s1517_s5 = spop %1516 }
 0x1d4   :  { %s1185_s7 = smul.f32 %s1517_s5, %s1184_s28 }
 0x1d6   :  { %s1188_s10 = smul.f32 %s1187_s6, %s1185_s7 }
 0x1d8   :  { %s1189_s11 = sadd.f32 %s1507_s29, %s1188_s10 }
 0x1da   :  { %1191 = sst [smem:[#allocation5]] %s1189_s11 }
 0x1db   :  { %1200 = dma.smem_to_hbm %s1553_s12, 16, %s1198_s1, [#allocation6]  }
 0x1dc   :  { %1549 = dma.done.wait [#allocation6], 16  }
 0x1dd   :  { %1550 = vsyncadd [#allocation6], 4294967280 }
 0x1de   :  { %1205 = sfence }
 0x1df   :  { %1206 = vsyncpa [#allocation6], 1 }

</bundles_post_ra>
